<compile_context>
chip_gen: v7x
topology: tpu7x:2x2x1
jax: 0.10.0
libtpu: 0.0.40
codegen_flags: <defaults>
</compile_context>

<pallas_src>
import jax
import jax.numpy as jnp
from jax.experimental import pallas as pl
from jax.experimental.pallas import tpu as pltpu

# ----- hyperparameters implied by the PyTorch module -----
VOCAB_SIZE = 1000        # synthetic stand-in for the DistilBert tokenizer vocab
EMBEDDING_DIM = 128
HIDDEN_SIZE = 64
FC_HIDDEN = 64
OUTPUT_SIZE = 3
MAX_LENGTH = 8           # sequence length
BATCH = 2

# padded (lane/sublane-aligned) widths used inside the kernel
HP = 128                                              # per-gate width padded to 128 lanes
FC_PAD = 128                                          # fc1 hidden width padded
OUT_PAD = 128                                         # output width padded (lane-dense store)
VOCAB_PAD = ((VOCAB_SIZE + 127) // 128) * 128         # 1024: one-hot contraction dim
BATCH_TILE = 8                                        # sublane batch tile / grid unit


def lstm_fc_kernel(tok_ref,       # VMEM (BT, T)           int32 tokens of this batch tile
                   emb_ref,       # VMEM (Vp, E)           bf16  embedding table (resident)
                   wih_f_ref,     # VMEM (E, 4*Hp)         bf16  forward input projection
                   wih_b_ref,     # VMEM (E, 4*Hp)         bf16  backward input projection
                   bias_f_ref,    # VMEM (1, 4*Hp)         f32   folded b_ih+b_hh (fwd)
                   bias_b_ref,    # VMEM (1, 4*Hp)         f32   folded b_ih+b_hh (bwd)
                   whh_f_ref,     # VMEM (Hp, 4*Hp)        bf16  forward recurrent weights
                   w1f_ref,       # VMEM (Hp, FC_PAD)      bf16  fc1, forward-h half
                   w1b_ref,       # VMEM (Hp, FC_PAD)      bf16  fc1, backward-h half
                   b1_ref,        # VMEM (1, FC_PAD)       f32
                   w2_ref,        # VMEM (FC_PAD, OUT_PAD) bf16
                   b2_ref,        # VMEM (1, OUT_PAD)      f32
                   out_ref,       # VMEM (BT, OUT_PAD)     f32
                   xg_vmem):      # scratch VMEM (T*BT, 4*Hp) f32  forward x-gates
    BT, T = tok_ref.shape
    Vp, _ = emb_ref.shape
    Hp = whh_f_ref.shape[0]

    # ---- 1) embedding gather via one-hot MXU matmuls (exact row selection; no DMAs).
    tok = tok_ref[...]                                              # (BT, T) int32
    lane_ids = jax.lax.broadcasted_iota(jnp.int32, (BT, Vp), 1)     # hoisted out of loop
    x_parts = []
    for t in range(T):
        onehot = jnp.where(lane_ids == tok[:, t:t + 1], 1.0, 0.0).astype(jnp.bfloat16)
        x_parts.append(jnp.dot(onehot, emb_ref[...],
                               preferred_element_type=jnp.float32))  # (BT, E), exact
    x = jnp.concatenate(x_parts, axis=0).astype(jnp.bfloat16)        # (T*BT, E) time-major

    # ---- 2) hoisted FORWARD input projection: ONE matmul for all timesteps.
    #         (backward x-gates are NOT computed here -- only the last step needs them)
    xg_vmem[...] = (jnp.dot(x, wih_f_ref[...], preferred_element_type=jnp.float32)
                    + bias_f_ref[...])

    # ---- 3) forward recurrence: only h @ W_hh remains inside the serial loop.
    h = jnp.zeros((BT, Hp), jnp.float32)
    c = jnp.zeros((BT, Hp), jnp.float32)
    for t in range(T):   # T == 8: static unroll (lax.fori_loop(unroll=True) if T grows)
        gates = (xg_vmem[pl.ds(t * BT, BT), :]
                 + jnp.dot(h.astype(jnp.bfloat16), whh_f_ref[...],
                           preferred_element_type=jnp.float32))
        # gate order i, f, g, o; each gate occupies one full 128-lane tile
        i = jax.nn.sigmoid(gates[:, 0 * Hp:1 * Hp])
        f = jax.nn.sigmoid(gates[:, 1 * Hp:2 * Hp])
        g = jnp.tanh(gates[:, 2 * Hp:3 * Hp])
        o = jax.nn.sigmoid(gates[:, 3 * Hp:4 * Hp])
        c = f * c + i * g
        h = o * jnp.tanh(c)
    h_fwd = h

    # ---- 4) backward direction.
    # PyTorch's lstm_out[:, -1, H:] is the backward LSTM's hidden state after its
    # FIRST step (it consumes x[:, T-1] first) from zero state, so ONE cell step with
    # h0 = c0 = 0 reproduces forward() exactly; h0 @ W_hh_bwd == 0 so W_hh_bwd is
    # never needed.  (Valid only because the head consumes the last timestep only.)
    x_last = x_parts[T - 1].astype(jnp.bfloat16)                    # (BT, E)
    gb = (jnp.dot(x_last, wih_b_ref[...], preferred_element_type=jnp.float32)
          + bias_b_ref[...])
    i_b = jax.nn.sigmoid(gb[:, 0 * Hp:1 * Hp])
    g_b = jnp.tanh(gb[:, 2 * Hp:3 * Hp])
    o_b = jax.nn.sigmoid(gb[:, 3 * Hp:4 * Hp])
    h_bwd = o_b * jnp.tanh(i_b * g_b)                               # f * c0 == 0

    # ---- 5) fc head, concat-free: fc1 split into fwd/bwd partial products.
    hidden = (jnp.dot(h_fwd.astype(jnp.bfloat16), w1f_ref[...],
                      preferred_element_type=jnp.float32)
              + jnp.dot(h_bwd.astype(jnp.bfloat16), w1b_ref[...],
                        preferred_element_type=jnp.float32)
              + b1_ref[...])
    hidden = jnp.maximum(hidden, 0.0)    # ReLU; Dropout(0.3) is identity at inference
    out_ref[...] = (jnp.dot(hidden.astype(jnp.bfloat16), w2_ref[...],
                            preferred_element_type=jnp.float32)
                    + b2_ref[...])


# ---------------- one-time parameter layout conversion (NOT per call) ----------------
def _pad_gate_cols(w_t, H, Hp):
    """(in, 4H) -> (in, 4*Hp): each gate block zero-padded from H to Hp lanes."""
    return jnp.concatenate(
        [jnp.pad(w_t[:, k * H:(k + 1) * H], ((0, 0), (0, Hp - H))) for k in range(4)],
        axis=1)


def _pad_gate_bias(b, H, Hp):
    """(4H,) -> (1, 4*Hp) with per-gate zero padding."""
    return jnp.concatenate(
        [jnp.pad(b[k * H:(k + 1) * H], (0, Hp - H)) for k in range(4)]).reshape(1, 4 * Hp)


def prepare_params(params):
    """Transpose / fold / pad / bf16-cast PyTorch-layout parameters, once."""
    H, Hp = HIDDEN_SIZE, HP

    # embedding table padded to a 128-multiple row count, bf16, VMEM-resident in kernel
    emb = jnp.pad(params["embedding"],
                  ((0, VOCAB_PAD - VOCAB_SIZE), (0, 0))).astype(jnp.bfloat16)

    wih_f = _pad_gate_cols(params["w_ih_f"].T, H, Hp).astype(jnp.bfloat16)   # (E, 4Hp)
    wih_b = _pad_gate_cols(params["w_ih_b"].T, H, Hp).astype(jnp.bfloat16)   # (E, 4Hp)
    bias_f = _pad_gate_bias(params["b_ih_f"] + params["b_hh_f"], H, Hp)      # (1, 4Hp) f32
    bias_b = _pad_gate_bias(params["b_ih_b"] + params["b_hh_b"], H, Hp)      # (1, 4Hp) f32

    whh_f = _pad_gate_cols(params["w_hh_f"].T, H, Hp)                        # (H, 4Hp)
    whh_f = jnp.pad(whh_f, ((0, Hp - H), (0, 0))).astype(jnp.bfloat16)       # (Hp, 4Hp)
    # W_hh_bwd intentionally dropped: only the backward LSTM's first step is consumed.

    w1 = params["fc1_w"].T                                                   # (2H, FC_HIDDEN)
    w1f = jnp.pad(w1[:H], ((0, Hp - H), (0, FC_PAD - FC_HIDDEN))).astype(jnp.bfloat16)
    w1b = jnp.pad(w1[H:], ((0, Hp - H), (0, FC_PAD - FC_HIDDEN))).astype(jnp.bfloat16)
    b1 = jnp.pad(params["fc1_b"], (0, FC_PAD - FC_HIDDEN)).reshape(1, FC_PAD)

    w2 = jnp.pad(params["fc2_w"].T,
                 ((0, FC_PAD - FC_HIDDEN),
                  (0, OUT_PAD - OUTPUT_SIZE))).astype(jnp.bfloat16)          # (FC_PAD, OUT_PAD)
    b2 = jnp.pad(params["fc2_b"], (0, OUT_PAD - OUTPUT_SIZE)).reshape(1, OUT_PAD)

    return {"embedding": emb, "wih_f": wih_f, "wih_b": wih_b,
            "bias_f": bias_f, "bias_b": bias_b, "whh_f": whh_f,
            "w1f": w1f, "w1b": w1b, "b1": b1, "w2": w2, "b2": b2}


def lstm_model_forward(tokens, kp):
    B, T = tokens.shape
    BT = BATCH_TILE
    Bp = ((B + BT - 1) // BT) * BT                       # pad batch to sublane multiple
    ntiles = Bp // BT
    tok_p = jnp.pad(tokens.astype(jnp.int32), ((0, Bp - B), (0, 0)))

    E, Hp, G = EMBEDDING_DIM, HP, 4 * HP

    def wspec(shape):                                    # weights: same block every step
        return pl.BlockSpec(shape, lambda i: (0, 0))

    out_p = pl.pallas_call(
        lstm_fc_kernel,
        out_shape=jax.ShapeDtypeStruct((Bp, OUT_PAD), jnp.float32),
        grid=(ntiles,),                                  # batch tiles; v7x: 2-TC parallel
        in_specs=[
            pl.BlockSpec((BT, T), lambda i: (i, 0)),     # tokens (one batch tile / step)
            wspec((VOCAB_PAD, E)),                       # embedding table (VMEM resident)
            wspec((E, G)), wspec((E, G)),                # W_ih fwd / bwd
            wspec((1, G)), wspec((1, G)),                # folded biases fwd / bwd
            wspec((Hp, G)),                              # W_hh fwd
            wspec((Hp, FC_PAD)), wspec((Hp, FC_PAD)),    # fc1 fwd / bwd halves
            wspec((1, FC_PAD)),                          # fc1 bias
            wspec((FC_PAD, OUT_PAD)),                    # fc2
            wspec((1, OUT_PAD)),                         # fc2 bias
        ],
        out_specs=pl.BlockSpec((BT, OUT_PAD), lambda i: (i, 0)),
        scratch_shapes=[pltpu.VMEM((T * BT, G), jnp.float32)],   # forward x-gates only
        compiler_params=pltpu.CompilerParams(dimension_semantics=("parallel",)),
    )(tok_p, kp["embedding"], kp["wih_f"], kp["wih_b"], kp["bias_f"], kp["bias_b"],
      kp["whh_f"], kp["w1f"], kp["w1b"], kp["b1"], kp["w2"], kp["b2"])

    return out_p[:B, :OUTPUT_SIZE]


# ---------------- pure-JAX reference (full bidirectional, PyTorch semantics) ----------
def reference_forward(tokens, params):
    emb = params["embedding"][tokens]
    B, T, _ = emb.shape
    H = HIDDEN_SIZE

    def run_dir(seq, w_ih, w_hh, b_ih, b_hh):
        h = jnp.zeros((B, H), jnp.float32)
        c = jnp.zeros((B, H), jnp.float32)
        outs = []
        for t in range(T):
            x_t = seq[:, t, :]
            gates = x_t @ w_ih.T + b_ih + h @ w_hh.T + b_hh
            i = jax.nn.sigmoid(gates[:, :H])
            f = jax.nn.sigmoid(gates[:, H:2 * H])
            g = jnp.tanh(gates[:, 2 * H:3 * H])
            o = jax.nn.sigmoid(gates[:, 3 * H:])
            c = f * c + i * g
            h = o * jnp.tanh(c)
            outs.append(h)
        return jnp.stack(outs, axis=1)

    fwd = run_dir(emb, params["w_ih_f"], params["w_hh_f"],
                  params["b_ih_f"], params["b_hh_f"])
    bwd = run_dir(emb[:, ::-1, :], params["w_ih_b"], params["w_hh_b"],
                  params["b_ih_b"], params["b_hh_b"])[:, ::-1, :]
    lstm_out = jnp.concatenate([fwd, bwd], axis=-1)
    feat = lstm_out[:, -1, :]
    hidden = jnp.maximum(feat @ params["fc1_w"].T + params["fc1_b"], 0.0)
    # Dropout(0.3) is identity at inference.
    return hidden @ params["fc2_w"].T + params["fc2_b"]


def init_params(key):
    H, E, V, O = HIDDEN_SIZE, EMBEDDING_DIM, VOCAB_SIZE, OUTPUT_SIZE
    ks = jax.random.split(key, 12)
    s = 0.1
    return {
        "embedding": s * jax.random.normal(ks[0], (V, E), jnp.float32),
        "w_ih_f": s * jax.random.normal(ks[1], (4 * H, E), jnp.float32),
        "w_hh_f": s * jax.random.normal(ks[2], (4 * H, H), jnp.float32),
        "b_ih_f": s * jax.random.normal(ks[3], (4 * H,), jnp.float32),
        "b_hh_f": s * jax.random.normal(ks[4], (4 * H,), jnp.float32),
        "w_ih_b": s * jax.random.normal(ks[5], (4 * H, E), jnp.float32),
        "w_hh_b": s * jax.random.normal(ks[6], (4 * H, H), jnp.float32),
        "b_ih_b": s * jax.random.normal(ks[7], (4 * H,), jnp.float32),
        "b_hh_b": s * jax.random.normal(ks[8], (4 * H,), jnp.float32),
        "fc1_w": s * jax.random.normal(ks[9], (FC_HIDDEN, 2 * H), jnp.float32),
        "fc1_b": s * jax.random.normal(ks[10], (FC_HIDDEN,), jnp.float32),
        "fc2_w": s * jax.random.normal(ks[11], (O, FC_HIDDEN), jnp.float32),
        "fc2_b": jnp.zeros((O,), jnp.float32),
    }


if __name__ == "__main__":
    key = jax.random.PRNGKey(0)
    k_params, k_tok = jax.random.split(key)
    params = init_params(k_params)
    tokens = jax.random.randint(k_tok, (BATCH, MAX_LENGTH), 0, VOCAB_SIZE,
                                dtype=jnp.int32)

    # One-time layout conversion (transpose / bias fold / gate padding / bf16 cast).
    kparams = jax.tree_util.tree_map(jax.block_until_ready, prepare_params(params))

    fwd = jax.jit(lstm_model_forward)
    out = jax.block_until_ready(fwd(tokens, kparams))

    ref = jax.block_until_ready(reference_forward(tokens, params))
    assert out.shape == (BATCH, OUTPUT_SIZE)
    # bf16 weight/embedding quantization contributes ~1e-3 absolute on ~0.1-scale
    # outputs; 2e-2 is a comfortable mixed-precision tolerance vs the f32 reference.
    assert jnp.allclose(out, ref, rtol=2e-2, atol=2e-2), (out, ref)
    print("KERNEL_OK")
</pallas_src>

<mosaic_0001>
module attributes {stable_mosaic.version = 11 : i64} {
  func.func @lstm_fc_kernel(%arg0: i32, %arg1: memref<8x8xi32, #tpu.memory_space<vmem>>, %arg2: memref<1024x128xbf16, #tpu.memory_space<vmem>>, %arg3: memref<128x512xbf16, #tpu.memory_space<vmem>>, %arg4: memref<128x512xbf16, #tpu.memory_space<vmem>>, %arg5: memref<1x512xf32, #tpu.memory_space<vmem>>, %arg6: memref<1x512xf32, #tpu.memory_space<vmem>>, %arg7: memref<128x512xbf16, #tpu.memory_space<vmem>>, %arg8: memref<128x128xbf16, #tpu.memory_space<vmem>>, %arg9: memref<128x128xbf16, #tpu.memory_space<vmem>>, %arg10: memref<1x128xf32, #tpu.memory_space<vmem>>, %arg11: memref<128x128xbf16, #tpu.memory_space<vmem>>, %arg12: memref<1x128xf32, #tpu.memory_space<vmem>>, %arg13: memref<8x128xf32, #tpu.memory_space<vmem>>, %arg14: memref<64x512xf32, #tpu.memory_space<vmem>>) attributes {dimension_semantics = [#tpu.dimension_semantics<parallel>], iteration_bounds = array<i64: 1>, scalar_prefetch = 0 : i64, scratch_operands = 1 : i64, tpu.core_type = #tpu.core_type<tc>, window_params = [{transform_indices = @transform_0, window_bounds = array<i64: 8, 8>}, {pipeline_mode = #tpu.pipeline_mode<synchronous>, transform_indices = @transform_1, window_bounds = array<i64: 1024, 128>}, {pipeline_mode = #tpu.pipeline_mode<synchronous>, transform_indices = @transform_2, window_bounds = array<i64: 128, 512>}, {pipeline_mode = #tpu.pipeline_mode<synchronous>, transform_indices = @transform_3, window_bounds = array<i64: 128, 512>}, {pipeline_mode = #tpu.pipeline_mode<synchronous>, transform_indices = @transform_4, window_bounds = array<i64: 1, 512>}, {pipeline_mode = #tpu.pipeline_mode<synchronous>, transform_indices = @transform_5, window_bounds = array<i64: 1, 512>}, {pipeline_mode = #tpu.pipeline_mode<synchronous>, transform_indices = @transform_6, window_bounds = array<i64: 128, 512>}, {pipeline_mode = #tpu.pipeline_mode<synchronous>, transform_indices = @transform_7, window_bounds = array<i64: 128, 128>}, {pipeline_mode = #tpu.pipeline_mode<synchronous>, transform_indices = @transform_8, window_bounds = array<i64: 128, 128>}, {pipeline_mode = #tpu.pipeline_mode<synchronous>, transform_indices = @transform_9, window_bounds = array<i64: 1, 128>}, {pipeline_mode = #tpu.pipeline_mode<synchronous>, transform_indices = @transform_10, window_bounds = array<i64: 128, 128>}, {pipeline_mode = #tpu.pipeline_mode<synchronous>, transform_indices = @transform_11, window_bounds = array<i64: 1, 128>}, {transform_indices = @transform_12, window_bounds = array<i64: 8, 128>}]} {
    %c0 = arith.constant 0 : index
    %c0_0 = arith.constant 0 : index
    %0 = vector.load %arg1[%c0, %c0_0] : memref<8x8xi32, #tpu.memory_space<vmem>>, vector<8x8xi32>
    %1 = tpu.iota {dimensions = array<i32: 1>} : vector<8x1024xi32>
    %2 = vector.extract_strided_slice %0 {offsets = [0, 0], sizes = [8, 1], strides = [1, 1]} : vector<8x8xi32> to vector<8x1xi32>
    %3 = vector.broadcast %2 : vector<8x1xi32> to vector<8x1024xi32>
    %4 = arith.cmpi eq, %1, %3 : vector<8x1024xi32>
    %cst = arith.constant 1.000000e+00 : f32
    %cst_1 = arith.constant 0.000000e+00 : f32
    %5 = vector.broadcast %cst : f32 to vector<8x1024xf32>
    %6 = vector.broadcast %cst_1 : f32 to vector<8x1024xf32>
    %7 = arith.select %4, %5, %6 : vector<8x1024xi1>, vector<8x1024xf32>
    %8 = arith.truncf %7 : vector<8x1024xf32> to vector<8x1024xbf16>
    %c0_2 = arith.constant 0 : index
    %c0_3 = arith.constant 0 : index
    %9 = vector.load %arg2[%c0_2, %c0_3] : memref<1024x128xbf16, #tpu.memory_space<vmem>>, vector<1024x128xbf16>
    %cst_4 = arith.constant dense<0.000000e+00> : vector<8x128xf32>
    %10 = tpu.matmul %8, %9, %cst_4 {dimension_numbers = #tpu.dot_dimension_numbers<[1], [0], [0], [1], [0, 0, 1, 1], [], []>} : vector<8x1024xbf16>, vector<1024x128xbf16>, vector<8x128xf32> -> vector<8x128xf32>
    %11 = vector.extract_strided_slice %0 {offsets = [0, 1], sizes = [8, 1], strides = [1, 1]} : vector<8x8xi32> to vector<8x1xi32>
    %12 = vector.broadcast %11 : vector<8x1xi32> to vector<8x1024xi32>
    %13 = arith.cmpi eq, %1, %12 : vector<8x1024xi32>
    %cst_5 = arith.constant 1.000000e+00 : f32
    %cst_6 = arith.constant 0.000000e+00 : f32
    %14 = vector.broadcast %cst_5 : f32 to vector<8x1024xf32>
    %15 = vector.broadcast %cst_6 : f32 to vector<8x1024xf32>
    %16 = arith.select %13, %14, %15 : vector<8x1024xi1>, vector<8x1024xf32>
    %17 = arith.truncf %16 : vector<8x1024xf32> to vector<8x1024xbf16>
    %c0_7 = arith.constant 0 : index
    %c0_8 = arith.constant 0 : index
    %18 = vector.load %arg2[%c0_7, %c0_8] : memref<1024x128xbf16, #tpu.memory_space<vmem>>, vector<1024x128xbf16>
    %cst_9 = arith.constant dense<0.000000e+00> : vector<8x128xf32>
    %19 = tpu.matmul %17, %18, %cst_9 {dimension_numbers = #tpu.dot_dimension_numbers<[1], [0], [0], [1], [0, 0, 1, 1], [], []>} : vector<8x1024xbf16>, vector<1024x128xbf16>, vector<8x128xf32> -> vector<8x128xf32>
    %20 = vector.extract_strided_slice %0 {offsets = [0, 2], sizes = [8, 1], strides = [1, 1]} : vector<8x8xi32> to vector<8x1xi32>
    %21 = vector.broadcast %20 : vector<8x1xi32> to vector<8x1024xi32>
    %22 = arith.cmpi eq, %1, %21 : vector<8x1024xi32>
    %cst_10 = arith.constant 1.000000e+00 : f32
    %cst_11 = arith.constant 0.000000e+00 : f32
    %23 = vector.broadcast %cst_10 : f32 to vector<8x1024xf32>
    %24 = vector.broadcast %cst_11 : f32 to vector<8x1024xf32>
    %25 = arith.select %22, %23, %24 : vector<8x1024xi1>, vector<8x1024xf32>
    %26 = arith.truncf %25 : vector<8x1024xf32> to vector<8x1024xbf16>
    %c0_12 = arith.constant 0 : index
    %c0_13 = arith.constant 0 : index
    %27 = vector.load %arg2[%c0_12, %c0_13] : memref<1024x128xbf16, #tpu.memory_space<vmem>>, vector<1024x128xbf16>
    %cst_14 = arith.constant dense<0.000000e+00> : vector<8x128xf32>
    %28 = tpu.matmul %26, %27, %cst_14 {dimension_numbers = #tpu.dot_dimension_numbers<[1], [0], [0], [1], [0, 0, 1, 1], [], []>} : vector<8x1024xbf16>, vector<1024x128xbf16>, vector<8x128xf32> -> vector<8x128xf32>
    %29 = vector.extract_strided_slice %0 {offsets = [0, 3], sizes = [8, 1], strides = [1, 1]} : vector<8x8xi32> to vector<8x1xi32>
    %30 = vector.broadcast %29 : vector<8x1xi32> to vector<8x1024xi32>
    %31 = arith.cmpi eq, %1, %30 : vector<8x1024xi32>
    %cst_15 = arith.constant 1.000000e+00 : f32
    %cst_16 = arith.constant 0.000000e+00 : f32
    %32 = vector.broadcast %cst_15 : f32 to vector<8x1024xf32>
    %33 = vector.broadcast %cst_16 : f32 to vector<8x1024xf32>
    %34 = arith.select %31, %32, %33 : vector<8x1024xi1>, vector<8x1024xf32>
    %35 = arith.truncf %34 : vector<8x1024xf32> to vector<8x1024xbf16>
    %c0_17 = arith.constant 0 : index
    %c0_18 = arith.constant 0 : index
    %36 = vector.load %arg2[%c0_17, %c0_18] : memref<1024x128xbf16, #tpu.memory_space<vmem>>, vector<1024x128xbf16>
    %cst_19 = arith.constant dense<0.000000e+00> : vector<8x128xf32>
    %37 = tpu.matmul %35, %36, %cst_19 {dimension_numbers = #tpu.dot_dimension_numbers<[1], [0], [0], [1], [0, 0, 1, 1], [], []>} : vector<8x1024xbf16>, vector<1024x128xbf16>, vector<8x128xf32> -> vector<8x128xf32>
    %38 = vector.extract_strided_slice %0 {offsets = [0, 4], sizes = [8, 1], strides = [1, 1]} : vector<8x8xi32> to vector<8x1xi32>
    %39 = vector.broadcast %38 : vector<8x1xi32> to vector<8x1024xi32>
    %40 = arith.cmpi eq, %1, %39 : vector<8x1024xi32>
    %cst_20 = arith.constant 1.000000e+00 : f32
    %cst_21 = arith.constant 0.000000e+00 : f32
    %41 = vector.broadcast %cst_20 : f32 to vector<8x1024xf32>
    %42 = vector.broadcast %cst_21 : f32 to vector<8x1024xf32>
    %43 = arith.select %40, %41, %42 : vector<8x1024xi1>, vector<8x1024xf32>
    %44 = arith.truncf %43 : vector<8x1024xf32> to vector<8x1024xbf16>
    %c0_22 = arith.constant 0 : index
    %c0_23 = arith.constant 0 : index
    %45 = vector.load %arg2[%c0_22, %c0_23] : memref<1024x128xbf16, #tpu.memory_space<vmem>>, vector<1024x128xbf16>
    %cst_24 = arith.constant dense<0.000000e+00> : vector<8x128xf32>
    %46 = tpu.matmul %44, %45, %cst_24 {dimension_numbers = #tpu.dot_dimension_numbers<[1], [0], [0], [1], [0, 0, 1, 1], [], []>} : vector<8x1024xbf16>, vector<1024x128xbf16>, vector<8x128xf32> -> vector<8x128xf32>
    %47 = vector.extract_strided_slice %0 {offsets = [0, 5], sizes = [8, 1], strides = [1, 1]} : vector<8x8xi32> to vector<8x1xi32>
    %48 = vector.broadcast %47 : vector<8x1xi32> to vector<8x1024xi32>
    %49 = arith.cmpi eq, %1, %48 : vector<8x1024xi32>
    %cst_25 = arith.constant 1.000000e+00 : f32
    %cst_26 = arith.constant 0.000000e+00 : f32
    %50 = vector.broadcast %cst_25 : f32 to vector<8x1024xf32>
    %51 = vector.broadcast %cst_26 : f32 to vector<8x1024xf32>
    %52 = arith.select %49, %50, %51 : vector<8x1024xi1>, vector<8x1024xf32>
    %53 = arith.truncf %52 : vector<8x1024xf32> to vector<8x1024xbf16>
    %c0_27 = arith.constant 0 : index
    %c0_28 = arith.constant 0 : index
    %54 = vector.load %arg2[%c0_27, %c0_28] : memref<1024x128xbf16, #tpu.memory_space<vmem>>, vector<1024x128xbf16>
    %cst_29 = arith.constant dense<0.000000e+00> : vector<8x128xf32>
    %55 = tpu.matmul %53, %54, %cst_29 {dimension_numbers = #tpu.dot_dimension_numbers<[1], [0], [0], [1], [0, 0, 1, 1], [], []>} : vector<8x1024xbf16>, vector<1024x128xbf16>, vector<8x128xf32> -> vector<8x128xf32>
    %56 = vector.extract_strided_slice %0 {offsets = [0, 6], sizes = [8, 1], strides = [1, 1]} : vector<8x8xi32> to vector<8x1xi32>
    %57 = vector.broadcast %56 : vector<8x1xi32> to vector<8x1024xi32>
    %58 = arith.cmpi eq, %1, %57 : vector<8x1024xi32>
    %cst_30 = arith.constant 1.000000e+00 : f32
    %cst_31 = arith.constant 0.000000e+00 : f32
    %59 = vector.broadcast %cst_30 : f32 to vector<8x1024xf32>
    %60 = vector.broadcast %cst_31 : f32 to vector<8x1024xf32>
    %61 = arith.select %58, %59, %60 : vector<8x1024xi1>, vector<8x1024xf32>
    %62 = arith.truncf %61 : vector<8x1024xf32> to vector<8x1024xbf16>
    %c0_32 = arith.constant 0 : index
    %c0_33 = arith.constant 0 : index
    %63 = vector.load %arg2[%c0_32, %c0_33] : memref<1024x128xbf16, #tpu.memory_space<vmem>>, vector<1024x128xbf16>
    %cst_34 = arith.constant dense<0.000000e+00> : vector<8x128xf32>
    %64 = tpu.matmul %62, %63, %cst_34 {dimension_numbers = #tpu.dot_dimension_numbers<[1], [0], [0], [1], [0, 0, 1, 1], [], []>} : vector<8x1024xbf16>, vector<1024x128xbf16>, vector<8x128xf32> -> vector<8x128xf32>
    %65 = vector.extract_strided_slice %0 {offsets = [0, 7], sizes = [8, 1], strides = [1, 1]} : vector<8x8xi32> to vector<8x1xi32>
    %66 = vector.broadcast %65 : vector<8x1xi32> to vector<8x1024xi32>
    %67 = arith.cmpi eq, %1, %66 : vector<8x1024xi32>
    %cst_35 = arith.constant 1.000000e+00 : f32
    %cst_36 = arith.constant 0.000000e+00 : f32
    %68 = vector.broadcast %cst_35 : f32 to vector<8x1024xf32>
    %69 = vector.broadcast %cst_36 : f32 to vector<8x1024xf32>
    %70 = arith.select %67, %68, %69 : vector<8x1024xi1>, vector<8x1024xf32>
    %71 = arith.truncf %70 : vector<8x1024xf32> to vector<8x1024xbf16>
    %c0_37 = arith.constant 0 : index
    %c0_38 = arith.constant 0 : index
    %72 = vector.load %arg2[%c0_37, %c0_38] : memref<1024x128xbf16, #tpu.memory_space<vmem>>, vector<1024x128xbf16>
    %cst_39 = arith.constant dense<0.000000e+00> : vector<8x128xf32>
    %73 = tpu.matmul %71, %72, %cst_39 {dimension_numbers = #tpu.dot_dimension_numbers<[1], [0], [0], [1], [0, 0, 1, 1], [], []>} : vector<8x1024xbf16>, vector<1024x128xbf16>, vector<8x128xf32> -> vector<8x128xf32>
    %74 = tpu.concatenate %10, %19, %28, %37, %46, %55, %64, %73 in 0 : vector<8x128xf32>, vector<8x128xf32>, vector<8x128xf32>, vector<8x128xf32>, vector<8x128xf32>, vector<8x128xf32>, vector<8x128xf32>, vector<8x128xf32> -> vector<64x128xf32>
    %75 = arith.truncf %74 : vector<64x128xf32> to vector<64x128xbf16>
    %c0_40 = arith.constant 0 : index
    %c0_41 = arith.constant 0 : index
    %76 = vector.load %arg3[%c0_40, %c0_41] : memref<128x512xbf16, #tpu.memory_space<vmem>>, vector<128x512xbf16>
    %cst_42 = arith.constant dense<0.000000e+00> : vector<64x512xf32>
    %77 = tpu.matmul %75, %76, %cst_42 {dimension_numbers = #tpu.dot_dimension_numbers<[1], [0], [0], [1], [0, 0, 1, 1], [], []>} : vector<64x128xbf16>, vector<128x512xbf16>, vector<64x512xf32> -> vector<64x512xf32>
    %c0_43 = arith.constant 0 : index
    %c0_44 = arith.constant 0 : index
    %78 = vector.load %arg5[%c0_43, %c0_44] : memref<1x512xf32, #tpu.memory_space<vmem>>, vector<1x512xf32>
    %79 = vector.broadcast %78 : vector<1x512xf32> to vector<64x512xf32>
    %80 = arith.addf %77, %79 : vector<64x512xf32>
    %c0_45 = arith.constant 0 : index
    %c0_46 = arith.constant 0 : index
    %81 = vector.load %arg14[%c0_45, %c0_46] : memref<64x512xf32, #tpu.memory_space<vmem>>, vector<64x512xf32>
    tpu.vector_store %arg14[%c0_45, %c0_46], %80 {strides = array<i32>} : memref<64x512xf32, #tpu.memory_space<vmem>>, vector<64x512xf32>,
    %cst_47 = arith.constant 0.000000e+00 : f32
    %82 = vector.broadcast %cst_47 : f32 to vector<8x128xf32>
    %cst_48 = arith.constant 0.000000e+00 : f32
    %83 = vector.broadcast %cst_48 : f32 to vector<8x128xf32>
    %c0_49 = arith.constant 0 : index
    %c0_50 = arith.constant 0 : index
    %84 = vector.load %arg14[%c0_49, %c0_50] : memref<64x512xf32, #tpu.memory_space<vmem>>, vector<8x512xf32>
    %85 = arith.truncf %82 : vector<8x128xf32> to vector<8x128xbf16>
    %c0_51 = arith.constant 0 : index
    %c0_52 = arith.constant 0 : index
    %86 = vector.load %arg7[%c0_51, %c0_52] : memref<128x512xbf16, #tpu.memory_space<vmem>>, vector<128x512xbf16>
    %cst_53 = arith.constant dense<0.000000e+00> : vector<8x512xf32>
    %87 = tpu.matmul %85, %86, %cst_53 {dimension_numbers = #tpu.dot_dimension_numbers<[1], [0], [0], [1], [0, 0, 1, 1], [], []>} : vector<8x128xbf16>, vector<128x512xbf16>, vector<8x512xf32> -> vector<8x512xf32>
    %88 = arith.addf %84, %87 : vector<8x512xf32>
    %89 = vector.extract_strided_slice %88 {offsets = [0, 0], sizes = [8, 128], strides = [1, 1]} : vector<8x512xf32> to vector<8x128xf32>
    %90 = arith.negf %89 : vector<8x128xf32>
    %91 = math.exp %90 : vector<8x128xf32>
    %cst_54 = arith.constant 1.000000e+00 : f32
    %92 = vector.broadcast %cst_54 : f32 to vector<8x128xf32>
    %93 = arith.addf %92, %91 : vector<8x128xf32>
    %94 = arith.divf %92, %93 : vector<8x128xf32>
    %95 = vector.extract_strided_slice %88 {offsets = [0, 128], sizes = [8, 128], strides = [1, 1]} : vector<8x512xf32> to vector<8x128xf32>
    %96 = arith.negf %95 : vector<8x128xf32>
    %97 = math.exp %96 : vector<8x128xf32>
    %cst_55 = arith.constant 1.000000e+00 : f32
    %98 = vector.broadcast %cst_55 : f32 to vector<8x128xf32>
    %99 = arith.addf %98, %97 : vector<8x128xf32>
    %100 = arith.divf %98, %99 : vector<8x128xf32>
    %101 = vector.extract_strided_slice %88 {offsets = [0, 256], sizes = [8, 128], strides = [1, 1]} : vector<8x512xf32> to vector<8x128xf32>
    %102 = math.tanh %101 : vector<8x128xf32>
    %103 = vector.extract_strided_slice %88 {offsets = [0, 384], sizes = [8, 128], strides = [1, 1]} : vector<8x512xf32> to vector<8x128xf32>
    %104 = arith.negf %103 : vector<8x128xf32>
    %105 = math.exp %104 : vector<8x128xf32>
    %cst_56 = arith.constant 1.000000e+00 : f32
    %106 = vector.broadcast %cst_56 : f32 to vector<8x128xf32>
    %107 = arith.addf %106, %105 : vector<8x128xf32>
    %108 = arith.divf %106, %107 : vector<8x128xf32>
    %109 = arith.mulf %100, %83 : vector<8x128xf32>
    %110 = arith.mulf %94, %102 : vector<8x128xf32>
    %111 = arith.addf %109, %110 : vector<8x128xf32>
    %112 = math.tanh %111 : vector<8x128xf32>
    %113 = arith.mulf %108, %112 : vector<8x128xf32>
    %c8 = arith.constant 8 : index
    %c0_57 = arith.constant 0 : index
    %114 = vector.load %arg14[%c8, %c0_57] : memref<64x512xf32, #tpu.memory_space<vmem>>, vector<8x512xf32>
    %115 = arith.truncf %113 : vector<8x128xf32> to vector<8x128xbf16>
    %c0_58 = arith.constant 0 : index
    %c0_59 = arith.constant 0 : index
    %116 = vector.load %arg7[%c0_58, %c0_59] : memref<128x512xbf16, #tpu.memory_space<vmem>>, vector<128x512xbf16>
    %cst_60 = arith.constant dense<0.000000e+00> : vector<8x512xf32>
    %117 = tpu.matmul %115, %116, %cst_60 {dimension_numbers = #tpu.dot_dimension_numbers<[1], [0], [0], [1], [0, 0, 1, 1], [], []>} : vector<8x128xbf16>, vector<128x512xbf16>, vector<8x512xf32> -> vector<8x512xf32>
    %118 = arith.addf %114, %117 : vector<8x512xf32>
    %119 = vector.extract_strided_slice %118 {offsets = [0, 0], sizes = [8, 128], strides = [1, 1]} : vector<8x512xf32> to vector<8x128xf32>
    %120 = arith.negf %119 : vector<8x128xf32>
    %121 = math.exp %120 : vector<8x128xf32>
    %cst_61 = arith.constant 1.000000e+00 : f32
    %122 = vector.broadcast %cst_61 : f32 to vector<8x128xf32>
    %123 = arith.addf %122, %121 : vector<8x128xf32>
    %124 = arith.divf %122, %123 : vector<8x128xf32>
    %125 = vector.extract_strided_slice %118 {offsets = [0, 128], sizes = [8, 128], strides = [1, 1]} : vector<8x512xf32> to vector<8x128xf32>
    %126 = arith.negf %125 : vector<8x128xf32>
    %127 = math.exp %126 : vector<8x128xf32>
    %cst_62 = arith.constant 1.000000e+00 : f32
    %128 = vector.broadcast %cst_62 : f32 to vector<8x128xf32>
    %129 = arith.addf %128, %127 : vector<8x128xf32>
    %130 = arith.divf %128, %129 : vector<8x128xf32>
    %131 = vector.extract_strided_slice %118 {offsets = [0, 256], sizes = [8, 128], strides = [1, 1]} : vector<8x512xf32> to vector<8x128xf32>
    %132 = math.tanh %131 : vector<8x128xf32>
    %133 = vector.extract_strided_slice %118 {offsets = [0, 384], sizes = [8, 128], strides = [1, 1]} : vector<8x512xf32> to vector<8x128xf32>
    %134 = arith.negf %133 : vector<8x128xf32>
    %135 = math.exp %134 : vector<8x128xf32>
    %cst_63 = arith.constant 1.000000e+00 : f32
    %136 = vector.broadcast %cst_63 : f32 to vector<8x128xf32>
    %137 = arith.addf %136, %135 : vector<8x128xf32>
    %138 = arith.divf %136, %137 : vector<8x128xf32>
    %139 = arith.mulf %130, %111 : vector<8x128xf32>
    %140 = arith.mulf %124, %132 : vector<8x128xf32>
    %141 = arith.addf %139, %140 : vector<8x128xf32>
    %142 = math.tanh %141 : vector<8x128xf32>
    %143 = arith.mulf %138, %142 : vector<8x128xf32>
    %c16 = arith.constant 16 : index
    %c0_64 = arith.constant 0 : index
    %144 = vector.load %arg14[%c16, %c0_64] : memref<64x512xf32, #tpu.memory_space<vmem>>, vector<8x512xf32>
    %145 = arith.truncf %143 : vector<8x128xf32> to vector<8x128xbf16>
    %c0_65 = arith.constant 0 : index
    %c0_66 = arith.constant 0 : index
    %146 = vector.load %arg7[%c0_65, %c0_66] : memref<128x512xbf16, #tpu.memory_space<vmem>>, vector<128x512xbf16>
    %cst_67 = arith.constant dense<0.000000e+00> : vector<8x512xf32>
    %147 = tpu.matmul %145, %146, %cst_67 {dimension_numbers = #tpu.dot_dimension_numbers<[1], [0], [0], [1], [0, 0, 1, 1], [], []>} : vector<8x128xbf16>, vector<128x512xbf16>, vector<8x512xf32> -> vector<8x512xf32>
    %148 = arith.addf %144, %147 : vector<8x512xf32>
    %149 = vector.extract_strided_slice %148 {offsets = [0, 0], sizes = [8, 128], strides = [1, 1]} : vector<8x512xf32> to vector<8x128xf32>
    %150 = arith.negf %149 : vector<8x128xf32>
    %151 = math.exp %150 : vector<8x128xf32>
    %cst_68 = arith.constant 1.000000e+00 : f32
    %152 = vector.broadcast %cst_68 : f32 to vector<8x128xf32>
    %153 = arith.addf %152, %151 : vector<8x128xf32>
    %154 = arith.divf %152, %153 : vector<8x128xf32>
    %155 = vector.extract_strided_slice %148 {offsets = [0, 128], sizes = [8, 128], strides = [1, 1]} : vector<8x512xf32> to vector<8x128xf32>
    %156 = arith.negf %155 : vector<8x128xf32>
    %157 = math.exp %156 : vector<8x128xf32>
    %cst_69 = arith.constant 1.000000e+00 : f32
    %158 = vector.broadcast %cst_69 : f32 to vector<8x128xf32>
    %159 = arith.addf %158, %157 : vector<8x128xf32>
    %160 = arith.divf %158, %159 : vector<8x128xf32>
    %161 = vector.extract_strided_slice %148 {offsets = [0, 256], sizes = [8, 128], strides = [1, 1]} : vector<8x512xf32> to vector<8x128xf32>
    %162 = math.tanh %161 : vector<8x128xf32>
    %163 = vector.extract_strided_slice %148 {offsets = [0, 384], sizes = [8, 128], strides = [1, 1]} : vector<8x512xf32> to vector<8x128xf32>
    %164 = arith.negf %163 : vector<8x128xf32>
    %165 = math.exp %164 : vector<8x128xf32>
    %cst_70 = arith.constant 1.000000e+00 : f32
    %166 = vector.broadcast %cst_70 : f32 to vector<8x128xf32>
    %167 = arith.addf %166, %165 : vector<8x128xf32>
    %168 = arith.divf %166, %167 : vector<8x128xf32>
    %169 = arith.mulf %160, %141 : vector<8x128xf32>
    %170 = arith.mulf %154, %162 : vector<8x128xf32>
    %171 = arith.addf %169, %170 : vector<8x128xf32>
    %172 = math.tanh %171 : vector<8x128xf32>
    %173 = arith.mulf %168, %172 : vector<8x128xf32>
    %c24 = arith.constant 24 : index
    %c0_71 = arith.constant 0 : index
    %174 = vector.load %arg14[%c24, %c0_71] : memref<64x512xf32, #tpu.memory_space<vmem>>, vector<8x512xf32>
    %175 = arith.truncf %173 : vector<8x128xf32> to vector<8x128xbf16>
    %c0_72 = arith.constant 0 : index
    %c0_73 = arith.constant 0 : index
    %176 = vector.load %arg7[%c0_72, %c0_73] : memref<128x512xbf16, #tpu.memory_space<vmem>>, vector<128x512xbf16>
    %cst_74 = arith.constant dense<0.000000e+00> : vector<8x512xf32>
    %177 = tpu.matmul %175, %176, %cst_74 {dimension_numbers = #tpu.dot_dimension_numbers<[1], [0], [0], [1], [0, 0, 1, 1], [], []>} : vector<8x128xbf16>, vector<128x512xbf16>, vector<8x512xf32> -> vector<8x512xf32>
    %178 = arith.addf %174, %177 : vector<8x512xf32>
    %179 = vector.extract_strided_slice %178 {offsets = [0, 0], sizes = [8, 128], strides = [1, 1]} : vector<8x512xf32> to vector<8x128xf32>
    %180 = arith.negf %179 : vector<8x128xf32>
    %181 = math.exp %180 : vector<8x128xf32>
    %cst_75 = arith.constant 1.000000e+00 : f32
    %182 = vector.broadcast %cst_75 : f32 to vector<8x128xf32>
    %183 = arith.addf %182, %181 : vector<8x128xf32>
    %184 = arith.divf %182, %183 : vector<8x128xf32>
    %185 = vector.extract_strided_slice %178 {offsets = [0, 128], sizes = [8, 128], strides = [1, 1]} : vector<8x512xf32> to vector<8x128xf32>
    %186 = arith.negf %185 : vector<8x128xf32>
    %187 = math.exp %186 : vector<8x128xf32>
    %cst_76 = arith.constant 1.000000e+00 : f32
    %188 = vector.broadcast %cst_76 : f32 to vector<8x128xf32>
    %189 = arith.addf %188, %187 : vector<8x128xf32>
    %190 = arith.divf %188, %189 : vector<8x128xf32>
    %191 = vector.extract_strided_slice %178 {offsets = [0, 256], sizes = [8, 128], strides = [1, 1]} : vector<8x512xf32> to vector<8x128xf32>
    %192 = math.tanh %191 : vector<8x128xf32>
    %193 = vector.extract_strided_slice %178 {offsets = [0, 384], sizes = [8, 128], strides = [1, 1]} : vector<8x512xf32> to vector<8x128xf32>
    %194 = arith.negf %193 : vector<8x128xf32>
    %195 = math.exp %194 : vector<8x128xf32>
    %cst_77 = arith.constant 1.000000e+00 : f32
    %196 = vector.broadcast %cst_77 : f32 to vector<8x128xf32>
    %197 = arith.addf %196, %195 : vector<8x128xf32>
    %198 = arith.divf %196, %197 : vector<8x128xf32>
    %199 = arith.mulf %190, %171 : vector<8x128xf32>
    %200 = arith.mulf %184, %192 : vector<8x128xf32>
    %201 = arith.addf %199, %200 : vector<8x128xf32>
    %202 = math.tanh %201 : vector<8x128xf32>
    %203 = arith.mulf %198, %202 : vector<8x128xf32>
    %c32 = arith.constant 32 : index
    %c0_78 = arith.constant 0 : index
    %204 = vector.load %arg14[%c32, %c0_78] : memref<64x512xf32, #tpu.memory_space<vmem>>, vector<8x512xf32>
    %205 = arith.truncf %203 : vector<8x128xf32> to vector<8x128xbf16>
    %c0_79 = arith.constant 0 : index
    %c0_80 = arith.constant 0 : index
    %206 = vector.load %arg7[%c0_79, %c0_80] : memref<128x512xbf16, #tpu.memory_space<vmem>>, vector<128x512xbf16>
    %cst_81 = arith.constant dense<0.000000e+00> : vector<8x512xf32>
    %207 = tpu.matmul %205, %206, %cst_81 {dimension_numbers = #tpu.dot_dimension_numbers<[1], [0], [0], [1], [0, 0, 1, 1], [], []>} : vector<8x128xbf16>, vector<128x512xbf16>, vector<8x512xf32> -> vector<8x512xf32>
    %208 = arith.addf %204, %207 : vector<8x512xf32>
    %209 = vector.extract_strided_slice %208 {offsets = [0, 0], sizes = [8, 128], strides = [1, 1]} : vector<8x512xf32> to vector<8x128xf32>
    %210 = arith.negf %209 : vector<8x128xf32>
    %211 = math.exp %210 : vector<8x128xf32>
    %cst_82 = arith.constant 1.000000e+00 : f32
    %212 = vector.broadcast %cst_82 : f32 to vector<8x128xf32>
    %213 = arith.addf %212, %211 : vector<8x128xf32>
    %214 = arith.divf %212, %213 : vector<8x128xf32>
    %215 = vector.extract_strided_slice %208 {offsets = [0, 128], sizes = [8, 128], strides = [1, 1]} : vector<8x512xf32> to vector<8x128xf32>
    %216 = arith.negf %215 : vector<8x128xf32>
    %217 = math.exp %216 : vector<8x128xf32>
    %cst_83 = arith.constant 1.000000e+00 : f32
    %218 = vector.broadcast %cst_83 : f32 to vector<8x128xf32>
    %219 = arith.addf %218, %217 : vector<8x128xf32>
    %220 = arith.divf %218, %219 : vector<8x128xf32>
    %221 = vector.extract_strided_slice %208 {offsets = [0, 256], sizes = [8, 128], strides = [1, 1]} : vector<8x512xf32> to vector<8x128xf32>
    %222 = math.tanh %221 : vector<8x128xf32>
    %223 = vector.extract_strided_slice %208 {offsets = [0, 384], sizes = [8, 128], strides = [1, 1]} : vector<8x512xf32> to vector<8x128xf32>
    %224 = arith.negf %223 : vector<8x128xf32>
    %225 = math.exp %224 : vector<8x128xf32>
    %cst_84 = arith.constant 1.000000e+00 : f32
    %226 = vector.broadcast %cst_84 : f32 to vector<8x128xf32>
    %227 = arith.addf %226, %225 : vector<8x128xf32>
    %228 = arith.divf %226, %227 : vector<8x128xf32>
    %229 = arith.mulf %220, %201 : vector<8x128xf32>
    %230 = arith.mulf %214, %222 : vector<8x128xf32>
    %231 = arith.addf %229, %230 : vector<8x128xf32>
    %232 = math.tanh %231 : vector<8x128xf32>
    %233 = arith.mulf %228, %232 : vector<8x128xf32>
    %c40 = arith.constant 40 : index
    %c0_85 = arith.constant 0 : index
    %234 = vector.load %arg14[%c40, %c0_85] : memref<64x512xf32, #tpu.memory_space<vmem>>, vector<8x512xf32>
    %235 = arith.truncf %233 : vector<8x128xf32> to vector<8x128xbf16>
    %c0_86 = arith.constant 0 : index
    %c0_87 = arith.constant 0 : index
    %236 = vector.load %arg7[%c0_86, %c0_87] : memref<128x512xbf16, #tpu.memory_space<vmem>>, vector<128x512xbf16>
    %cst_88 = arith.constant dense<0.000000e+00> : vector<8x512xf32>
    %237 = tpu.matmul %235, %236, %cst_88 {dimension_numbers = #tpu.dot_dimension_numbers<[1], [0], [0], [1], [0, 0, 1, 1], [], []>} : vector<8x128xbf16>, vector<128x512xbf16>, vector<8x512xf32> -> vector<8x512xf32>
    %238 = arith.addf %234, %237 : vector<8x512xf32>
    %239 = vector.extract_strided_slice %238 {offsets = [0, 0], sizes = [8, 128], strides = [1, 1]} : vector<8x512xf32> to vector<8x128xf32>
    %240 = arith.negf %239 : vector<8x128xf32>
    %241 = math.exp %240 : vector<8x128xf32>
    %cst_89 = arith.constant 1.000000e+00 : f32
    %242 = vector.broadcast %cst_89 : f32 to vector<8x128xf32>
    %243 = arith.addf %242, %241 : vector<8x128xf32>
    %244 = arith.divf %242, %243 : vector<8x128xf32>
    %245 = vector.extract_strided_slice %238 {offsets = [0, 128], sizes = [8, 128], strides = [1, 1]} : vector<8x512xf32> to vector<8x128xf32>
    %246 = arith.negf %245 : vector<8x128xf32>
    %247 = math.exp %246 : vector<8x128xf32>
    %cst_90 = arith.constant 1.000000e+00 : f32
    %248 = vector.broadcast %cst_90 : f32 to vector<8x128xf32>
    %249 = arith.addf %248, %247 : vector<8x128xf32>
    %250 = arith.divf %248, %249 : vector<8x128xf32>
    %251 = vector.extract_strided_slice %238 {offsets = [0, 256], sizes = [8, 128], strides = [1, 1]} : vector<8x512xf32> to vector<8x128xf32>
    %252 = math.tanh %251 : vector<8x128xf32>
    %253 = vector.extract_strided_slice %238 {offsets = [0, 384], sizes = [8, 128], strides = [1, 1]} : vector<8x512xf32> to vector<8x128xf32>
    %254 = arith.negf %253 : vector<8x128xf32>
    %255 = math.exp %254 : vector<8x128xf32>
    %cst_91 = arith.constant 1.000000e+00 : f32
    %256 = vector.broadcast %cst_91 : f32 to vector<8x128xf32>
    %257 = arith.addf %256, %255 : vector<8x128xf32>
    %258 = arith.divf %256, %257 : vector<8x128xf32>
    %259 = arith.mulf %250, %231 : vector<8x128xf32>
    %260 = arith.mulf %244, %252 : vector<8x128xf32>
    %261 = arith.addf %259, %260 : vector<8x128xf32>
    %262 = math.tanh %261 : vector<8x128xf32>
    %263 = arith.mulf %258, %262 : vector<8x128xf32>
    %c48 = arith.constant 48 : index
    %c0_92 = arith.constant 0 : index
    %264 = vector.load %arg14[%c48, %c0_92] : memref<64x512xf32, #tpu.memory_space<vmem>>, vector<8x512xf32>
    %265 = arith.truncf %263 : vector<8x128xf32> to vector<8x128xbf16>
    %c0_93 = arith.constant 0 : index
    %c0_94 = arith.constant 0 : index
    %266 = vector.load %arg7[%c0_93, %c0_94] : memref<128x512xbf16, #tpu.memory_space<vmem>>, vector<128x512xbf16>
    %cst_95 = arith.constant dense<0.000000e+00> : vector<8x512xf32>
    %267 = tpu.matmul %265, %266, %cst_95 {dimension_numbers = #tpu.dot_dimension_numbers<[1], [0], [0], [1], [0, 0, 1, 1], [], []>} : vector<8x128xbf16>, vector<128x512xbf16>, vector<8x512xf32> -> vector<8x512xf32>
    %268 = arith.addf %264, %267 : vector<8x512xf32>
    %269 = vector.extract_strided_slice %268 {offsets = [0, 0], sizes = [8, 128], strides = [1, 1]} : vector<8x512xf32> to vector<8x128xf32>
    %270 = arith.negf %269 : vector<8x128xf32>
    %271 = math.exp %270 : vector<8x128xf32>
    %cst_96 = arith.constant 1.000000e+00 : f32
    %272 = vector.broadcast %cst_96 : f32 to vector<8x128xf32>
    %273 = arith.addf %272, %271 : vector<8x128xf32>
    %274 = arith.divf %272, %273 : vector<8x128xf32>
    %275 = vector.extract_strided_slice %268 {offsets = [0, 128], sizes = [8, 128], strides = [1, 1]} : vector<8x512xf32> to vector<8x128xf32>
    %276 = arith.negf %275 : vector<8x128xf32>
    %277 = math.exp %276 : vector<8x128xf32>
    %cst_97 = arith.constant 1.000000e+00 : f32
    %278 = vector.broadcast %cst_97 : f32 to vector<8x128xf32>
    %279 = arith.addf %278, %277 : vector<8x128xf32>
    %280 = arith.divf %278, %279 : vector<8x128xf32>
    %281 = vector.extract_strided_slice %268 {offsets = [0, 256], sizes = [8, 128], strides = [1, 1]} : vector<8x512xf32> to vector<8x128xf32>
    %282 = math.tanh %281 : vector<8x128xf32>
    %283 = vector.extract_strided_slice %268 {offsets = [0, 384], sizes = [8, 128], strides = [1, 1]} : vector<8x512xf32> to vector<8x128xf32>
    %284 = arith.negf %283 : vector<8x128xf32>
    %285 = math.exp %284 : vector<8x128xf32>
    %cst_98 = arith.constant 1.000000e+00 : f32
    %286 = vector.broadcast %cst_98 : f32 to vector<8x128xf32>
    %287 = arith.addf %286, %285 : vector<8x128xf32>
    %288 = arith.divf %286, %287 : vector<8x128xf32>
    %289 = arith.mulf %280, %261 : vector<8x128xf32>
    %290 = arith.mulf %274, %282 : vector<8x128xf32>
    %291 = arith.addf %289, %290 : vector<8x128xf32>
    %292 = math.tanh %291 : vector<8x128xf32>
    %293 = arith.mulf %288, %292 : vector<8x128xf32>
    %c56 = arith.constant 56 : index
    %c0_99 = arith.constant 0 : index
    %294 = vector.load %arg14[%c56, %c0_99] : memref<64x512xf32, #tpu.memory_space<vmem>>, vector<8x512xf32>
    %295 = arith.truncf %293 : vector<8x128xf32> to vector<8x128xbf16>
    %c0_100 = arith.constant 0 : index
    %c0_101 = arith.constant 0 : index
    %296 = vector.load %arg7[%c0_100, %c0_101] : memref<128x512xbf16, #tpu.memory_space<vmem>>, vector<128x512xbf16>
    %cst_102 = arith.constant dense<0.000000e+00> : vector<8x512xf32>
    %297 = tpu.matmul %295, %296, %cst_102 {dimension_numbers = #tpu.dot_dimension_numbers<[1], [0], [0], [1], [0, 0, 1, 1], [], []>} : vector<8x128xbf16>, vector<128x512xbf16>, vector<8x512xf32> -> vector<8x512xf32>
    %298 = arith.addf %294, %297 : vector<8x512xf32>
    %299 = vector.extract_strided_slice %298 {offsets = [0, 0], sizes = [8, 128], strides = [1, 1]} : vector<8x512xf32> to vector<8x128xf32>
    %300 = arith.negf %299 : vector<8x128xf32>
    %301 = math.exp %300 : vector<8x128xf32>
    %cst_103 = arith.constant 1.000000e+00 : f32
    %302 = vector.broadcast %cst_103 : f32 to vector<8x128xf32>
    %303 = arith.addf %302, %301 : vector<8x128xf32>
    %304 = arith.divf %302, %303 : vector<8x128xf32>
    %305 = vector.extract_strided_slice %298 {offsets = [0, 128], sizes = [8, 128], strides = [1, 1]} : vector<8x512xf32> to vector<8x128xf32>
    %306 = arith.negf %305 : vector<8x128xf32>
    %307 = math.exp %306 : vector<8x128xf32>
    %cst_104 = arith.constant 1.000000e+00 : f32
    %308 = vector.broadcast %cst_104 : f32 to vector<8x128xf32>
    %309 = arith.addf %308, %307 : vector<8x128xf32>
    %310 = arith.divf %308, %309 : vector<8x128xf32>
    %311 = vector.extract_strided_slice %298 {offsets = [0, 256], sizes = [8, 128], strides = [1, 1]} : vector<8x512xf32> to vector<8x128xf32>
    %312 = math.tanh %311 : vector<8x128xf32>
    %313 = vector.extract_strided_slice %298 {offsets = [0, 384], sizes = [8, 128], strides = [1, 1]} : vector<8x512xf32> to vector<8x128xf32>
    %314 = arith.negf %313 : vector<8x128xf32>
    %315 = math.exp %314 : vector<8x128xf32>
    %cst_105 = arith.constant 1.000000e+00 : f32
    %316 = vector.broadcast %cst_105 : f32 to vector<8x128xf32>
    %317 = arith.addf %316, %315 : vector<8x128xf32>
    %318 = arith.divf %316, %317 : vector<8x128xf32>
    %319 = arith.mulf %310, %291 : vector<8x128xf32>
    %320 = arith.mulf %304, %312 : vector<8x128xf32>
    %321 = arith.addf %319, %320 : vector<8x128xf32>
    %322 = math.tanh %321 : vector<8x128xf32>
    %323 = arith.mulf %318, %322 : vector<8x128xf32>
    %324 = arith.truncf %73 : vector<8x128xf32> to vector<8x128xbf16>
    %c0_106 = arith.constant 0 : index
    %c0_107 = arith.constant 0 : index
    %325 = vector.load %arg4[%c0_106, %c0_107] : memref<128x512xbf16, #tpu.memory_space<vmem>>, vector<128x512xbf16>
    %cst_108 = arith.constant dense<0.000000e+00> : vector<8x512xf32>
    %326 = tpu.matmul %324, %325, %cst_108 {dimension_numbers = #tpu.dot_dimension_numbers<[1], [0], [0], [1], [0, 0, 1, 1], [], []>} : vector<8x128xbf16>, vector<128x512xbf16>, vector<8x512xf32> -> vector<8x512xf32>
    %c0_109 = arith.constant 0 : index
    %c0_110 = arith.constant 0 : index
    %327 = vector.load %arg6[%c0_109, %c0_110] : memref<1x512xf32, #tpu.memory_space<vmem>>, vector<1x512xf32>
    %328 = vector.broadcast %327 : vector<1x512xf32> to vector<8x512xf32>
    %329 = arith.addf %326, %328 : vector<8x512xf32>
    %330 = vector.extract_strided_slice %329 {offsets = [0, 0], sizes = [8, 128], strides = [1, 1]} : vector<8x512xf32> to vector<8x128xf32>
    %331 = arith.negf %330 : vector<8x128xf32>
    %332 = math.exp %331 : vector<8x128xf32>
    %cst_111 = arith.constant 1.000000e+00 : f32
    %333 = vector.broadcast %cst_111 : f32 to vector<8x128xf32>
    %334 = arith.addf %333, %332 : vector<8x128xf32>
    %335 = arith.divf %333, %334 : vector<8x128xf32>
    %336 = vector.extract_strided_slice %329 {offsets = [0, 256], sizes = [8, 128], strides = [1, 1]} : vector<8x512xf32> to vector<8x128xf32>
    %337 = math.tanh %336 : vector<8x128xf32>
    %338 = vector.extract_strided_slice %329 {offsets = [0, 384], sizes = [8, 128], strides = [1, 1]} : vector<8x512xf32> to vector<8x128xf32>
    %339 = arith.negf %338 : vector<8x128xf32>
    %340 = math.exp %339 : vector<8x128xf32>
    %cst_112 = arith.constant 1.000000e+00 : f32
    %341 = vector.broadcast %cst_112 : f32 to vector<8x128xf32>
    %342 = arith.addf %341, %340 : vector<8x128xf32>
    %343 = arith.divf %341, %342 : vector<8x128xf32>
    %344 = arith.mulf %335, %337 : vector<8x128xf32>
    %345 = math.tanh %344 : vector<8x128xf32>
    %346 = arith.mulf %343, %345 : vector<8x128xf32>
    %347 = arith.truncf %323 : vector<8x128xf32> to vector<8x128xbf16>
    %c0_113 = arith.constant 0 : index
    %c0_114 = arith.constant 0 : index
    %348 = vector.load %arg8[%c0_113, %c0_114] : memref<128x128xbf16, #tpu.memory_space<vmem>>, vector<128x128xbf16>
    %cst_115 = arith.constant dense<0.000000e+00> : vector<8x128xf32>
    %349 = tpu.matmul %347, %348, %cst_115 {dimension_numbers = #tpu.dot_dimension_numbers<[1], [0], [0], [1], [0, 0, 1, 1], [], []>} : vector<8x128xbf16>, vector<128x128xbf16>, vector<8x128xf32> -> vector<8x128xf32>
    %350 = arith.truncf %346 : vector<8x128xf32> to vector<8x128xbf16>
    %c0_116 = arith.constant 0 : index
    %c0_117 = arith.constant 0 : index
    %351 = vector.load %arg9[%c0_116, %c0_117] : memref<128x128xbf16, #tpu.memory_space<vmem>>, vector<128x128xbf16>
    %cst_118 = arith.constant dense<0.000000e+00> : vector<8x128xf32>
    %352 = tpu.matmul %350, %351, %cst_118 {dimension_numbers = #tpu.dot_dimension_numbers<[1], [0], [0], [1], [0, 0, 1, 1], [], []>} : vector<8x128xbf16>, vector<128x128xbf16>, vector<8x128xf32> -> vector<8x128xf32>
    %353 = arith.addf %349, %352 : vector<8x128xf32>
    %c0_119 = arith.constant 0 : index
    %c0_120 = arith.constant 0 : index
    %354 = vector.load %arg10[%c0_119, %c0_120] : memref<1x128xf32, #tpu.memory_space<vmem>>, vector<1x128xf32>
    %355 = vector.broadcast %354 : vector<1x128xf32> to vector<8x128xf32>
    %356 = arith.addf %353, %355 : vector<8x128xf32>
    %cst_121 = arith.constant 0.000000e+00 : f32
    %357 = vector.broadcast %cst_121 : f32 to vector<8x128xf32>
    %358 = arith.maximumf %356, %357 : vector<8x128xf32>
    %359 = arith.truncf %358 : vector<8x128xf32> to vector<8x128xbf16>
    %c0_122 = arith.constant 0 : index
    %c0_123 = arith.constant 0 : index
    %360 = vector.load %arg11[%c0_122, %c0_123] : memref<128x128xbf16, #tpu.memory_space<vmem>>, vector<128x128xbf16>
    %cst_124 = arith.constant dense<0.000000e+00> : vector<8x128xf32>
    %361 = tpu.matmul %359, %360, %cst_124 {dimension_numbers = #tpu.dot_dimension_numbers<[1], [0], [0], [1], [0, 0, 1, 1], [], []>} : vector<8x128xbf16>, vector<128x128xbf16>, vector<8x128xf32> -> vector<8x128xf32>
    %c0_125 = arith.constant 0 : index
    %c0_126 = arith.constant 0 : index
    %362 = vector.load %arg12[%c0_125, %c0_126] : memref<1x128xf32, #tpu.memory_space<vmem>>, vector<1x128xf32>
    %363 = vector.broadcast %362 : vector<1x128xf32> to vector<8x128xf32>
    %364 = arith.addf %361, %363 : vector<8x128xf32>
    %c0_127 = arith.constant 0 : index
    %c0_128 = arith.constant 0 : index
    %365 = vector.load %arg13[%c0_127, %c0_128] : memref<8x128xf32, #tpu.memory_space<vmem>>, vector<8x128xf32>
    tpu.vector_store %arg13[%c0_127, %c0_128], %364 {strides = array<i32>} : memref<8x128xf32, #tpu.memory_space<vmem>>, vector<8x128xf32>,
    return
  }
  func.func @transform_0(%arg0: i32) -> (i32, i32) {
    %c0_i32 = arith.constant 0 : i32
    %c0_i32_0 = arith.constant 0 : i32
    return %arg0, %c0_i32 : i32, i32
  }
  func.func @transform_1(%arg0: i32) -> (i32, i32) {
    %c0_i32 = arith.constant 0 : i32
    %c0_i32_0 = arith.constant 0 : i32
    %c0_i32_1 = arith.constant 0 : i32
    return %c0_i32, %c0_i32_0 : i32, i32
  }
  func.func @transform_2(%arg0: i32) -> (i32, i32) {
    %c0_i32 = arith.constant 0 : i32
    %c0_i32_0 = arith.constant 0 : i32
    %c0_i32_1 = arith.constant 0 : i32
    return %c0_i32, %c0_i32_0 : i32, i32
  }
  func.func @transform_3(%arg0: i32) -> (i32, i32) {
    %c0_i32 = arith.constant 0 : i32
    %c0_i32_0 = arith.constant 0 : i32
    %c0_i32_1 = arith.constant 0 : i32
    return %c0_i32, %c0_i32_0 : i32, i32
  }
  func.func @transform_4(%arg0: i32) -> (i32, i32) {
    %c0_i32 = arith.constant 0 : i32
    %c0_i32_0 = arith.constant 0 : i32
    %c0_i32_1 = arith.constant 0 : i32
    return %c0_i32, %c0_i32_0 : i32, i32
  }
  func.func @transform_5(%arg0: i32) -> (i32, i32) {
    %c0_i32 = arith.constant 0 : i32
    %c0_i32_0 = arith.constant 0 : i32
    %c0_i32_1 = arith.constant 0 : i32
    return %c0_i32, %c0_i32_0 : i32, i32
  }
  func.func @transform_6(%arg0: i32) -> (i32, i32) {
    %c0_i32 = arith.constant 0 : i32
    %c0_i32_0 = arith.constant 0 : i32
    %c0_i32_1 = arith.constant 0 : i32
    return %c0_i32, %c0_i32_0 : i32, i32
  }
  func.func @transform_7(%arg0: i32) -> (i32, i32) {
    %c0_i32 = arith.constant 0 : i32
    %c0_i32_0 = arith.constant 0 : i32
    %c0_i32_1 = arith.constant 0 : i32
    return %c0_i32, %c0_i32_0 : i32, i32
  }
  func.func @transform_8(%arg0: i32) -> (i32, i32) {
    %c0_i32 = arith.constant 0 : i32
    %c0_i32_0 = arith.constant 0 : i32
    %c0_i32_1 = arith.constant 0 : i32
    return %c0_i32, %c0_i32_0 : i32, i32
  }
  func.func @transform_9(%arg0: i32) -> (i32, i32) {
    %c0_i32 = arith.constant 0 : i32
    %c0_i32_0 = arith.constant 0 : i32
    %c0_i32_1 = arith.constant 0 : i32
    return %c0_i32, %c0_i32_0 : i32, i32
  }
  func.func @transform_10(%arg0: i32) -> (i32, i32) {
    %c0_i32 = arith.constant 0 : i32
    %c0_i32_0 = arith.constant 0 : i32
    %c0_i32_1 = arith.constant 0 : i32
    return %c0_i32, %c0_i32_0 : i32, i32
  }
  func.func @transform_11(%arg0: i32) -> (i32, i32) {
    %c0_i32 = arith.constant 0 : i32
    %c0_i32_0 = arith.constant 0 : i32
    %c0_i32_1 = arith.constant 0 : i32
    return %c0_i32, %c0_i32_0 : i32, i32
  }
  func.func @transform_12(%arg0: i32) -> (i32, i32) {
    %c0_i32 = arith.constant 0 : i32
    %c0_i32_0 = arith.constant 0 : i32
    return %arg0, %c0_i32 : i32, i32
  }
}

</mosaic_0001>

<bundles_post_ra>
// kernel: lstm_model_forward.1
= control target key start
LH: loop header
LB: loop body
LE: loop exit
PB: predicated region body
PF: predicated region fallthrough
CT: control target
= control target key end

     0   :  { %17 = vsyncpa [#allocation4], 0  ;;  %s7987_s0 = inlined_call_operand.vmem [shape: s32[8,8], index: 0, kind: input, shape index: {}]   ;;  %s7988_s1 = inlined_call_operand.hbm [shape: bf16[1024,128], index: 1, kind: input, shape index: {}]   ;;  %s7989_s2 = inlined_call_operand.hbm [shape: bf16[128,512], index: 2, kind: input, shape index: {}]   ;;  %s7990_s3 = inlined_call_operand.hbm [shape: bf16[128,512], index: 3, kind: input, shape index: {}]   ;;  %s7991_s4 = inlined_call_operand.vmem [shape: f32[1,512], index: 4, kind: input, shape index: {}]   ;;  %s7992_s5 = inlined_call_operand.vmem [shape: f32[1,512], index: 5, kind: input, shape index: {}]   ;;  %s7993_s6 = inlined_call_operand.hbm [shape: bf16[128,512], index: 6, kind: input, shape index: {}]   ;;  %s7994_s7 = inlined_call_operand.hbm [shape: bf16[128,128], index: 7, kind: input, shape index: {}]   ;;  %s7995_s8 = inlined_call_operand.hbm [shape: bf16[128,128], index: 8, kind: input, shape index: {}]   ;;  %s7996_s9 = inlined_call_operand.vmem [shape: f32[1,128], index: 9, kind: input, shape index: {}]   ;;  %s7997_s10 = inlined_call_operand.hbm [shape: bf16[128,128], index: 10, kind: input, shape index: {}]   ;;  %s7998_s11 = inlined_call_operand.vmem [shape: f32[1,128], index: 11, kind: input, shape index: {}]   ;;  %s7999_s12 = inlined_call_operand.vmem [shape: f32[8,128], index: 12, kind: output, shape index: {}]  }
   0x1   :  { %18 = vsyncpa [#allocation6], 0 }
   0x2   :  { %19 = vsyncpa [#allocation9], 0 }
   0x3   :  { %20 = vsyncpa [#allocation12], 0  ;;  %s6112_s21 = smov [#allocation5]   ;;  %s5950_s25 = scalar_lea.hbm %s7989_s2, 4096 }
   0x4   :  { %s40_s22 = sshll.u32 %s6112_s21, 4  ;;  %p5951_p0 = scmp.ne.s32.totalorder %s7989_s2, %s5950_s25  ;;  %s41_s22 = int_to_ptr.vmem [resolvable:$true] %s40_s22 }
   0x5   :  { %p5954_p1 = scmp.lt.u32.totalorder %s5950_s25, %s7989_s2 }
   0x7   :  { %p5956_p2 = pnand %p5954_p1, %p5951_p0 }
   0x9   :  { %5959 = shalt.err (!%p5956_p2)
}
   0xa   :  { %s5960_s30 = scalar_lea.vmem %s41_s22, 4096  ;;  %p5965_p4 = scmp.lt.s32.totalorder %s41_s22, %s41_s22 }
   0xb   :  { %p5961_p3 = scmp.ne.s32.totalorder %s41_s22, %s5960_s30  ;;  %p5966_p5 = scmp.lt.s32.totalorder %s5960_s30, %s5960_s30 }
   0xd   :  { %p5967_p6 = por %p5966_p5, %p5965_p4 }
   0xf   :  { %p5968_p7 = pnand %p5967_p6, %p5961_p3 }
  0x11   :  { %5971 = shalt.err (!%p5968_p7)
}
  0x12   :  { %s6113_s13 = smov 256   ;;  %s6114_s14 = smov 16  }
  0x13   :  { %46 = dma.hbm_to_vmem [thread:$0]  %s7989_s2, 4096, %s41_s22, [#allocation6], %s6113_s13, %s6113_s13, %s6114_s14  }
  0x14   :  { %s6115_s17 = smov [#allocation8]   ;;  %s5972_s21 = scalar_lea.hbm %s7993_s6, 4096 }
  0x15   :  { %s68_s18 = sshll.u32 %s6115_s17, 4  ;;  %p5973_p8 = scmp.ne.s32.totalorder %s7993_s6, %s5972_s21  ;;  %s69_s18 = int_to_ptr.vmem [resolvable:$true] %s68_s18 }
  0x16   :  { %p5976_p9 = scmp.lt.u32.totalorder %s5972_s21, %s7993_s6 }
  0x18   :  { %p5978_p10 = pnand %p5976_p9, %p5973_p8 }
  0x1a   :  { %5981 = shalt.err (!%p5978_p10)
}
  0x1b   :  { %s5982_s27 = scalar_lea.vmem %s69_s18, 4096  ;;  %p5987_p12 = scmp.lt.s32.totalorder %s69_s18, %s69_s18 }
  0x1c   :  { %p5983_p11 = scmp.ne.s32.totalorder %s69_s18, %s5982_s27  ;;  %p5988_p13 = scmp.lt.s32.totalorder %s5982_s27, %s5982_s27 }
  0x1e   :  { %p5989_p0 = por %p5988_p13, %p5987_p12 }
  0x20   :  { %p5990_p1 = pnand %p5989_p0, %p5983_p11 }
  0x22   :  { %5993 = shalt.err (!%p5990_p1)
}
  0x23   :  { %74 = dma.hbm_to_vmem [thread:$0]  %s7993_s6, 4096, %s69_s18, [#allocation9], %s6113_s13, %s6113_s13, %s6114_s14  }
  0x24   :  { %s6116_s28 = smov [#allocation11]   ;;  %s6117_s30 = smov [#allocation3]  }
  0x25   :  { %s92_s29 = sshll.u32 %s6116_s28, 4  ;;  %s28_s15 = sshll.u32 %s6117_s30, 4  ;;  %s93_s29 = int_to_ptr.vmem [resolvable:$true] %s92_s29  ;;  %s6229_s15 = int_to_ptr.vmem [resolvable:$true] %s28_s15 }
  0x26   :  { %s5994_s19 = scalar_lea.hbm %s7995_s8, 1024 }
  0x27   :  { %p5995_p2 = scmp.ne.s32.totalorder %s7995_s8, %s5994_s19  ;;  %p5998_p3 = scmp.lt.u32.totalorder %s5994_s19, %s7995_s8 }
  0x29   :  { %p6000_p4 = pnand %p5998_p3, %p5995_p2 }
  0x2b   :  { %6003 = shalt.err (!%p6000_p4)
}
  0x2c   :  { %s6004_s6 = scalar_lea.vmem %s93_s29, 1024  ;;  %p6009_p6 = scmp.lt.s32.totalorder %s93_s29, %s93_s29 }
  0x2d   :  { %p6005_p5 = scmp.ne.s32.totalorder %s93_s29, %s6004_s6  ;;  %p6010_p7 = scmp.lt.s32.totalorder %s6004_s6, %s6004_s6 }
  0x2f   :  { %p6011_p8 = por %p6010_p7, %p6009_p6 }
  0x31   :  { %p6012_p9 = pnand %p6011_p8, %p6005_p5 }
  0x33   :  { %6015 = shalt.err (!%p6012_p9)
}
  0x34   :  { %s6118_s18 = smov 64   ;;  %s6119_s25 = smov 4  }
  0x35   :  { %98 = dma.hbm_to_vmem [thread:$0]  %s7995_s8, 1024, %s93_s29, [#allocation12], %s6118_s18, %s6118_s18, %s6119_s25  }
  0x36   :  { %s6016_s28 = scalar_lea.hbm %s7988_s1, 8192 }
  0x37   :  { %p6017_p10 = scmp.ne.s32.totalorder %s7988_s1, %s6016_s28  ;;  %p6020_p11 = scmp.lt.u32.totalorder %s6016_s28, %s7988_s1 }
  0x39   :  { %p6022_p12 = pnand %p6020_p11, %p6017_p10 }
  0x3b   :  { %6025 = shalt.err (!%p6022_p12)
}
  0x3c   :  { %s6026_s20 = scalar_lea.vmem %s6229_s15, 8192  ;;  %p6031_p0 = scmp.lt.s32.totalorder %s6229_s15, %s6229_s15 }
  0x3d   :  { %p6027_p13 = scmp.ne.s32.totalorder %s6229_s15, %s6026_s20  ;;  %p6032_p1 = scmp.lt.s32.totalorder %s6026_s20, %s6026_s20 }
  0x3f   :  { %p6033_p2 = por %p6032_p1, %p6031_p0 }
  0x41   :  { %p6034_p3 = pnand %p6033_p2, %p6027_p13 }
  0x43   :  { %6037 = shalt.err (!%p6034_p3)
}
  0x44   :  { %34 = dma.hbm_to_vmem [thread:$0]  %s7988_s1, 8192, %s6229_s15, [#allocation4], %s6118_s18, %s6118_s18, %s6119_s25  }
  0x45   :  { %s6120_s21 = smov [#allocation7]   ;;  %s6121_s24 = smov [#allocation10]  }
  0x46   :  { %s52_s23 = sshll.u32 %s6120_s21, 4  ;;  %s80_s6 = sshll.u32 %s6121_s24, 4  ;;  %s53_s23 = int_to_ptr.vmem [resolvable:$true] %s52_s23  ;;  %s6266_s6 = int_to_ptr.vmem [resolvable:$true] %s80_s6 }
  0x47   :  { %s6038_s2 = scalar_lea.hbm %s7990_s3, 4096 }
  0x48   :  { %p6039_p4 = scmp.ne.s32.totalorder %s7990_s3, %s6038_s2  ;;  %p6042_p5 = scmp.lt.u32.totalorder %s6038_s2, %s7990_s3 }
  0x4a   :  { %p6044_p6 = pnand %p6042_p5, %p6039_p4 }
  0x4c   :  { %6047 = shalt.err (!%p6044_p6)
}
  0x4d   :  { %s6048_s1 = scalar_lea.vmem %s53_s23, 4096  ;;  %p6053_p8 = scmp.lt.s32.totalorder %s53_s23, %s53_s23 }
  0x4e   :  { %p6049_p7 = scmp.ne.s32.totalorder %s53_s23, %s6048_s1  ;;  %p6054_p9 = scmp.lt.s32.totalorder %s6048_s1, %s6048_s1 }
  0x50   :  { %p6055_p10 = por %p6054_p9, %p6053_p8 }
  0x52   :  { %p6056_p11 = pnand %p6055_p10, %p6049_p7 }
  0x54   :  { %6059 = shalt.err (!%p6056_p11)
}
  0x55   :  { %58 = dma.hbm_to_vmem [thread:$0]  %s7990_s3, 4096, %s53_s23, [#allocation6], %s6113_s13, %s6113_s13, %s6114_s14  }
  0x56   :  { %s6060_s8 = scalar_lea.hbm %s7994_s7, 1024 }
  0x57   :  { %p6061_p12 = scmp.ne.s32.totalorder %s7994_s7, %s6060_s8  ;;  %p6064_p13 = scmp.lt.u32.totalorder %s6060_s8, %s7994_s7 }
  0x59   :  { %p6066_p0 = pnand %p6064_p13, %p6061_p12 }
  0x5b   :  { %6069 = shalt.err (!%p6066_p0)
}
  0x5c   :  { %s6070_s27 = scalar_lea.vmem %s6266_s6, 1024  ;;  %p6075_p2 = scmp.lt.s32.totalorder %s6266_s6, %s6266_s6 }
  0x5d   :  { %p6071_p1 = scmp.ne.s32.totalorder %s6266_s6, %s6070_s27  ;;  %p6076_p3 = scmp.lt.s32.totalorder %s6070_s27, %s6070_s27 }
  0x5f   :  { %p6077_p4 = por %p6076_p3, %p6075_p2 }
  0x61   :  { %p6078_p5 = pnand %p6077_p4, %p6071_p1 }
  0x63   :  { %6081 = shalt.err (!%p6078_p5)
}
  0x64   :  { %86 = dma.hbm_to_vmem [thread:$0]  %s7994_s7, 1024, %s6266_s6, [#allocation9], %s6118_s18, %s6118_s18, %s6119_s25  }
  0x65   :  { %s6122_s14 = smov [#allocation13]   ;;  %s6082_s28 = scalar_lea.hbm %s7997_s10, 1024 }
  0x66   :  { %s106_s23 = sshll.u32 %s6122_s14, 4  ;;  %p6083_p6 = scmp.ne.s32.totalorder %s7997_s10, %s6082_s28  ;;  %s107_s23 = int_to_ptr.vmem [resolvable:$true] %s106_s23 }
  0x67   :  { %p6086_p7 = scmp.lt.u32.totalorder %s6082_s28, %s7997_s10 }
  0x69   :  { %p6088_p8 = pnand %p6086_p7, %p6083_p6 }
  0x6b   :  { %6091 = shalt.err (!%p6088_p8)
}
  0x6c   :  { %s6092_s17 = scalar_lea.vmem %s107_s23, 1024  ;;  %p6097_p10 = scmp.lt.s32.totalorder %s107_s23, %s107_s23 }
  0x6d   :  { %p6093_p9 = scmp.ne.s32.totalorder %s107_s23, %s6092_s17  ;;  %p6098_p11 = scmp.lt.s32.totalorder %s6092_s17, %s6092_s17 }
  0x6f   :  { %p6099_p12 = por %p6098_p11, %p6097_p10 }
  0x71   :  { %p6100_p13 = pnand %p6099_p12, %p6093_p9 }
  0x73   :  { %6103 = shalt.err (!%p6100_p13)
}
  0x74   :  { %112 = dma.hbm_to_vmem [thread:$0]  %s7997_s10, 1024, %s107_s23, [#allocation12], %s6118_s18, %s6118_s18, %s6119_s25  }
  0x75   :  { %6104 = dma.done.wait [#allocation4], 8192  }
  0x76   :  { %6105 = vsyncadd [#allocation4], 4294959104 }
  0x77   :  { %6106 = dma.done.wait [#allocation6], 8192  }
  0x78   :  { %6107 = vsyncadd [#allocation6], 4294959104 }
  0x79   :  { %6108 = dma.done.wait [#allocation9], 5120  }
  0x7a   :  { %6109 = vsyncadd [#allocation9], 4294962176 }
  0x7b   :  { %6110 = dma.done.wait [#allocation12], 2048  }
  0x7c   :  { %6111 = vsyncadd [#allocation12], 4294965248  ;;  %v8001_v0 = vmov 0   ;;  %v6124_v1 = vmov 2   ;;  %v6322_v2 = vld [vmem:[%s7987_s0] sm:$0xff]  ;;  %v6125_v7 = vmov 1   ;;  %v8000_v39 = vlaneseq }
  0x7d   :  { %5462 = vset.pattern.permute.xlu0 %v8001_v0  ;;  %5464 = vset.pattern.permute.xlu1 %v6124_v1  ;;  %v6325_v3 = vld [vmem:[#allocation3 + $0x40] sm:$0xff]   ;;  %v6337_v8 = vld [vmem:[#allocation3 + $0x48] sm:$0xff]   ;;  %v6350_v12 = vld [vmem:[#allocation3 + $0x50] sm:$0xff]   ;;  %v6126_v38 = vmov 3   ;;  %v6127_v47 = vmov 4  }
  0x7e   :  { %148 = vperm.xlu0 %5462, %v6322_v2   ;;  %1034 = vperm.xlu1 %5464, %v6322_v2   ;;  %v6328_v4 = vld [vmem:[#allocation3 + $0xc0] sm:$0xff]   ;;  %v6341_v9 = vld [vmem:[#allocation3 + $0xc8] sm:$0xff]   ;;  %v6353_v13 = vld [vmem:[#allocation3 + $0xd0] sm:$0xff]   ;;  %v6431_v40 = vand.u32 127, %v8000_v39  ;;  %v8003_v49 = vmov 1.0|1.0  }
  0x7f   :  { %4649 = vmatprep.subr.bf16.mxu0 %v6325_v3  ;;  %v6331_v5 = vld [vmem:[#allocation3] sm:$0xff]   ;;  %4671 = vmatprep.subr.bf16.mxu1 %v6328_v4  ;;  %v6344_v10 = vld [vmem:[#allocation3 + $0x8] sm:$0xff]   ;;  %v6356_v14 = vld [vmem:[#allocation3 + $0x10] sm:$0xff]  }
  0x80   :  { %v6334_v6 = vld [vmem:[#allocation3 + $0x80] sm:$0xff]   ;;  %4650 = vmatpush3.bf16.msra.mxu0 %v6331_v5  ;;  %v6347_v11 = vld [vmem:[#allocation3 + $0x88] sm:$0xff]   ;;  %v6359_v15 = vld [vmem:[#allocation3 + $0x90] sm:$0xff]   ;;  %v6434_v41 = vadd.s32 128, %v6431_v40  ;;  %v6437_v42 = vadd.s32 384, %v6431_v40  ;;  %v6440_v43 = vadd.s32 256, %v6431_v40 }
  0x81   :  { %4672 = vmatpush3.bf16.msra.mxu1 %v6334_v6  ;;  %4651 = vmatprep.subr.bf16.mxu0 %v6337_v8  ;;  %v6362_v16 = vld [vmem:[#allocation3 + $0x58] sm:$0xff]   ;;  %v6374_v20 = vld [vmem:[#allocation3 + $0x60] sm:$0xff]   ;;  %v6386_v24 = vld [vmem:[#allocation3 + $0x68] sm:$0xff]   ;;  %v6443_v44 = vadd.s32 640, %v6431_v40  ;;  %v6448_v46 = vadd.s32 896, %v6431_v40 }
  0x82   :  { %5463 = vset.pattern.permute.xlu0 %v6125_v7  ;;  %4673 = vmatprep.subr.bf16.mxu1 %v6341_v9  ;;  %v6365_v17 = vld [vmem:[#allocation3 + $0xd8] sm:$0xff]   ;;  %v6377_v21 = vld [vmem:[#allocation3 + $0xe0] sm:$0xff]   ;;  %v6389_v25 = vld [vmem:[#allocation3 + $0xe8] sm:$0xff]   ;;  %8119 = vst [vmem:[#allocation18_spill] sm:$0xff] %v6437_v42 }
  0x83   :  { %847 = vperm.xlu0 %5463, %v6322_v2   ;;  %v6368_v18 = vld [vmem:[#allocation3 + $0x18] sm:$0xff]   ;;  %v6380_v22 = vld [vmem:[#allocation3 + $0x20] sm:$0xff]   ;;  %v6392_v26 = vld [vmem:[#allocation3 + $0x28] sm:$0xff]   ;;  %5465 = vset.pattern.permute.xlu1 %v6126_v38  ;;  %8120 = vst [vmem:[#allocation19_spill] sm:$0xff] %v6440_v43 }
  0x84   :  { %4652 = vmatpush3.bf16.msra.mxu0 %v6344_v10  ;;  %v6371_v19 = vld [vmem:[#allocation3 + $0x98] sm:$0xff]   ;;  %v6383_v23 = vld [vmem:[#allocation3 + $0xa0] sm:$0xff]   ;;  %v6395_v27 = vld [vmem:[#allocation3 + $0xa8] sm:$0xff]   ;;  %1221 = vperm.xlu1 %5465, %v6322_v2  }
  0x85   :  { %4674 = vmatpush3.bf16.msra.mxu1 %v6347_v11  ;;  %4653 = vmatprep.subr.bf16.mxu0 %v6350_v12  ;;  %v6398_v28 = vld [vmem:[#allocation3 + $0x70] sm:$0xff]   ;;  %v6410_v32 = vld [vmem:[#allocation3 + $0x78] sm:$0xff]   ;;  %v6421_v36 = vld [vmem:[#allocation3 + $0x140] sm:$0xff]  }
  0x86   :  { %4675 = vmatprep.subr.bf16.mxu1 %v6353_v13  ;;  %v6401_v29 = vld [vmem:[#allocation3 + $0xf0] sm:$0xff]   ;;  %v6413_v33 = vld [vmem:[#allocation3 + $0xf8] sm:$0xff]   ;;  %v6426_v37 = vld [vmem:[#allocation3 + $0x1c0] sm:$0xff]  }
  0x87   :  { %v6404_v30 = vld [vmem:[#allocation3 + $0x30] sm:$0xff]   ;;  %v6416_v34 = vld [vmem:[#allocation3 + $0x38] sm:$0xff]   ;;  %v6459_v48 = vld [vmem:[#allocation3 + $0x100] sm:$0xff]  }
  0x88   :  { %4654 = vmatpush3.bf16.msra.mxu0 %v6356_v14  ;;  %v6407_v31 = vld [vmem:[#allocation3 + $0xb0] sm:$0xff]   ;;  %v6419_v35 = vld [vmem:[#allocation3 + $0xb8] sm:$0xff]   ;;  %5466 = vset.pattern.permute.xlu1 %v6127_v47  ;;  %v6462_v50 = vld [vmem:[#allocation3 + $0x180] sm:$0xff]  }
  0x89   :  { %4676 = vmatpush3.bf16.msra.mxu1 %v6359_v15  ;;  %4655 = vmatprep.subr.bf16.mxu0 %v6362_v16  ;;  %v6469_v51 = vld [vmem:[#allocation3 + $0x148] sm:$0xff]   ;;  %v6482_v55 = vld [vmem:[#allocation3 + $0x150] sm:$0xff]   ;;  %v6496_v59 = vld [vmem:[#allocation3 + $0x158] sm:$0xff]  }
  0x8a   :  { %4677 = vmatprep.subr.bf16.mxu1 %v6365_v17  ;;  %1408 = vperm.xlu1 %5466, %v6322_v2   ;;  %v6472_v52 = vld [vmem:[#allocation3 + $0x1c8] sm:$0xff]   ;;  %v6486_v56 = vld [vmem:[#allocation3 + $0x1d0] sm:$0xff]   ;;  %8123 = vst [vmem:[#allocation22_spill] sm:$0xff] %v6496_v59  ;;  %v6499_v60 = vld [vmem:[#allocation3 + $0x1d8] sm:$0xff]  }
  0x8b   :  { %v6476_v53 = vld [vmem:[#allocation3 + $0x108] sm:$0xff]   ;;  %v6490_v57 = vld [vmem:[#allocation3 + $0x110] sm:$0xff]   ;;  %8124 = vst [vmem:[#allocation23_spill] sm:$0xff] %v6499_v60  ;;  %v6502_v61 = vld [vmem:[#allocation3 + $0x118] sm:$0xff]  }
  0x8c   :  { %4656 = vmatpush3.bf16.msra.mxu0 %v6368_v18  ;;  %v6480_v54 = vld [vmem:[#allocation3 + $0x188] sm:$0xff]   ;;  %8121 = vst [vmem:[#allocation20_spill] sm:$0xff] %v6490_v57  ;;  %v6494_v58 = vld [vmem:[#allocation3 + $0x190] sm:$0xff]   ;;  %8125 = vst [vmem:[#allocation24_spill] sm:$0xff] %v6502_v61 }
  0x8d   :  { %4678 = vmatpush3.bf16.msra.mxu1 %v6371_v19  ;;  %4657 = vmatprep.subr.bf16.mxu0 %v6374_v20  ;;  %8122 = vst [vmem:[#allocation21_spill] sm:$0xff] %v6494_v58  ;;  %v6506_v62 = vld [vmem:[#allocation3 + $0x198] sm:$0xff]   ;;  %v6508_v63 = vld [vmem:[#allocation3 + $0x160] sm:$0xff]   ;;  %v6520_v47 = vld [vmem:[#allocation3 + $0x168] sm:$0xff]  }
  0x8e   :  { %4679 = vmatprep.subr.bf16.mxu1 %v6377_v21  ;;  %8126 = vst [vmem:[#allocation25_spill] sm:$0xff] %v6506_v62  ;;  %8127 = vst [vmem:[#allocation26_spill] sm:$0xff] %v6508_v63  ;;  %v6511_v1 = vld [vmem:[#allocation3 + $0x1e0] sm:$0xff]   ;;  %v6523_v39 = vld [vmem:[#allocation3 + $0x1e8] sm:$0xff]  }
  0x8f   :  { %8128 = vst [vmem:[#allocation27_spill] sm:$0xff] %v6511_v1  ;;  %v6514_v7 = vld [vmem:[#allocation3 + $0x120] sm:$0xff]   ;;  %8131 = vst [vmem:[#allocation30_spill] sm:$0xff] %v6520_v47  ;;  %v6526_v0 = vld [vmem:[#allocation3 + $0x128] sm:$0xff]  }
  0x90   :  { %4658 = vmatpush3.bf16.msra.mxu0 %v6380_v22  ;;  %8129 = vst [vmem:[#allocation28_spill] sm:$0xff] %v6514_v7  ;;  %v6518_v38 = vld [vmem:[#allocation3 + $0x1a0] sm:$0xff]   ;;  %8132 = vst [vmem:[#allocation31_spill] sm:$0xff] %v6523_v39 }
  0x91   :  { %4680 = vmatpush3.bf16.msra.mxu1 %v6383_v23  ;;  %4659 = vmatprep.subr.bf16.mxu0 %v6386_v24  ;;  %8130 = vst [vmem:[#allocation29_spill] sm:$0xff] %v6518_v38  ;;  %8133 = vst [vmem:[#allocation32_spill] sm:$0xff] %v6526_v0 }
  0x92   :  { %4681 = vmatprep.subr.bf16.mxu1 %v6389_v25 }
  0x94   :  { %4660 = vmatpush3.bf16.msra.mxu0 %v6392_v26 }
  0x95   :  { %4682 = vmatpush3.bf16.msra.mxu1 %v6395_v27  ;;  %4661 = vmatprep.subr.bf16.mxu0 %v6398_v28 }
  0x96   :  { %4683 = vmatprep.subr.bf16.mxu1 %v6401_v29 }
  0x98   :  { %4662 = vmatpush3.bf16.msra.mxu0 %v6404_v30 }
  0x99   :  { %4684 = vmatpush3.bf16.msra.mxu1 %v6407_v31  ;;  %4663 = vmatprep.subr.bf16.mxu0 %v6410_v32 }
  0x9a   :  { %4685 = vmatprep.subr.bf16.mxu1 %v6413_v33 }
  0x9c   :  { %4664 = vmatpush3.bf16.msra.mxu0 %v6416_v34 }
  0x9d   :  { %4686 = vmatpush3.bf16.msra.mxu1 %v6419_v35  ;;  %4693 = vmatprep.subr.bf16.mxu0 %v6421_v36 }
  0x9e   :  { %4715 = vmatprep.subr.bf16.mxu1 %v6426_v37 }
  0xfd   :  { %v6445_v45 = vpop.permute.xlu0 %148 }
  0xfe   :  { %vm151_vm0 = vcmp.eq.s32.totalorder %v6434_v41, %v6445_v45  ;;  %vm153_vm1 = vcmp.eq.s32.totalorder %v6437_v42, %v6445_v45  ;;  %vm150_vm2 = vcmp.eq.s32.totalorder %v6431_v40, %v6445_v45  ;;  %vm152_vm4 = vcmp.eq.s32.totalorder %v6440_v43, %v6445_v45 }
  0xff   :  { %vm4373_vm3 = vmpackc.low %vm151_vm0, %vm151_vm0  ;;  %vm155_vm6 = vcmp.eq.s32.totalorder %v6443_v44, %v6445_v45  ;;  %vm157_vm8 = vcmp.eq.s32.totalorder %v6448_v46, %v6445_v45 }
 0x100   :  { %4374 = vmatprep.mubr.msk.bf16.mxu0 %vm4373_vm3, %v8003_v49  ;;  %vm4377_vm5 = vmpackc.low %vm153_vm1, %vm153_vm1 }
 0x101   :  { %4378 = vmatprep.mubr.msk.bf16.mxu1 %vm4377_vm5, %v8003_v49  ;;  %vm4375_vm7 = vmpackc.low %vm150_vm2, %vm150_vm2 }
 0x102   :  { %4376 = vmatmul.mubr.msk.bf16.vlgmr.msra.gmra.mrb[0].mxu0 %vm4375_vm7, %v8003_v49  ;;  %vm4379_vm9 = vmpackc.low %vm152_vm4, %vm152_vm4 }
 0x103   :  { %4380 = vmatmul.mubr.msk.bf16.vlgmr.msra.gmra.mrb[0].mxu1 %vm4379_vm9, %v8003_v49  ;;  %4694 = vmatpush3.bf16.msra.mxu0 %v6459_v48  ;;  %vm4381_vm10 = vmpackc.low %vm155_vm6, %vm155_vm6 }
 0x104   :  { %4716 = vmatpush3.bf16.msra.mxu1 %v6462_v50  ;;  %4382 = vmatprep.mubr.msk.bf16.mxu0 %vm4381_vm10, %v8003_v49  ;;  %vm4385_vm11 = vmpackc.low %vm157_vm8, %vm157_vm8 }
 0x105   :  { %4386 = vmatprep.mubr.msk.bf16.mxu1 %vm4385_vm11, %v8003_v49  ;;  %4695 = vmatprep.subr.bf16.mxu0 %v6469_v51  ;;  %v6530_v49 = vld [vmem:[#allocation3 + $0x1a8] sm:$0xff]  }
 0x106   :  { %4717 = vmatprep.subr.bf16.mxu1 %v6472_v52  ;;  %8134 = vst [vmem:[#allocation33_spill] sm:$0xff] %v6530_v49 }
 0x107   :  { %4696 = vmatpush3.bf16.msra.mxu0 %v6476_v53 }
 0x108   :  { %4718 = vmatpush3.bf16.msra.mxu1 %v6480_v54  ;;  %4697 = vmatprep.subr.bf16.mxu0 %v6482_v55 }
 0x109   :  { %4719 = vmatprep.subr.bf16.mxu1 %v6486_v56 }
 0x10b   :  { %4698 = vmatpush3.bf16.msra.mxu0 %v6490_v57 }
 0x10c   :  { %4720 = vmatpush3.bf16.msra.mxu1 %v6494_v58  ;;  %4699 = vmatprep.subr.bf16.mxu0 %v6496_v59 }
 0x10d   :  { %4721 = vmatprep.subr.bf16.mxu1 %v6499_v60 }
 0x10f   :  { %4700 = vmatpush3.bf16.msra.mxu0 %v6502_v61  ;;  %v6553_v61 = vadd.s32 768, %v6431_v40 }
 0x110   :  { %4722 = vmatpush3.bf16.msra.mxu1 %v6506_v62  ;;  %4701 = vmatprep.subr.bf16.mxu0 %v6508_v63  ;;  %v6532_v62 = vld [vmem:[#allocation3 + $0x170] sm:$0xff]  }
 0x111   :  { %4723 = vmatprep.subr.bf16.mxu1 %v6511_v1  ;;  %8135 = vst [vmem:[#allocation34_spill] sm:$0xff] %v6532_v62  ;;  %v6535_v63 = vld [vmem:[#allocation3 + $0x1f0] sm:$0xff]   ;;  %vm156_vm13 = vcmp.eq.s32.totalorder %v6553_v61, %v6445_v45 }
 0x112   :  { %v6538_v1 = vld [vmem:[#allocation3 + $0x130] sm:$0xff]   ;;  %vm4387_vm1 = vmpackc.low %vm156_vm13, %vm156_vm13 }
 0x113   :  { %4702 = vmatpush3.bf16.msra.mxu0 %v6514_v7  ;;  %v6542_v7 = vld [vmem:[#allocation3 + $0x1b0] sm:$0xff]  }
 0x114   :  { %4724 = vmatpush3.bf16.msra.mxu1 %v6518_v38  ;;  %4703 = vmatprep.subr.bf16.mxu0 %v6520_v47  ;;  %8136 = vst [vmem:[#allocation35_spill] sm:$0xff] %v6542_v7  ;;  %v6544_v38 = vld [vmem:[#allocation3 + $0x178] sm:$0xff]  }
 0x115   :  { %4725 = vmatprep.subr.bf16.mxu1 %v6523_v39  ;;  %v6547_v47 = vld [vmem:[#allocation3 + $0x1f8] sm:$0xff]   ;;  %v6550_v39 = vadd.s32 512, %v6431_v40 }
 0x117   :  { %4704 = vmatpush3.bf16.msra.mxu0 %v6526_v0  ;;  %8137 = vst [vmem:[#allocation36_spill] sm:$0xff] %v6550_v39  ;;  %v6556_v0 = vld [vmem:[#allocation3 + $0x138] sm:$0xff]   ;;  %vm154_vm12 = vcmp.eq.s32.totalorder %v6550_v39, %v6445_v45  ;;  %v8139_v39 = vmov 1.0|1.0  }
 0x118   :  { %4726 = vmatpush3.bf16.msra.mxu1 %v6530_v49  ;;  %4705 = vmatprep.subr.bf16.mxu0 %v6532_v62  ;;  %v6560_v62 = vld [vmem:[#allocation3 + $0x1b8] sm:$0xff]   ;;  %v6562_v49 = vpop.permute.xlu0 %847  ;;  %vm4383_vm15 = vmpackc.low %vm154_vm12, %vm154_vm12  ;;  %v8150_v45 = vld [vmem:[#allocation34_spill] sm:$0xff] }
 0x119   :  { %4727 = vmatprep.subr.bf16.mxu1 %v6535_v63  ;;  %8138 = vst [vmem:[#allocation37_spill] sm:$0xff] %v6560_v62  ;;  %vm850_vm14 = vcmp.eq.s32.totalorder %v6434_v41, %v6562_v49  ;;  %vm852_vm0 = vcmp.eq.s32.totalorder %v6437_v42, %v6562_v49  ;;  %vm849_vm4 = vcmp.eq.s32.totalorder %v6431_v40, %v6562_v49 }
 0x11a   :  { %vm4389_vm2 = vmpackc.low %vm850_vm14, %vm850_vm14  ;;  %vm851_vm5 = vcmp.eq.s32.totalorder %v6440_v43, %v6562_v49  ;;  %vm854_vm6 = vcmp.eq.s32.totalorder %v6443_v44, %v6562_v49  ;;  %vm856_vm8 = vcmp.eq.s32.totalorder %v6448_v46, %v6562_v49  ;;  %vm855_vm13 = vcmp.eq.s32.totalorder %v6553_v61, %v6562_v49 }
 0x11b   :  { %4706 = vmatpush3.bf16.msra.mxu0 %v6538_v1  ;;  %vm4393_vm3 = vmpackc.low %vm852_vm0, %vm852_vm0 }
 0x11c   :  { %4728 = vmatpush3.bf16.msra.mxu1 %v6542_v7  ;;  %4707 = vmatprep.subr.bf16.mxu0 %v6544_v38  ;;  %vm4391_vm7 = vmpackc.low %vm849_vm4, %vm849_vm4 }
 0x11d   :  { %4729 = vmatprep.subr.bf16.mxu1 %v6547_v47  ;;  %vm4395_vm9 = vmpackc.low %vm851_vm5, %vm851_vm5 }
 0x11e   :  { %vm4397_vm10 = vmpackc.low %vm854_vm6, %vm854_vm6 }
 0x11f   :  { %4708 = vmatpush3.bf16.msra.mxu0 %v6556_v0  ;;  %vm4401_vm11 = vmpackc.low %vm856_vm8, %vm856_vm8 }
 0x120   :  { %4730 = vmatpush3.bf16.msra.mxu1 %v6560_v62  ;;  %4737 = vmatprep.subr.bf16.mxu0 %v6325_v3  ;;  %v6129_v3 = vmov 5  }
 0x121   :  { %4759 = vmatprep.subr.bf16.mxu1 %v6328_v4  ;;  %5467 = vset.pattern.permute.xlu0 %v6129_v3  ;;  %v8141_v4 = vld [vmem:[#allocation25_spill] sm:$0xff]  ;;  %v6653_v3 = vpop.permute.xlu1 %1034 }
 0x122   :  { %4384 = vmatmul.mubr.msk.bf16.vlgmr.msra.gmra.mrb[4].mxu0 %vm4383_vm15, %v8139_v39  ;;  %1595 = vperm.xlu0 %5467, %v6322_v2   ;;  %v8140_v2 = vld [vmem:[#allocation24_spill] sm:$0xff]  ;;  %vm1037_vm14 = vcmp.eq.s32.totalorder %v6434_v41, %v6653_v3  ;;  %vm1039_vm0 = vcmp.eq.s32.totalorder %v6437_v42, %v6653_v3  ;;  %v6680_v42 = vld [vmem:[#allocation3 + $0x48] sm:$0xff]   ;;  %vm1036_vm4 = vcmp.eq.s32.totalorder %v6431_v40, %v6653_v3 }
 0x123   :  { %4388 = vmatmul.mubr.msk.bf16.vlgmr.msra.gmra.mrb[4].mxu1 %vm4387_vm1, %v8139_v39  ;;  %4738 = vmatpush3.bf16.msra.mxu0 %v6331_v5  ;;  %v8142_v5 = vld [vmem:[#allocation26_spill] sm:$0xff]  ;;  %vm4403_vm1 = vmpackc.low %vm855_vm13, %vm855_vm13  ;;  %8156 = vst [vmem:[#allocation38_spill] sm:$0xff] %v6680_v42  ;;  %vm1038_vm5 = vcmp.eq.s32.totalorder %v6440_v43, %v6653_v3  ;;  %vm1041_vm6 = vcmp.eq.s32.totalorder %v6443_v44, %v6653_v3 }
 0x124   :  { %4760 = vmatpush3.bf16.msra.mxu1 %v6334_v6  ;;  %4739 = vmatprep.subr.bf16.mxu0 %v6337_v8  ;;  %v8143_v6 = vld [vmem:[#allocation27_spill] sm:$0xff]  ;;  %v8144_v8 = vld [vmem:[#allocation28_spill] sm:$0xff]  ;;  %vm1043_vm8 = vcmp.eq.s32.totalorder %v6448_v46, %v6653_v3  ;;  %vm1042_vm13 = vcmp.eq.s32.totalorder %v6553_v61, %v6653_v3 }
 0x125   :  { %4761 = vmatprep.subr.bf16.mxu1 %v6341_v9  ;;  %4390 = vmatprep.mubr.msk.bf16.mxu0 %vm4389_vm2, %v8139_v39  ;;  %v8145_v9 = vld [vmem:[#allocation29_spill] sm:$0xff]  ;;  %vm4405_vm2 = vmpackc.low %vm1037_vm14, %vm1037_vm14 }
 0x126   :  { %4394 = vmatprep.mubr.msk.bf16.mxu1 %vm4393_vm3, %v8139_v39  ;;  %vm4409_vm3 = vmpackc.low %vm1039_vm0, %vm1039_vm0 }
 0x127   :  { %4740 = vmatpush3.bf16.msra.mxu0 %v6344_v10  ;;  %v8146_v10 = vld [vmem:[#allocation30_spill] sm:$0xff] }
 0x128   :  { %4762 = vmatpush3.bf16.msra.mxu1 %v6347_v11  ;;  %4741 = vmatprep.subr.bf16.mxu0 %v6350_v12  ;;  %v8147_v11 = vld [vmem:[#allocation31_spill] sm:$0xff]  ;;  %v8148_v12 = vld [vmem:[#allocation32_spill] sm:$0xff] }
 0x129   :  { %4763 = vmatprep.subr.bf16.mxu1 %v6353_v13  ;;  %v8149_v13 = vld [vmem:[#allocation33_spill] sm:$0xff] }
 0x12b   :  { %4742 = vmatpush3.bf16.msra.mxu0 %v6356_v14 }
 0x12c   :  { %4764 = vmatpush3.bf16.msra.mxu1 %v6359_v15  ;;  %4743 = vmatprep.subr.bf16.mxu0 %v6362_v16 }
 0x12d   :  { %4765 = vmatprep.subr.bf16.mxu1 %v6365_v17 }
 0x12f   :  { %4744 = vmatpush3.bf16.msra.mxu0 %v6368_v18 }
 0x130   :  { %4766 = vmatpush3.bf16.msra.mxu1 %v6371_v19  ;;  %4745 = vmatprep.subr.bf16.mxu0 %v6374_v20 }
 0x131   :  { %4767 = vmatprep.subr.bf16.mxu1 %v6377_v21 }
 0x133   :  { %4746 = vmatpush3.bf16.msra.mxu0 %v6380_v22 }
 0x134   :  { %4768 = vmatpush3.bf16.msra.mxu1 %v6383_v23  ;;  %4747 = vmatprep.subr.bf16.mxu0 %v6386_v24 }
 0x135   :  { %4769 = vmatprep.subr.bf16.mxu1 %v6389_v25 }
 0x137   :  { %4748 = vmatpush3.bf16.msra.mxu0 %v6392_v26 }
 0x138   :  { %4770 = vmatpush3.bf16.msra.mxu1 %v6395_v27  ;;  %4749 = vmatprep.subr.bf16.mxu0 %v6398_v28 }
 0x139   :  { %4771 = vmatprep.subr.bf16.mxu1 %v6401_v29 }
 0x13b   :  { %4750 = vmatpush3.bf16.msra.mxu0 %v6404_v30 }
 0x13c   :  { %4772 = vmatpush3.bf16.msra.mxu1 %v6407_v31  ;;  %4751 = vmatprep.subr.bf16.mxu0 %v6410_v32 }
 0x13d   :  { %4773 = vmatprep.subr.bf16.mxu1 %v6413_v33 }
 0x13f   :  { %4752 = vmatpush3.bf16.msra.mxu0 %v6416_v34 }
 0x140   :  { %4774 = vmatpush3.bf16.msra.mxu1 %v6419_v35  ;;  %4781 = vmatprep.subr.bf16.mxu0 %v6421_v36 }
 0x141   :  { %4803 = vmatprep.subr.bf16.mxu1 %v6426_v37 }
 0x142   :  { %4392 = vmatmul.mubr.msk.bf16.vlgmr.msra.gmra.mrb[8].mxu0 %vm4391_vm7, %v8139_v39  ;;  %vm4407_vm7 = vmpackc.low %vm1036_vm4, %vm1036_vm4 }
 0x143   :  { %4396 = vmatmul.mubr.msk.bf16.vlgmr.msra.gmra.mrb[8].mxu1 %vm4395_vm9, %v8139_v39  ;;  %4782 = vmatpush3.bf16.msra.mxu0 %v6459_v48  ;;  %vm4411_vm9 = vmpackc.low %vm1038_vm5, %vm1038_vm5 }
 0x144   :  { %4398 = vmatprep.mubr.msk.bf16.mxu0 %vm4397_vm10, %v8139_v39  ;;  %4804 = vmatpush3.bf16.msra.mxu1 %v6462_v50  ;;  %vm4413_vm10 = vmpackc.low %vm1041_vm6, %vm1041_vm6 }
 0x145   :  { %4402 = vmatprep.mubr.msk.bf16.mxu1 %vm4401_vm11, %v8139_v39  ;;  %4783 = vmatprep.subr.bf16.mxu0 %v6469_v51  ;;  %vm4417_vm11 = vmpackc.low %vm1043_vm8, %vm1043_vm8 }
 0x146   :  { %4805 = vmatprep.subr.bf16.mxu1 %v6472_v52 }
 0x147   :  { %4784 = vmatpush3.bf16.msra.mxu0 %v6476_v53 }
 0x148   :  { %4806 = vmatpush3.bf16.msra.mxu1 %v6480_v54  ;;  %4785 = vmatprep.subr.bf16.mxu0 %v6482_v55 }
 0x149   :  { %4807 = vmatprep.subr.bf16.mxu1 %v6486_v56 }
 0x14b   :  { %4786 = vmatpush3.bf16.msra.mxu0 %v6490_v57 }
 0x14c   :  { %4808 = vmatpush3.bf16.msra.mxu1 %v6494_v58  ;;  %4787 = vmatprep.subr.bf16.mxu0 %v6496_v59 }
 0x14d   :  { %4809 = vmatprep.subr.bf16.mxu1 %v6499_v60 }
 0x14f   :  { %4788 = vmatpush3.bf16.msra.mxu0 %v8140_v2 }
 0x150   :  { %4810 = vmatpush3.bf16.msra.mxu1 %v8141_v4  ;;  %4789 = vmatprep.subr.bf16.mxu0 %v8142_v5 }
 0x151   :  { %4811 = vmatprep.subr.bf16.mxu1 %v8143_v6 }
 0x153   :  { %4790 = vmatpush3.bf16.msra.mxu0 %v8144_v8 }
 0x154   :  { %4812 = vmatpush3.bf16.msra.mxu1 %v8145_v9  ;;  %4791 = vmatprep.subr.bf16.mxu0 %v8146_v10 }
 0x155   :  { %4813 = vmatprep.subr.bf16.mxu1 %v8147_v11  ;;  %v8151_v11 = vld [vmem:[#allocation36_spill] sm:$0xff] }
 0x156   :  { %vm853_vm12 = vcmp.eq.s32.totalorder %v8151_v11, %v6562_v49  ;;  %v6669_v11 = vld [vmem:[#allocation3 + $0xc0] sm:$0xff]  }
 0x157   :  { %4792 = vmatpush3.bf16.msra.mxu0 %v8148_v12  ;;  %vm4399_vm15 = vmpackc.low %vm853_vm12, %vm853_vm12  ;;  %8153 = vst [vmem:[#allocation32_spill] sm:$0xff] %v6669_v11  ;;  %v6674_v49 = vld [vmem:[#allocation3] sm:$0xff]  }
 0x158   :  { %4814 = vmatpush3.bf16.msra.mxu1 %v8149_v13  ;;  %4793 = vmatprep.subr.bf16.mxu0 %v8150_v45  ;;  %8154 = vst [vmem:[#allocation33_spill] sm:$0xff] %v6674_v49 }
 0x159   :  { %4815 = vmatprep.subr.bf16.mxu1 %v6535_v63 }
 0x15b   :  { %4794 = vmatpush3.bf16.msra.mxu0 %v6538_v1 }
 0x15c   :  { %4816 = vmatpush3.bf16.msra.mxu1 %v6542_v7  ;;  %4795 = vmatprep.subr.bf16.mxu0 %v6544_v38  ;;  %v6664_v7 = vld [vmem:[#allocation3 + $0x40] sm:$0xff]  }
 0x15d   :  { %4817 = vmatprep.subr.bf16.mxu1 %v6547_v47  ;;  %8152 = vst [vmem:[#allocation28_spill] sm:$0xff] %v6664_v7 }
 0x15f   :  { %4796 = vmatpush3.bf16.msra.mxu0 %v6556_v0 }
 0x160   :  { %4818 = vmatpush3.bf16.msra.mxu1 %v6560_v62  ;;  %4825 = vmatprep.subr.bf16.mxu0 %v6664_v7  ;;  %v6677_v62 = vld [vmem:[#allocation3 + $0x80] sm:$0xff]   ;;  %v6683_v7 = vld [vmem:[#allocation3 + $0xc8] sm:$0xff]  }
 0x161   :  { %4847 = vmatprep.subr.bf16.mxu1 %v6669_v11  ;;  %8155 = vst [vmem:[#allocation34_spill] sm:$0xff] %v6677_v62  ;;  %v6688_v11 = vld [vmem:[#allocation3 + $0x8] sm:$0xff]  }
 0x162   :  { %4400 = vmatmul.mubr.msk.bf16.vlgmr.msra.gmra.mrb[12].mxu0 %vm4399_vm15, %v8139_v39 }
 0x163   :  { %4404 = vmatmul.mubr.msk.bf16.vlgmr.msra.gmra.mrb[12].mxu1 %vm4403_vm1, %v8139_v39  ;;  %4826 = vmatpush3.bf16.msra.mxu0 %v6674_v49  ;;  %v6691_v49 = vld [vmem:[#allocation3 + $0x88] sm:$0xff]   ;;  %vm4419_vm1 = vmpackc.low %vm1042_vm13, %vm1042_vm13 }
 0x164   :  { %4848 = vmatpush3.bf16.msra.mxu1 %v6677_v62  ;;  %4827 = vmatprep.subr.bf16.mxu0 %v6680_v42  ;;  %v6694_v62 = vld [vmem:[#allocation3 + $0x50] sm:$0xff]  }
 0x165   :  { %4849 = vmatprep.subr.bf16.mxu1 %v6683_v7  ;;  %4406 = vmatprep.mubr.msk.bf16.mxu0 %vm4405_vm2, %v8139_v39  ;;  %v6697_v42 = vld [vmem:[#allocation3 + $0xd0] sm:$0xff]  }
 0x166   :  { %4410 = vmatprep.mubr.msk.bf16.mxu1 %vm4409_vm3, %v8139_v39 }
 0x167   :  { %4828 = vmatpush3.bf16.msra.mxu0 %v6688_v11 }
 0x168   :  { %4850 = vmatpush3.bf16.msra.mxu1 %v6691_v49  ;;  %4829 = vmatprep.subr.bf16.mxu0 %v6694_v62 }
 0x169   :  { %4851 = vmatprep.subr.bf16.mxu1 %v6697_v42 }
 0x16b   :  { %4830 = vmatpush3.bf16.msra.mxu0 %v6356_v14  ;;  %v6130_v14 = vmov 6  }
 0x16c   :  { %4852 = vmatpush3.bf16.msra.mxu1 %v6359_v15  ;;  %4831 = vmatprep.subr.bf16.mxu0 %v6362_v16  ;;  %v6729_v15 = vld [vmem:[%s7987_s0] sm:$0xff]  ;;  %v8157_v16 = vld [vmem:[#allocation31_spill] sm:$0xff] }
 0x16d   :  { %4853 = vmatprep.subr.bf16.mxu1 %v6365_v17  ;;  %5468 = vset.pattern.permute.xlu1 %v6130_v14  ;;  %v8158_v17 = vld [vmem:[#allocation35_spill] sm:$0xff] }
 0x16e   :  { %1782 = vperm.xlu1 %5468, %v6729_v15   ;;  %v6832_v14 = vld [vmem:[#allocation3 + $0x28] sm:$0xff]  }
 0x16f   :  { %4832 = vmatpush3.bf16.msra.mxu0 %v6368_v18  ;;  %v6769_v18 = vpop.permute.xlu1 %1221  ;;  %8177 = vst [vmem:[#allocation39_spill] sm:$0xff] %v6832_v14 }
 0x170   :  { %4854 = vmatpush3.bf16.msra.mxu1 %v6371_v19  ;;  %4833 = vmatprep.subr.bf16.mxu0 %v6374_v20  ;;  %v8159_v19 = vld [vmem:[#allocation36_spill] sm:$0xff]  ;;  %vm1224_vm14 = vcmp.eq.s32.totalorder %v6434_v41, %v6769_v18  ;;  %v8160_v20 = vld [vmem:[#allocation37_spill] sm:$0xff]  ;;  %vm1223_vm4 = vcmp.eq.s32.totalorder %v6431_v40, %v6769_v18  ;;  %vm1225_vm5 = vcmp.eq.s32.totalorder %v6440_v43, %v6769_v18  ;;  %v6871_v43 = vld [vmem:[#allocation3 + $0x140] sm:$0xff]  }
 0x171   :  { %4855 = vmatprep.subr.bf16.mxu1 %v6377_v21  ;;  %vm1040_vm12 = vcmp.eq.s32.totalorder %v8159_v19, %v6653_v3  ;;  %v8161_v21 = vld [vmem:[#allocation28_spill] sm:$0xff]  ;;  %vm4421_vm2 = vmpackc.low %vm1224_vm14, %vm1224_vm14  ;;  %v6829_v3 = vld [vmem:[#allocation3 + $0xe8] sm:$0xff]   ;;  %vm1228_vm6 = vcmp.eq.s32.totalorder %v6443_v44, %v6769_v18  ;;  %vm1230_vm8 = vcmp.eq.s32.totalorder %v6448_v46, %v6769_v18  ;;  %vm1229_vm13 = vcmp.eq.s32.totalorder %v6553_v61, %v6769_v18 }
 0x172   :  { %vm4415_vm15 = vmpackc.low %vm1040_vm12, %vm1040_vm12  ;;  %vm1227_vm12 = vcmp.eq.s32.totalorder %v8159_v19, %v6769_v18 }
 0x173   :  { %4834 = vmatpush3.bf16.msra.mxu0 %v6380_v22  ;;  %v8162_v22 = vld [vmem:[#allocation18_spill] sm:$0xff] }
 0x174   :  { %4856 = vmatpush3.bf16.msra.mxu1 %v6383_v23  ;;  %4835 = vmatprep.subr.bf16.mxu0 %v6386_v24  ;;  %vm1226_vm0 = vcmp.eq.s32.totalorder %v8162_v22, %v6769_v18  ;;  %v8163_v23 = vld [vmem:[#allocation32_spill] sm:$0xff]  ;;  %v8164_v24 = vld [vmem:[#allocation33_spill] sm:$0xff] }
 0x175   :  { %4857 = vmatprep.subr.bf16.mxu1 %v6389_v25  ;;  %vm4425_vm3 = vmpackc.low %vm1226_vm0, %vm1226_vm0  ;;  %v8165_v25 = vld [vmem:[#allocation34_spill] sm:$0xff] }
 0x177   :  { %4836 = vmatpush3.bf16.msra.mxu0 %v6392_v26  ;;  %v8166_v26 = vld [vmem:[#allocation38_spill] sm:$0xff] }
 0x178   :  { %4858 = vmatpush3.bf16.msra.mxu1 %v6395_v27  ;;  %4837 = vmatprep.subr.bf16.mxu0 %v6398_v28  ;;  %v6796_v27 = vld [vmem:[#allocation3 + $0x10] sm:$0xff]   ;;  %8176 = vst [vmem:[#allocation38_spill] sm:$0xff] %v6829_v3 }
 0x179   :  { %4859 = vmatprep.subr.bf16.mxu1 %v6401_v29  ;;  %v6799_v28 = vld [vmem:[#allocation3 + $0x90] sm:$0xff]   ;;  %v6802_v29 = vld [vmem:[#allocation3 + $0x58] sm:$0xff]  }
 0x17a   :  { %8167 = vst [vmem:[#allocation31_spill] sm:$0xff] %v6802_v29 }
 0x17b   :  { %4838 = vmatpush3.bf16.msra.mxu0 %v6404_v30  ;;  %v6805_v30 = vld [vmem:[#allocation3 + $0xd8] sm:$0xff]  }
 0x17c   :  { %4860 = vmatpush3.bf16.msra.mxu1 %v6407_v31  ;;  %4839 = vmatprep.subr.bf16.mxu0 %v6410_v32  ;;  %8168 = vst [vmem:[#allocation35_spill] sm:$0xff] %v6805_v30  ;;  %v6808_v31 = vld [vmem:[#allocation3 + $0x18] sm:$0xff]  }
 0x17d   :  { %4861 = vmatprep.subr.bf16.mxu1 %v6413_v33  ;;  %8169 = vst [vmem:[#allocation36_spill] sm:$0xff] %v6808_v31  ;;  %v6811_v32 = vld [vmem:[#allocation3 + $0x98] sm:$0xff]   ;;  %v6814_v33 = vld [vmem:[#allocation3 + $0x60] sm:$0xff]  }
 0x17e   :  { %8170 = vst [vmem:[#allocation37_spill] sm:$0xff] %v6811_v32  ;;  %8171 = vst [vmem:[#allocation28_spill] sm:$0xff] %v6814_v33 }
 0x17f   :  { %4840 = vmatpush3.bf16.msra.mxu0 %v6416_v34  ;;  %v6817_v34 = vld [vmem:[#allocation3 + $0xe0] sm:$0xff]  }
 0x180   :  { %4862 = vmatpush3.bf16.msra.mxu1 %v6419_v35  ;;  %4869 = vmatprep.subr.bf16.mxu0 %v6421_v36  ;;  %8172 = vst [vmem:[#allocation18_spill] sm:$0xff] %v6817_v34  ;;  %v6820_v35 = vld [vmem:[#allocation3 + $0x20] sm:$0xff]  }
 0x181   :  { %4891 = vmatprep.subr.bf16.mxu1 %v6426_v37  ;;  %8173 = vst [vmem:[#allocation32_spill] sm:$0xff] %v6820_v35  ;;  %v6823_v36 = vld [vmem:[#allocation3 + $0xa0] sm:$0xff]   ;;  %v6826_v37 = vld [vmem:[#allocation3 + $0x68] sm:$0xff]  }
 0x182   :  { %4408 = vmatmul.mubr.msk.bf16.vlgmr.msra.gmra.mrb[16].mxu0 %vm4407_vm7, %v8139_v39  ;;  %8174 = vst [vmem:[#allocation33_spill] sm:$0xff] %v6823_v36  ;;  %8175 = vst [vmem:[#allocation34_spill] sm:$0xff] %v6826_v37 }
 0x183   :  { %4412 = vmatmul.mubr.msk.bf16.vlgmr.msra.gmra.mrb[16].mxu1 %vm4411_vm9, %v8139_v39  ;;  %4870 = vmatpush3.bf16.msra.mxu0 %v6459_v48  ;;  %vm4423_vm7 = vmpackc.low %vm1223_vm4, %vm1223_vm4 }
 0x184   :  { %4414 = vmatprep.mubr.msk.bf16.mxu0 %vm4413_vm10, %v8139_v39  ;;  %4892 = vmatpush3.bf16.msra.mxu1 %v6462_v50  ;;  %vm4427_vm9 = vmpackc.low %vm1225_vm5, %vm1225_vm5 }
 0x185   :  { %4418 = vmatprep.mubr.msk.bf16.mxu1 %vm4417_vm11, %v8139_v39  ;;  %4871 = vmatprep.subr.bf16.mxu0 %v6469_v51  ;;  %vm4429_vm10 = vmpackc.low %vm1228_vm6, %vm1228_vm6 }
 0x186   :  { %4893 = vmatprep.subr.bf16.mxu1 %v6472_v52  ;;  %vm4433_vm11 = vmpackc.low %vm1230_vm8, %vm1230_vm8 }
 0x187   :  { %4872 = vmatpush3.bf16.msra.mxu0 %v6476_v53 }
 0x188   :  { %4894 = vmatpush3.bf16.msra.mxu1 %v6480_v54  ;;  %4873 = vmatprep.subr.bf16.mxu0 %v6482_v55 }
 0x189   :  { %4895 = vmatprep.subr.bf16.mxu1 %v6486_v56 }
 0x18b   :  { %4874 = vmatpush3.bf16.msra.mxu0 %v6490_v57 }
 0x18c   :  { %4896 = vmatpush3.bf16.msra.mxu1 %v6494_v58  ;;  %4875 = vmatprep.subr.bf16.mxu0 %v6496_v59 }
 0x18d   :  { %4897 = vmatprep.subr.bf16.mxu1 %v6499_v60 }
 0x18f   :  { %4876 = vmatpush3.bf16.msra.mxu0 %v8140_v2 }
 0x190   :  { %4898 = vmatpush3.bf16.msra.mxu1 %v8141_v4  ;;  %4877 = vmatprep.subr.bf16.mxu0 %v8142_v5 }
 0x191   :  { %4899 = vmatprep.subr.bf16.mxu1 %v8143_v6 }
 0x193   :  { %4878 = vmatpush3.bf16.msra.mxu0 %v8144_v8 }
 0x194   :  { %4900 = vmatpush3.bf16.msra.mxu1 %v8145_v9  ;;  %4879 = vmatprep.subr.bf16.mxu0 %v8146_v10 }
 0x195   :  { %4901 = vmatprep.subr.bf16.mxu1 %v8157_v16 }
 0x197   :  { %4880 = vmatpush3.bf16.msra.mxu0 %v8148_v12 }
 0x198   :  { %4902 = vmatpush3.bf16.msra.mxu1 %v8149_v13  ;;  %4881 = vmatprep.subr.bf16.mxu0 %v8150_v45 }
 0x199   :  { %4903 = vmatprep.subr.bf16.mxu1 %v6535_v63 }
 0x19b   :  { %4882 = vmatpush3.bf16.msra.mxu0 %v6538_v1 }
 0x19c   :  { %4904 = vmatpush3.bf16.msra.mxu1 %v8158_v17  ;;  %4883 = vmatprep.subr.bf16.mxu0 %v6544_v38 }
 0x19d   :  { %4905 = vmatprep.subr.bf16.mxu1 %v6547_v47 }
 0x19f   :  { %4884 = vmatpush3.bf16.msra.mxu0 %v6556_v0 }
 0x1a0   :  { %4906 = vmatpush3.bf16.msra.mxu1 %v8160_v20  ;;  %4913 = vmatprep.subr.bf16.mxu0 %v8161_v21 }
 0x1a1   :  { %4935 = vmatprep.subr.bf16.mxu1 %v8163_v23 }
 0x1a2   :  { %4416 = vmatmul.mubr.msk.bf16.vlgmr.msra.gmra.mrb[20].mxu0 %vm4415_vm15, %v8139_v39  ;;  %vm4431_vm15 = vmpackc.low %vm1227_vm12, %vm1227_vm12 }
 0x1a3   :  { %4420 = vmatmul.mubr.msk.bf16.vlgmr.msra.gmra.mrb[20].mxu1 %vm4419_vm1, %v8139_v39  ;;  %4914 = vmatpush3.bf16.msra.mxu0 %v8164_v24  ;;  %vm4435_vm1 = vmpackc.low %vm1229_vm13, %vm1229_vm13 }
 0x1a4   :  { %4936 = vmatpush3.bf16.msra.mxu1 %v8165_v25  ;;  %4915 = vmatprep.subr.bf16.mxu0 %v8166_v26 }
 0x1a5   :  { %4937 = vmatprep.subr.bf16.mxu1 %v6683_v7  ;;  %4422 = vmatprep.mubr.msk.bf16.mxu0 %vm4421_vm2, %v8139_v39 }
 0x1a6   :  { %4426 = vmatprep.mubr.msk.bf16.mxu1 %vm4425_vm3, %v8139_v39 }
 0x1a7   :  { %4916 = vmatpush3.bf16.msra.mxu0 %v6688_v11 }
 0x1a8   :  { %4938 = vmatpush3.bf16.msra.mxu1 %v6691_v49  ;;  %4917 = vmatprep.subr.bf16.mxu0 %v6694_v62 }
 0x1a9   :  { %4939 = vmatprep.subr.bf16.mxu1 %v6697_v42 }
 0x1ab   :  { %4918 = vmatpush3.bf16.msra.mxu0 %v6796_v27 }
 0x1ac   :  { %4940 = vmatpush3.bf16.msra.mxu1 %v6799_v28  ;;  %4919 = vmatprep.subr.bf16.mxu0 %v6802_v29 }
 0x1ad   :  { %4941 = vmatprep.subr.bf16.mxu1 %v6805_v30 }
 0x1af   :  { %4920 = vmatpush3.bf16.msra.mxu0 %v6808_v31 }
 0x1b0   :  { %4942 = vmatpush3.bf16.msra.mxu1 %v6811_v32  ;;  %4921 = vmatprep.subr.bf16.mxu0 %v6814_v33 }
 0x1b1   :  { %4943 = vmatprep.subr.bf16.mxu1 %v6817_v34  ;;  %v6835_v34 = vld [vmem:[#allocation3 + $0xa8] sm:$0xff]  }
 0x1b3   :  { %4922 = vmatpush3.bf16.msra.mxu0 %v6820_v35  ;;  %v6838_v35 = vld [vmem:[#allocation3 + $0x70] sm:$0xff]  }
 0x1b4   :  { %4944 = vmatpush3.bf16.msra.mxu1 %v6823_v36  ;;  %4923 = vmatprep.subr.bf16.mxu0 %v6826_v37  ;;  %8178 = vst [vmem:[#allocation40_spill] sm:$0xff] %v6838_v35  ;;  %v6841_v36 = vld [vmem:[#allocation3 + $0xf0] sm:$0xff]  }
 0x1b5   :  { %4945 = vmatprep.subr.bf16.mxu1 %v6829_v3  ;;  %v6844_v37 = vld [vmem:[#allocation3 + $0x30] sm:$0xff]  }
 0x1b6   :  { %8179 = vst [vmem:[#allocation41_spill] sm:$0xff] %v6844_v37  ;;  %v6847_v3 = vld [vmem:[#allocation3 + $0xb0] sm:$0xff]  }
 0x1b7   :  { %4924 = vmatpush3.bf16.msra.mxu0 %v6832_v14  ;;  %8180 = vst [vmem:[#allocation42_spill] sm:$0xff] %v6847_v3  ;;  %v6850_v14 = vld [vmem:[#allocation3 + $0x78] sm:$0xff]  }
 0x1b8   :  { %4946 = vmatpush3.bf16.msra.mxu1 %v6835_v34  ;;  %4925 = vmatprep.subr.bf16.mxu0 %v6838_v35  ;;  %v6855_v35 = vld [vmem:[#allocation3 + $0xf8] sm:$0xff]  }
 0x1b9   :  { %4947 = vmatprep.subr.bf16.mxu1 %v6841_v36  ;;  %8181 = vst [vmem:[#allocation43_spill] sm:$0xff] %v6855_v35 }
 0x1bb   :  { %4926 = vmatpush3.bf16.msra.mxu0 %v6844_v37  ;;  %v6131_v37 = vmov 7  }
 0x1bc   :  { %4948 = vmatpush3.bf16.msra.mxu1 %v6847_v3  ;;  %4927 = vmatprep.subr.bf16.mxu0 %v6850_v14  ;;  %v6862_v3 = vld [vmem:[#allocation3 + $0x38] sm:$0xff]  }
 0x1bd   :  { %4949 = vmatprep.subr.bf16.mxu1 %v6855_v35  ;;  %5469 = vset.pattern.permute.xlu1 %v6131_v37  ;;  %v6868_v35 = vld [vmem:[#allocation3 + $0xb8] sm:$0xff]  }
 0x1be   :  { %5470 = vset.pattern.permute.xlu0 %v6131_v37  ;;  %1969 = vperm.xlu1 %5469, %v6729_v15   ;;  %v6874_v37 = vld [vmem:[#allocation3 + $0x1c0] sm:$0xff]  }
 0x1bf   :  { %4928 = vmatpush3.bf16.msra.mxu0 %v6862_v3 }
 0x1c0   :  { %4950 = vmatpush3.bf16.msra.mxu1 %v6868_v35  ;;  %4957 = vmatprep.subr.bf16.mxu0 %v6871_v43 }
 0x1c1   :  { %4979 = vmatprep.subr.bf16.mxu1 %v6874_v37 }
 0x1c2   :  { %4424 = vmatmul.mubr.msk.bf16.vlgmr.msra.gmra.mrb[24].mxu0 %vm4423_vm7, %v8139_v39 }
 0x1c3   :  { %4428 = vmatmul.mubr.msk.bf16.vlgmr.msra.gmra.mrb[24].mxu1 %vm4427_vm9, %v8139_v39  ;;  %4958 = vmatpush3.bf16.msra.mxu0 %v6459_v48 }
 0x1c4   :  { %4430 = vmatprep.mubr.msk.bf16.mxu0 %vm4429_vm10, %v8139_v39  ;;  %4980 = vmatpush3.bf16.msra.mxu1 %v6462_v50 }
 0x1c5   :  { %4434 = vmatprep.mubr.msk.bf16.mxu1 %vm4433_vm11, %v8139_v39  ;;  %4959 = vmatprep.subr.bf16.mxu0 %v6469_v51 }
 0x1c6   :  { %4981 = vmatprep.subr.bf16.mxu1 %v6472_v52 }
 0x1c7   :  { %4960 = vmatpush3.bf16.msra.mxu0 %v6476_v53 }
 0x1c8   :  { %4982 = vmatpush3.bf16.msra.mxu1 %v6480_v54  ;;  %4961 = vmatprep.subr.bf16.mxu0 %v6482_v55 }
 0x1c9   :  { %4983 = vmatprep.subr.bf16.mxu1 %v6486_v56 }
 0x1cb   :  { %4962 = vmatpush3.bf16.msra.mxu0 %v6490_v57 }
 0x1cc   :  { %4984 = vmatpush3.bf16.msra.mxu1 %v6494_v58  ;;  %4963 = vmatprep.subr.bf16.mxu0 %v6496_v59 }
 0x1cd   :  { %4985 = vmatprep.subr.bf16.mxu1 %v6499_v60 }
 0x1cf   :  { %4964 = vmatpush3.bf16.msra.mxu0 %v8140_v2 }
 0x1d0   :  { %4986 = vmatpush3.bf16.msra.mxu1 %v8141_v4  ;;  %4965 = vmatprep.subr.bf16.mxu0 %v8142_v5 }
 0x1d1   :  { %4987 = vmatprep.subr.bf16.mxu1 %v8143_v6 }
 0x1d3   :  { %4966 = vmatpush3.bf16.msra.mxu0 %v8144_v8 }
 0x1d4   :  { %4988 = vmatpush3.bf16.msra.mxu1 %v8145_v9  ;;  %4967 = vmatprep.subr.bf16.mxu0 %v8146_v10 }
 0x1d5   :  { %v4665_v15 = vpop.f32.mrb[0].mxu0  ;;  %4989 = vmatprep.subr.bf16.mxu1 %v8157_v16 }
 0x1d6   :  { %v4687_v59 = vpop.f32.mrb[0].mxu1  ;;  %v4666_v58 = vpop.f32.mrb[1].mxu0 }
 0x1d7   :  { %v4667_v60 = vadd.f32 %v4666_v58, %v4665_v15  ;;  %v4688_v57 = vpop.f32.mrb[1].mxu1  ;;  %4968 = vmatpush3.bf16.msra.mxu0 %v8148_v12  ;;  %v4668_v4 = vpop.f32.mrb[2].mxu0 }
 0x1d8   :  { %v4689_v2 = vadd.f32 %v4688_v57, %v4687_v59  ;;  %4990 = vmatpush3.bf16.msra.mxu1 %v8149_v13  ;;  %v4690_v6 = vpop.f32.mrb[2].mxu1  ;;  %v4669_v5 = vpop.f32.mrb[3].mxu0  ;;  %4969 = vmatprep.subr.bf16.mxu0 %v8150_v45  ;;  %v8182_v57 = vld [vmem:[#allocation18_spill] sm:$0xff]  ;;  %v8183_v59 = vld [vmem:[#allocation32_spill] sm:$0xff] }
 0x1d9   :  { %v4691_v9 = vpop.f32.mrb[3].mxu1  ;;  %4991 = vmatprep.subr.bf16.mxu1 %v6535_v63  ;;  %v6912_v58 = vpop.permute.xlu1 %1408  ;;  %v8186_v5 = vld [vmem:[#allocation38_spill] sm:$0xff] }
 0x1da   :  { %v761_v10 = vadd.f32 %v4689_v2, %v4667_v60  ;;  %vm1411_vm14 = vcmp.eq.s32.totalorder %v6434_v41, %v6912_v58  ;;  %vm1413_vm0 = vcmp.eq.s32.totalorder %v8162_v22, %v6912_v58  ;;  %v8184_v60 = vld [vmem:[#allocation33_spill] sm:$0xff]  ;;  %v8185_v2 = vld [vmem:[#allocation34_spill] sm:$0xff]  ;;  %vm1410_vm4 = vcmp.eq.s32.totalorder %v6431_v40, %v6912_v58 }
 0x1db   :  { %4970 = vmatpush3.bf16.msra.mxu0 %v6538_v1  ;;  %vm4437_vm2 = vmpackc.low %vm1411_vm14, %vm1411_vm14  ;;  %vm1415_vm6 = vcmp.eq.s32.totalorder %v6443_v44, %v6912_v58  ;;  %vm1417_vm8 = vcmp.eq.s32.totalorder %v6448_v46, %v6912_v58  ;;  %vm1414_vm12 = vcmp.eq.s32.totalorder %v8159_v19, %v6912_v58  ;;  %vm1416_vm13 = vcmp.eq.s32.totalorder %v6553_v61, %v6912_v58 }
 0x1dc   :  { %4992 = vmatpush3.bf16.msra.mxu1 %v8158_v17  ;;  %4971 = vmatprep.subr.bf16.mxu0 %v6544_v38  ;;  %vm4441_vm3 = vmpackc.low %vm1413_vm0, %vm1413_vm0 }
 0x1dd   :  { %4993 = vmatprep.subr.bf16.mxu1 %v6547_v47  ;;  %vm4439_vm7 = vmpackc.low %vm1410_vm4, %vm1410_vm4 }
 0x1de   :  { %vm4445_vm10 = vmpackc.low %vm1415_vm6, %vm1415_vm6 }
 0x1df   :  { %4972 = vmatpush3.bf16.msra.mxu0 %v6556_v0  ;;  %vm4449_vm11 = vmpackc.low %vm1417_vm8, %vm1417_vm8 }
 0x1e0   :  { %4994 = vmatpush3.bf16.msra.mxu1 %v8160_v20  ;;  %5001 = vmatprep.subr.bf16.mxu0 %v8161_v21 }
 0x1e1   :  { %5023 = vmatprep.subr.bf16.mxu1 %v8163_v23 }
 0x1e2   :  { %4432 = vmatmul.mubr.msk.bf16.vlgmr.msra.gmra.mrb[28].mxu0 %vm4431_vm15, %v8139_v39  ;;  %vm4447_vm15 = vmpackc.low %vm1414_vm12, %vm1414_vm12 }
 0x1e3   :  { %4436 = vmatmul.mubr.msk.bf16.vlgmr.msra.gmra.mrb[28].mxu1 %vm4435_vm1, %v8139_v39  ;;  %5002 = vmatpush3.bf16.msra.mxu0 %v8164_v24  ;;  %vm4451_vm1 = vmpackc.low %vm1416_vm13, %vm1416_vm13 }
 0x1e4   :  { %5024 = vmatpush3.bf16.msra.mxu1 %v8165_v25  ;;  %5003 = vmatprep.subr.bf16.mxu0 %v8166_v26 }
 0x1e5   :  { %5025 = vmatprep.subr.bf16.mxu1 %v6683_v7  ;;  %4438 = vmatprep.mubr.msk.bf16.mxu0 %vm4437_vm2, %v8139_v39 }
 0x1e6   :  { %4442 = vmatprep.mubr.msk.bf16.mxu1 %vm4441_vm3, %v8139_v39 }
 0x1e7   :  { %5004 = vmatpush3.bf16.msra.mxu0 %v6688_v11 }
 0x1e8   :  { %5026 = vmatpush3.bf16.msra.mxu1 %v6691_v49  ;;  %5005 = vmatprep.subr.bf16.mxu0 %v6694_v62 }
 0x1e9   :  { %5027 = vmatprep.subr.bf16.mxu1 %v6697_v42 }
 0x1eb   :  { %5006 = vmatpush3.bf16.msra.mxu0 %v6796_v27 }
 0x1ec   :  { %5028 = vmatpush3.bf16.msra.mxu1 %v6799_v28  ;;  %5007 = vmatprep.subr.bf16.mxu0 %v6802_v29 }
 0x1ed   :  { %5029 = vmatprep.subr.bf16.mxu1 %v6805_v30  ;;  %v8187_v30 = vld [vmem:[#allocation39_spill] sm:$0xff] }
 0x1ef   :  { %5008 = vmatpush3.bf16.msra.mxu0 %v6808_v31 }
 0x1f0   :  { %5030 = vmatpush3.bf16.msra.mxu1 %v6811_v32  ;;  %5009 = vmatprep.subr.bf16.mxu0 %v6814_v33 }
 0x1f1   :  { %5031 = vmatprep.subr.bf16.mxu1 %v8182_v57 }
 0x1f3   :  { %5010 = vmatpush3.bf16.msra.mxu0 %v8183_v59  ;;  %v8188_v59 = vld [vmem:[#allocation40_spill] sm:$0xff] }
 0x1f4   :  { %5032 = vmatpush3.bf16.msra.mxu1 %v8184_v60  ;;  %5011 = vmatprep.subr.bf16.mxu0 %v8185_v2 }
 0x1f5   :  { %v4709_v4 = vpop.f32.mrb[4].mxu0  ;;  %5033 = vmatprep.subr.bf16.mxu1 %v8186_v5  ;;  %v8189_v5 = vld [vmem:[#allocation41_spill] sm:$0xff] }
 0x1f6   :  { %v4731_v6 = vpop.f32.mrb[4].mxu1  ;;  %v4710_v9 = vpop.f32.mrb[5].mxu0 }
 0x1f7   :  { %v4711_v18 = vadd.f32 %v4710_v9, %v4709_v4  ;;  %v4732_v15 = vpop.f32.mrb[5].mxu1  ;;  %v4712_v31 = vpop.f32.mrb[6].mxu0  ;;  %5012 = vmatpush3.bf16.msra.mxu0 %v8187_v30  ;;  %v8190_v4 = vld [vmem:[#allocation42_spill] sm:$0xff] }
 0x1f8   :  { %v4733_v32 = vadd.f32 %v4732_v15, %v4731_v6  ;;  %v4734_v33 = vpop.f32.mrb[6].mxu1  ;;  %5034 = vmatpush3.bf16.msra.mxu1 %v6835_v34  ;;  %v4713_v57 = vpop.f32.mrb[7].mxu0  ;;  %5013 = vmatprep.subr.bf16.mxu0 %v8188_v59  ;;  %v8191_v31 = vld [vmem:[#allocation43_spill] sm:$0xff] }
 0x1f9   :  { %v801_v60 = vadd.f32 %v4711_v18, %v761_v10  ;;  %v4735_v29 = vpop.f32.mrb[7].mxu1  ;;  %5035 = vmatprep.subr.bf16.mxu1 %v6841_v36  ;;  %v8192_v33 = vld [vmem:[#allocation19_spill] sm:$0xff]  ;;  %v8193_v10 = vld [vmem:[#allocation20_spill] sm:$0xff] }
 0x1fa   :  { %vm1412_vm5 = vcmp.eq.s32.totalorder %v8192_v33, %v6912_v58  ;;  %v8195_v29 = vld [vmem:[#allocation22_spill] sm:$0xff] }
 0x1fb   :  { %v6955_v2 = vadd.f32 %v4733_v32, %v801_v60  ;;  %5014 = vmatpush3.bf16.msra.mxu0 %v8189_v5  ;;  %vm4443_vm9 = vmpackc.low %vm1412_vm5, %vm1412_vm5  ;;  %v8197_v32 = vld [vmem:[#allocation24_spill] sm:$0xff]  ;;  %v8212_v58 = vld [vmem:[#allocation38_spill] sm:$0xff] }
 0x1fc   :  { %5036 = vmatpush3.bf16.msra.mxu1 %v8190_v4  ;;  %5015 = vmatprep.subr.bf16.mxu0 %v6850_v14 }
 0x1fd   :  { %5037 = vmatprep.subr.bf16.mxu1 %v8191_v31 }
 0x1ff   :  { %5016 = vmatpush3.bf16.msra.mxu0 %v6862_v3 }
 0x200   :  { %5038 = vmatpush3.bf16.msra.mxu1 %v6868_v35  ;;  %5045 = vmatprep.subr.bf16.mxu0 %v6871_v43 }
 0x201   :  { %5067 = vmatprep.subr.bf16.mxu1 %v6874_v37 }
 0x202   :  { %4440 = vmatmul.mubr.msk.bf16.vlgmr.msra.gmra.mrb[32].mxu0 %vm4439_vm7, %v8139_v39 }
 0x203   :  { %4444 = vmatmul.mubr.msk.bf16.vlgmr.msra.gmra.mrb[32].mxu1 %vm4443_vm9, %v8139_v39  ;;  %5046 = vmatpush3.bf16.msra.mxu0 %v6459_v48  ;;  %v8194_v48 = vld [vmem:[#allocation21_spill] sm:$0xff] }
 0x204   :  { %4446 = vmatprep.mubr.msk.bf16.mxu0 %vm4445_vm10, %v8139_v39  ;;  %5068 = vmatpush3.bf16.msra.mxu1 %v6462_v50  ;;  %v8196_v50 = vld [vmem:[#allocation23_spill] sm:$0xff] }
 0x205   :  { %4450 = vmatprep.mubr.msk.bf16.mxu1 %vm4449_vm11, %v8139_v39  ;;  %5047 = vmatprep.subr.bf16.mxu0 %v6469_v51  ;;  %v8198_v51 = vld [vmem:[#allocation25_spill] sm:$0xff] }
 0x206   :  { %5069 = vmatprep.subr.bf16.mxu1 %v6472_v52  ;;  %v8199_v52 = vld [vmem:[#allocation26_spill] sm:$0xff] }
 0x207   :  { %5048 = vmatpush3.bf16.msra.mxu0 %v6476_v53  ;;  %v8200_v53 = vld [vmem:[#allocation27_spill] sm:$0xff] }
 0x208   :  { %5070 = vmatpush3.bf16.msra.mxu1 %v6480_v54  ;;  %5049 = vmatprep.subr.bf16.mxu0 %v6482_v55  ;;  %v8201_v54 = vld [vmem:[#allocation29_spill] sm:$0xff]  ;;  %v8202_v55 = vld [vmem:[#allocation30_spill] sm:$0xff] }
 0x209   :  { %5071 = vmatprep.subr.bf16.mxu1 %v6486_v56 }
 0x20b   :  { %5050 = vmatpush3.bf16.msra.mxu0 %v8193_v10 }
 0x20c   :  { %5072 = vmatpush3.bf16.msra.mxu1 %v8194_v48  ;;  %5051 = vmatprep.subr.bf16.mxu0 %v8195_v29 }
 0x20d   :  { %5073 = vmatprep.subr.bf16.mxu1 %v8196_v50 }
 0x20f   :  { %5052 = vmatpush3.bf16.msra.mxu0 %v8197_v32 }
 0x210   :  { %5074 = vmatpush3.bf16.msra.mxu1 %v8198_v51  ;;  %5053 = vmatprep.subr.bf16.mxu0 %v8199_v52 }
 0x211   :  { %5075 = vmatprep.subr.bf16.mxu1 %v8200_v53 }
 0x213   :  { %5054 = vmatpush3.bf16.msra.mxu0 %v8144_v8 }
 0x214   :  { %5076 = vmatpush3.bf16.msra.mxu1 %v8201_v54  ;;  %5055 = vmatprep.subr.bf16.mxu0 %v8202_v55 }
 0x215   :  { %v4753_v56 = vpop.f32.mrb[8].mxu0  ;;  %5077 = vmatprep.subr.bf16.mxu1 %v8157_v16  ;;  %v7004_v16 = vpop.permute.xlu0 %1595 }
 0x216   :  { %v4775_v57 = vpop.f32.mrb[8].mxu1  ;;  %v4754_v60 = vpop.f32.mrb[9].mxu0  ;;  %vm1598_vm14 = vcmp.eq.s32.totalorder %v6434_v41, %v7004_v16  ;;  %vm1600_vm0 = vcmp.eq.s32.totalorder %v8162_v22, %v7004_v16  ;;  %vm1597_vm4 = vcmp.eq.s32.totalorder %v6431_v40, %v7004_v16  ;;  %vm1599_vm5 = vcmp.eq.s32.totalorder %v8192_v33, %v7004_v16 }
 0x217   :  { %v4755_v6 = vadd.f32 %v4754_v60, %v4753_v56  ;;  %v4776_v9 = vpop.f32.mrb[9].mxu1  ;;  %v4756_v18 = vpop.f32.mrb[10].mxu0  ;;  %5056 = vmatpush3.bf16.msra.mxu0 %v8148_v12  ;;  %vm4453_vm2 = vmpackc.low %vm1598_vm14, %vm1598_vm14  ;;  %v8208_v12 = vld [vmem:[#allocation18_spill] sm:$0xff]  ;;  %vm1602_vm6 = vcmp.eq.s32.totalorder %v6443_v44, %v7004_v16  ;;  %vm1604_vm8 = vcmp.eq.s32.totalorder %v6448_v46, %v7004_v16  ;;  %vm1601_vm12 = vcmp.eq.s32.totalorder %v8159_v19, %v7004_v16 }
 0x218   :  { %v4777_v15 = vadd.f32 %v4776_v9, %v4775_v57  ;;  %v4778_v10 = vpop.f32.mrb[10].mxu1  ;;  %5078 = vmatpush3.bf16.msra.mxu1 %v8149_v13  ;;  %v4757_v48 = vpop.f32.mrb[11].mxu0  ;;  %5057 = vmatprep.subr.bf16.mxu0 %v8150_v45  ;;  %vm4457_vm3 = vmpackc.low %vm1600_vm0, %vm1600_vm0  ;;  %v8209_v13 = vld [vmem:[#allocation32_spill] sm:$0xff]  ;;  %v8210_v45 = vld [vmem:[#allocation33_spill] sm:$0xff]  ;;  %vm1603_vm13 = vcmp.eq.s32.totalorder %v6553_v61, %v7004_v16 }
 0x219   :  { %v4779_v8 = vpop.f32.mrb[11].mxu1  ;;  %5079 = vmatprep.subr.bf16.mxu1 %v6535_v63  ;;  %v8204_v63 = vld [vmem:[#allocation35_spill] sm:$0xff]  ;;  %vm4455_vm7 = vmpackc.low %vm1597_vm4, %vm1597_vm4  ;;  %v7072_v18 = vld [vmem:[#allocation3 + $0x180] sm:$0xff]  }
 0x21a   :  { %v948_v29 = vadd.f32 %v4777_v15, %v4755_v6  ;;  %vm4459_vm9 = vmpackc.low %vm1599_vm5, %vm1599_vm5  ;;  %v7076_v15 = vld [vmem:[#allocation3 + $0x148] sm:$0xff]  }
 0x21b   :  { %5058 = vmatpush3.bf16.msra.mxu0 %v6538_v1  ;;  %v8205_v1 = vld [vmem:[#allocation36_spill] sm:$0xff]  ;;  %vm4461_vm10 = vmpackc.low %vm1602_vm6, %vm1602_vm6  ;;  %v7079_v10 = vld [vmem:[#allocation3 + $0x1c8] sm:$0xff]  }
 0x21c   :  { %5080 = vmatpush3.bf16.msra.mxu1 %v8158_v17  ;;  %5059 = vmatprep.subr.bf16.mxu0 %v6544_v38  ;;  %v8206_v38 = vld [vmem:[#allocation37_spill] sm:$0xff]  ;;  %v8211_v17 = vld [vmem:[#allocation34_spill] sm:$0xff]  ;;  %vm4465_vm11 = vmpackc.low %vm1604_vm8, %vm1604_vm8 }
 0x21d   :  { %5081 = vmatprep.subr.bf16.mxu1 %v6547_v47  ;;  %v8207_v47 = vld [vmem:[#allocation28_spill] sm:$0xff]  ;;  %v7082_v48 = vld [vmem:[#allocation3 + $0x108] sm:$0xff]  }
 0x21e   :  { %v7085_v8 = vld [vmem:[#allocation3 + $0x188] sm:$0xff]  }
 0x21f   :  { %5060 = vmatpush3.bf16.msra.mxu0 %v6556_v0  ;;  %v8203_v0 = vld [vmem:[#allocation31_spill] sm:$0xff] }
 0x220   :  { %5082 = vmatpush3.bf16.msra.mxu1 %v8160_v20  ;;  %5089 = vmatprep.subr.bf16.mxu0 %v8161_v21 }
 0x221   :  { %5111 = vmatprep.subr.bf16.mxu1 %v8163_v23 }
 0x222   :  { %4448 = vmatmul.mubr.msk.bf16.vlgmr.msra.gmra.mrb[36].mxu0 %vm4447_vm15, %v8139_v39  ;;  %vm4463_vm15 = vmpackc.low %vm1601_vm12, %vm1601_vm12 }
 0x223   :  { %4452 = vmatmul.mubr.msk.bf16.vlgmr.msra.gmra.mrb[36].mxu1 %vm4451_vm1, %v8139_v39  ;;  %5090 = vmatpush3.bf16.msra.mxu0 %v8164_v24  ;;  %vm4467_vm1 = vmpackc.low %vm1603_vm13, %vm1603_vm13 }
 0x224   :  { %5112 = vmatpush3.bf16.msra.mxu1 %v8165_v25  ;;  %5091 = vmatprep.subr.bf16.mxu0 %v8166_v26 }
 0x225   :  { %5113 = vmatprep.subr.bf16.mxu1 %v6683_v7  ;;  %4454 = vmatprep.mubr.msk.bf16.mxu0 %vm4453_vm2, %v8139_v39 }
 0x226   :  { %4458 = vmatprep.mubr.msk.bf16.mxu1 %vm4457_vm3, %v8139_v39 }
 0x227   :  { %5092 = vmatpush3.bf16.msra.mxu0 %v6688_v11 }
 0x228   :  { %5114 = vmatpush3.bf16.msra.mxu1 %v6691_v49  ;;  %5093 = vmatprep.subr.bf16.mxu0 %v6694_v62 }
 0x229   :  { %5115 = vmatprep.subr.bf16.mxu1 %v6697_v42 }
 0x22b   :  { %5094 = vmatpush3.bf16.msra.mxu0 %v6796_v27 }
 0x22c   :  { %5116 = vmatpush3.bf16.msra.mxu1 %v6799_v28  ;;  %5095 = vmatprep.subr.bf16.mxu0 %v8203_v0 }
 0x22d   :  { %5117 = vmatprep.subr.bf16.mxu1 %v8204_v63 }
 0x22f   :  { %5096 = vmatpush3.bf16.msra.mxu0 %v8205_v1 }
 0x230   :  { %5118 = vmatpush3.bf16.msra.mxu1 %v8206_v38  ;;  %5097 = vmatprep.subr.bf16.mxu0 %v8207_v47 }
 0x231   :  { %5119 = vmatprep.subr.bf16.mxu1 %v8208_v12 }
 0x233   :  { %5098 = vmatpush3.bf16.msra.mxu0 %v8209_v13 }
 0x234   :  { %5120 = vmatpush3.bf16.msra.mxu1 %v8210_v45  ;;  %5099 = vmatprep.subr.bf16.mxu0 %v8211_v17 }
 0x235   :  { %v4797_v20 = vpop.f32.mrb[12].mxu0  ;;  %5121 = vmatprep.subr.bf16.mxu1 %v8212_v58 }
 0x236   :  { %v4819_v50 = vpop.f32.mrb[12].mxu1  ;;  %v4798_v32 = vpop.f32.mrb[13].mxu0 }
 0x237   :  { %v4799_v51 = vadd.f32 %v4798_v32, %v4797_v20  ;;  %v4820_v52 = vpop.f32.mrb[13].mxu1  ;;  %v4800_v53 = vpop.f32.mrb[14].mxu0  ;;  %5100 = vmatpush3.bf16.msra.mxu0 %v8187_v30  ;;  %v7091_v20 = vld [vmem:[#allocation3 + $0x1d0] sm:$0xff]  }
 0x238   :  { %v4821_v54 = vadd.f32 %v4820_v52, %v4819_v50  ;;  %v4822_v55 = vpop.f32.mrb[14].mxu1  ;;  %5122 = vmatpush3.bf16.msra.mxu1 %v6835_v34  ;;  %v4801_v56 = vpop.f32.mrb[15].mxu0  ;;  %5101 = vmatprep.subr.bf16.mxu0 %v8188_v59  ;;  %8215 = vst [vmem:[#allocation41_spill] sm:$0xff] %v7091_v20  ;;  %v7094_v50 = vld [vmem:[#allocation3 + $0x110] sm:$0xff]   ;;  %v7103_v52 = vld [vmem:[#allocation3 + $0x1d8] sm:$0xff]  }
 0x239   :  { %v988_v57 = vadd.f32 %v4799_v51, %v948_v29  ;;  %v4823_v60 = vpop.f32.mrb[15].mxu1  ;;  %5123 = vmatprep.subr.bf16.mxu1 %v6841_v36  ;;  %v7088_v29 = vld [vmem:[#allocation3 + $0x150] sm:$0xff]   ;;  %8216 = vst [vmem:[#allocation42_spill] sm:$0xff] %v7094_v50  ;;  %v7100_v51 = vld [vmem:[#allocation3 + $0x158] sm:$0xff]   ;;  %8219 = vst [vmem:[#allocation20_spill] sm:$0xff] %v7103_v52 }
 0x23a   :  { %8214 = vst [vmem:[#allocation40_spill] sm:$0xff] %v7088_v29  ;;  %v7097_v32 = vld [vmem:[#allocation3 + $0x190] sm:$0xff]   ;;  %8218 = vst [vmem:[#allocation19_spill] sm:$0xff] %v7100_v51  ;;  %v7106_v53 = vld [vmem:[#allocation3 + $0x118] sm:$0xff]  }
 0x23b   :  { %v1028_v6 = vadd.f32 %v4821_v54, %v988_v57  ;;  %5102 = vmatpush3.bf16.msra.mxu0 %v8189_v5  ;;  %8217 = vst [vmem:[#allocation43_spill] sm:$0xff] %v7097_v32  ;;  %8220 = vst [vmem:[#allocation21_spill] sm:$0xff] %v7106_v53  ;;  %v7109_v54 = vld [vmem:[#allocation3 + $0x198] sm:$0xff]   ;;  %v7112_v55 = vld [vmem:[#allocation3 + $0x160] sm:$0xff]  }
 0x23c   :  { %5124 = vmatpush3.bf16.msra.mxu1 %v8190_v4  ;;  %5103 = vmatprep.subr.bf16.mxu0 %v6850_v14  ;;  %8221 = vst [vmem:[#allocation22_spill] sm:$0xff] %v7109_v54  ;;  %8222 = vst [vmem:[#allocation23_spill] sm:$0xff] %v7112_v55  ;;  %v7115_v56 = vld [vmem:[#allocation3 + $0x1e0] sm:$0xff]  }
 0x23d   :  { %v7053_v9 = vpack.c.bf16 %v1028_v6, %v6955_v2  ;;  %5125 = vmatprep.subr.bf16.mxu1 %v8191_v31  ;;  %v7068_v2 = vld [vmem:[#allocation3 + $0x100] sm:$0xff]   ;;  %8223 = vst [vmem:[#allocation24_spill] sm:$0xff] %v7115_v56  ;;  %v7124_v6 = vld [vmem:[#allocation3 + $0x168] sm:$0xff]  }
 0x23e   :  { %v7118_v57 = vld [vmem:[#allocation3 + $0x120] sm:$0xff]   ;;  %8226 = vst [vmem:[#allocation27_spill] sm:$0xff] %v7124_v6 }
 0x23f   :  { %8213 = vst [vmem:[#allocation39_spill] sm:$0xff] %v7053_v9  ;;  %5104 = vmatpush3.bf16.msra.mxu0 %v6862_v3  ;;  %8224 = vst [vmem:[#allocation25_spill] sm:$0xff] %v7118_v57  ;;  %v7121_v60 = vld [vmem:[#allocation3 + $0x1a0] sm:$0xff]  }
 0x240   :  { %5126 = vmatpush3.bf16.msra.mxu1 %v6868_v35  ;;  %5133 = vmatprep.subr.bf16.mxu0 %v6871_v43  ;;  %8225 = vst [vmem:[#allocation26_spill] sm:$0xff] %v7121_v60 }
 0x241   :  { %5155 = vmatprep.subr.bf16.mxu1 %v6874_v37 }
 0x242   :  { %4456 = vmatmul.mubr.msk.bf16.vlgmr.msra.gmra.mrb[40].mxu0 %vm4455_vm7, %v8139_v39 }
 0x243   :  { %4460 = vmatmul.mubr.msk.bf16.vlgmr.msra.gmra.mrb[40].mxu1 %vm4459_vm9, %v8139_v39  ;;  %5134 = vmatpush3.bf16.msra.mxu0 %v7068_v2 }
 0x244   :  { %4462 = vmatprep.mubr.msk.bf16.mxu0 %vm4461_vm10, %v8139_v39  ;;  %5156 = vmatpush3.bf16.msra.mxu1 %v7072_v18 }
 0x245   :  { %4466 = vmatprep.mubr.msk.bf16.mxu1 %vm4465_vm11, %v8139_v39  ;;  %5135 = vmatprep.subr.bf16.mxu0 %v7076_v15 }
 0x246   :  { %5157 = vmatprep.subr.bf16.mxu1 %v7079_v10 }
 0x247   :  { %5136 = vmatpush3.bf16.msra.mxu0 %v7082_v48 }
 0x248   :  { %5158 = vmatpush3.bf16.msra.mxu1 %v7085_v8  ;;  %5137 = vmatprep.subr.bf16.mxu0 %v7088_v29  ;;  %v7139_v29 = vld [vmem:[#allocation3 + $0x1f0] sm:$0xff]  }
 0x249   :  { %5159 = vmatprep.subr.bf16.mxu1 %v7091_v20  ;;  %v7136_v20 = vld [vmem:[#allocation3 + $0x170] sm:$0xff]  }
 0x24b   :  { %5138 = vmatpush3.bf16.msra.mxu0 %v7094_v50  ;;  %v7133_v50 = vld [vmem:[#allocation3 + $0x1a8] sm:$0xff]  }
 0x24c   :  { %5160 = vmatpush3.bf16.msra.mxu1 %v7097_v32  ;;  %5139 = vmatprep.subr.bf16.mxu0 %v7100_v51  ;;  %v7130_v32 = vld [vmem:[#allocation3 + $0x128] sm:$0xff]  }
 0x24d   :  { %5161 = vmatprep.subr.bf16.mxu1 %v7103_v52 }
 0x24f   :  { %5140 = vmatpush3.bf16.msra.mxu0 %v7106_v53 }
 0x250   :  { %5162 = vmatpush3.bf16.msra.mxu1 %v7109_v54  ;;  %5141 = vmatprep.subr.bf16.mxu0 %v7112_v55  ;;  %v7127_v54 = vld [vmem:[#allocation3 + $0x1e8] sm:$0xff]  }
 0x251   :  { %5163 = vmatprep.subr.bf16.mxu1 %v7115_v56  ;;  %8227 = vst [vmem:[#allocation29_spill] sm:$0xff] %v7127_v54 }
 0x253   :  { %5142 = vmatpush3.bf16.msra.mxu0 %v7118_v57 }
 0x254   :  { %5164 = vmatpush3.bf16.msra.mxu1 %v7121_v60  ;;  %5143 = vmatprep.subr.bf16.mxu0 %v7124_v6 }
 0x255   :  { %v4841_v9 = vpop.f32.mrb[16].mxu0  ;;  %5165 = vmatprep.subr.bf16.mxu1 %v7127_v54 }
 0x256   :  { %v4863_v55 = vpop.f32.mrb[16].mxu1  ;;  %v4842_v53 = vpop.f32.mrb[17].mxu0 }
 0x257   :  { %v4843_v56 = vadd.f32 %v4842_v53, %v4841_v9  ;;  %v4864_v52 = vpop.f32.mrb[17].mxu1  ;;  %v4844_v51 = vpop.f32.mrb[18].mxu0  ;;  %5144 = vmatpush3.bf16.msra.mxu0 %v7130_v32  ;;  %v7148_v53 = vld [vmem:[#allocation3 + $0x178] sm:$0xff]  }
 0x258   :  { %v4865_v57 = vadd.f32 %v4864_v52, %v4863_v55  ;;  %v4866_v60 = vpop.f32.mrb[18].mxu1  ;;  %5166 = vmatpush3.bf16.msra.mxu1 %v7133_v50  ;;  %v4845_v6 = vpop.f32.mrb[19].mxu0  ;;  %5145 = vmatprep.subr.bf16.mxu0 %v7136_v20  ;;  %v7142_v51 = vld [vmem:[#allocation3 + $0x130] sm:$0xff]  }
 0x259   :  { %v4867_v54 = vpop.f32.mrb[19].mxu1  ;;  %5167 = vmatprep.subr.bf16.mxu1 %v7139_v29  ;;  %v7145_v52 = vld [vmem:[#allocation3 + $0x1b0] sm:$0xff]   ;;  %v7151_v55 = vpop.permute.xlu1 %1782 }
 0x25a   :  { %v1135_v9 = vadd.f32 %v4865_v57, %v4843_v56  ;;  %v7153_v54 = vld [vmem:[#allocation3 + $0x1f8] sm:$0xff]   ;;  %vm1785_vm14 = vcmp.eq.s32.totalorder %v6434_v41, %v7151_v55  ;;  %vm1787_vm0 = vcmp.eq.s32.totalorder %v8162_v22, %v7151_v55  ;;  %vm1784_vm4 = vcmp.eq.s32.totalorder %v6431_v40, %v7151_v55  ;;  %v8228_v6 = vld [vmem:[#allocation40_spill] sm:$0xff] }
 0x25b   :  { %5146 = vmatpush3.bf16.msra.mxu0 %v7142_v51  ;;  %v7160_v56 = vld [vmem:[#allocation3 + $0x138] sm:$0xff]   ;;  %vm4469_vm2 = vmpackc.low %vm1785_vm14, %vm1785_vm14  ;;  %vm1786_vm5 = vcmp.eq.s32.totalorder %v8192_v33, %v7151_v55  ;;  %vm1789_vm6 = vcmp.eq.s32.totalorder %v6443_v44, %v7151_v55  ;;  %vm1791_vm8 = vcmp.eq.s32.totalorder %v6448_v46, %v7151_v55  ;;  %vm1788_vm12 = vcmp.eq.s32.totalorder %v8159_v19, %v7151_v55 }
 0x25c   :  { %5168 = vmatpush3.bf16.msra.mxu1 %v7145_v52  ;;  %5147 = vmatprep.subr.bf16.mxu0 %v7148_v53  ;;  %v7165_v57 = vld [vmem:[#allocation3 + $0x1b8] sm:$0xff]   ;;  %vm4473_vm3 = vmpackc.low %vm1787_vm0, %vm1787_vm0  ;;  %vm1790_vm13 = vcmp.eq.s32.totalorder %v6553_v61, %v7151_v55  ;;  %v5910_v55 = vld [vmem:[#allocation3] sm:$0xff]  }
 0x25d   :  { %5169 = vmatprep.subr.bf16.mxu1 %v7153_v54  ;;  %vm4471_vm7 = vmpackc.low %vm1784_vm4, %vm1784_vm4 }
 0x25e   :  { %vm4475_vm9 = vmpackc.low %vm1786_vm5, %vm1786_vm5 }
 0x25f   :  { %5148 = vmatpush3.bf16.msra.mxu0 %v7160_v56  ;;  %vm4477_vm10 = vmpackc.low %vm1789_vm6, %vm1789_vm6 }
 0x260   :  { %5170 = vmatpush3.bf16.msra.mxu1 %v7165_v57  ;;  %5177 = vmatprep.subr.bf16.mxu0 %v8161_v21  ;;  %vm4481_vm11 = vmpackc.low %vm1791_vm8, %vm1791_vm8 }
 0x261   :  { %5199 = vmatprep.subr.bf16.mxu1 %v8163_v23 }
 0x262   :  { %4464 = vmatmul.mubr.msk.bf16.vlgmr.msra.gmra.mrb[44].mxu0 %vm4463_vm15, %v8139_v39  ;;  %vm4479_vm15 = vmpackc.low %vm1788_vm12, %vm1788_vm12 }
 0x263   :  { %4468 = vmatmul.mubr.msk.bf16.vlgmr.msra.gmra.mrb[44].mxu1 %vm4467_vm1, %v8139_v39  ;;  %5178 = vmatpush3.bf16.msra.mxu0 %v8164_v24  ;;  %vm4483_vm1 = vmpackc.low %vm1790_vm13, %vm1790_vm13 }
 0x264   :  { %5200 = vmatpush3.bf16.msra.mxu1 %v8165_v25  ;;  %5179 = vmatprep.subr.bf16.mxu0 %v8166_v26 }
 0x265   :  { %5201 = vmatprep.subr.bf16.mxu1 %v6683_v7  ;;  %4470 = vmatprep.mubr.msk.bf16.mxu0 %vm4469_vm2, %v8139_v39 }
 0x266   :  { %4474 = vmatprep.mubr.msk.bf16.mxu1 %vm4473_vm3, %v8139_v39 }
 0x267   :  { %5180 = vmatpush3.bf16.msra.mxu0 %v6688_v11 }
 0x268   :  { %5202 = vmatpush3.bf16.msra.mxu1 %v6691_v49  ;;  %5181 = vmatprep.subr.bf16.mxu0 %v6694_v62 }
 0x269   :  { %5203 = vmatprep.subr.bf16.mxu1 %v6697_v42 }
 0x26b   :  { %5182 = vmatpush3.bf16.msra.mxu0 %v6796_v27 }
 0x26c   :  { %5204 = vmatpush3.bf16.msra.mxu1 %v6799_v28  ;;  %5183 = vmatprep.subr.bf16.mxu0 %v8203_v0 }
 0x26d   :  { %5205 = vmatprep.subr.bf16.mxu1 %v8204_v63 }
 0x26f   :  { %5184 = vmatpush3.bf16.msra.mxu0 %v8205_v1 }
 0x270   :  { %5206 = vmatpush3.bf16.msra.mxu1 %v8206_v38  ;;  %5185 = vmatprep.subr.bf16.mxu0 %v8207_v47 }
 0x271   :  { %5207 = vmatprep.subr.bf16.mxu1 %v8208_v12 }
 0x273   :  { %5186 = vmatpush3.bf16.msra.mxu0 %v8209_v13 }
 0x274   :  { %5208 = vmatpush3.bf16.msra.mxu1 %v8210_v45  ;;  %5187 = vmatprep.subr.bf16.mxu0 %v8211_v17 }
 0x275   :  { %v4885_v42 = vpop.f32.mrb[20].mxu0  ;;  %5209 = vmatprep.subr.bf16.mxu1 %v8212_v58 }
 0x276   :  { %v4907_v62 = vpop.f32.mrb[20].mxu1  ;;  %v4886_v7 = vpop.f32.mrb[21].mxu0 }
 0x277   :  { %v4887_v11 = vadd.f32 %v4886_v7, %v4885_v42  ;;  %v4908_v49 = vpop.f32.mrb[21].mxu1  ;;  %v4888_v21 = vpop.f32.mrb[22].mxu0  ;;  %5188 = vmatpush3.bf16.msra.mxu0 %v8187_v30  ;;  %v8230_v42 = vld [vmem:[#allocation42_spill] sm:$0xff]  ;;  %v8232_v7 = vld [vmem:[#allocation19_spill] sm:$0xff] }
 0x278   :  { %v4909_v23 = vadd.f32 %v4908_v49, %v4907_v62  ;;  %v4910_v24 = vpop.f32.mrb[22].mxu1  ;;  %5210 = vmatpush3.bf16.msra.mxu1 %v6835_v34  ;;  %v4889_v25 = vpop.f32.mrb[23].mxu0  ;;  %5189 = vmatprep.subr.bf16.mxu0 %v8188_v59  ;;  %v8231_v62 = vld [vmem:[#allocation43_spill] sm:$0xff]  ;;  %v8234_v49 = vld [vmem:[#allocation21_spill] sm:$0xff]  ;;  %v8235_v21 = vld [vmem:[#allocation22_spill] sm:$0xff] }
 0x279   :  { %v1175_v26 = vadd.f32 %v4887_v11, %v1135_v9  ;;  %v4911_v16 = vpop.f32.mrb[23].mxu1  ;;  %5211 = vmatprep.subr.bf16.mxu1 %v6841_v36  ;;  %v8229_v9 = vld [vmem:[#allocation41_spill] sm:$0xff]  ;;  %v8233_v11 = vld [vmem:[#allocation20_spill] sm:$0xff] }
 0x27a   :  { %v8237_v24 = vld [vmem:[#allocation24_spill] sm:$0xff]  ;;  %v8238_v25 = vld [vmem:[#allocation25_spill] sm:$0xff]  ;;  %v8240_v16 = vld [vmem:[#allocation27_spill] sm:$0xff] }
 0x27b   :  { %v7200_v60 = vadd.f32 %v4909_v23, %v1175_v26  ;;  %5190 = vmatpush3.bf16.msra.mxu0 %v8189_v5  ;;  %v8236_v23 = vld [vmem:[#allocation23_spill] sm:$0xff]  ;;  %v8239_v26 = vld [vmem:[#allocation26_spill] sm:$0xff] }
 0x27c   :  { %5212 = vmatpush3.bf16.msra.mxu1 %v8190_v4  ;;  %5191 = vmatprep.subr.bf16.mxu0 %v6850_v14 }
 0x27d   :  { %5213 = vmatprep.subr.bf16.mxu1 %v8191_v31 }
 0x27f   :  { %5192 = vmatpush3.bf16.msra.mxu0 %v6862_v3 }
 0x280   :  { %5214 = vmatpush3.bf16.msra.mxu1 %v6868_v35  ;;  %5221 = vmatprep.subr.bf16.mxu0 %v6871_v43 }
 0x281   :  { %5243 = vmatprep.subr.bf16.mxu1 %v6874_v37 }
 0x282   :  { %4472 = vmatmul.mubr.msk.bf16.vlgmr.msra.gmra.mrb[48].mxu0 %vm4471_vm7, %v8139_v39 }
 0x283   :  { %4476 = vmatmul.mubr.msk.bf16.vlgmr.msra.gmra.mrb[48].mxu1 %vm4475_vm9, %v8139_v39  ;;  %5222 = vmatpush3.bf16.msra.mxu0 %v7068_v2 }
 0x284   :  { %4478 = vmatprep.mubr.msk.bf16.mxu0 %vm4477_vm10, %v8139_v39  ;;  %5244 = vmatpush3.bf16.msra.mxu1 %v7072_v18 }
 0x285   :  { %4482 = vmatprep.mubr.msk.bf16.mxu1 %vm4481_vm11, %v8139_v39  ;;  %5223 = vmatprep.subr.bf16.mxu0 %v7076_v15 }
 0x286   :  { %5245 = vmatprep.subr.bf16.mxu1 %v7079_v10 }
 0x287   :  { %5224 = vmatpush3.bf16.msra.mxu0 %v7082_v48 }
 0x288   :  { %5246 = vmatpush3.bf16.msra.mxu1 %v7085_v8  ;;  %5225 = vmatprep.subr.bf16.mxu0 %v8228_v6 }
 0x289   :  { %5247 = vmatprep.subr.bf16.mxu1 %v8229_v9 }
 0x28b   :  { %5226 = vmatpush3.bf16.msra.mxu0 %v8230_v42 }
 0x28c   :  { %5248 = vmatpush3.bf16.msra.mxu1 %v8231_v62  ;;  %5227 = vmatprep.subr.bf16.mxu0 %v8232_v7  ;;  %v8241_v62 = vld [vmem:[#allocation29_spill] sm:$0xff] }
 0x28d   :  { %5249 = vmatprep.subr.bf16.mxu1 %v8233_v11 }
 0x28f   :  { %5228 = vmatpush3.bf16.msra.mxu0 %v8234_v49 }
 0x290   :  { %5250 = vmatpush3.bf16.msra.mxu1 %v8235_v21  ;;  %5229 = vmatprep.subr.bf16.mxu0 %v8236_v23 }
 0x291   :  { %5251 = vmatprep.subr.bf16.mxu1 %v8237_v24 }
 0x293   :  { %5230 = vmatpush3.bf16.msra.mxu0 %v8238_v25 }
 0x294   :  { %5252 = vmatpush3.bf16.msra.mxu1 %v8239_v26  ;;  %5231 = vmatprep.subr.bf16.mxu0 %v8240_v16 }
 0x295   :  { %v4929_v42 = vpop.f32.mrb[24].mxu0  ;;  %5253 = vmatprep.subr.bf16.mxu1 %v8241_v62 }
 0x296   :  { %v4951_v7 = vpop.f32.mrb[24].mxu1  ;;  %v4930_v9 = vpop.f32.mrb[25].mxu0 }
 0x297   :  { %v4931_v11 = vadd.f32 %v4930_v9, %v4929_v42  ;;  %v4952_v6 = vpop.f32.mrb[25].mxu1  ;;  %v4932_v49 = vpop.f32.mrb[26].mxu0  ;;  %5232 = vmatpush3.bf16.msra.mxu0 %v7130_v32  ;;  %v5909_v42 = vld [vmem:[#allocation3 + $0xc0] sm:$0xff]  }
 0x298   :  { %v4953_v21 = vadd.f32 %v4952_v6, %v4951_v7  ;;  %v4954_v23 = vpop.f32.mrb[26].mxu1  ;;  %5254 = vmatpush3.bf16.msra.mxu1 %v7133_v50  ;;  %v4933_v24 = vpop.f32.mrb[27].mxu0  ;;  %5233 = vmatprep.subr.bf16.mxu0 %v7136_v20  ;;  %v5908_v6 = vld [vmem:[#allocation3 + $0x40] sm:$0xff]   ;;  %v5912_v7 = vld [vmem:[#allocation3 + $0x48] sm:$0xff]  }
 0x299   :  { %v4955_v26 = vpop.f32.mrb[27].mxu1  ;;  %5255 = vmatprep.subr.bf16.mxu1 %v7139_v29  ;;  %v7251_v9 = vpop.permute.xlu1 %1969  ;;  %v5915_v49 = vld [vmem:[#allocation3 + $0x88] sm:$0xff]   ;;  %v5917_v23 = vld [vmem:[#allocation3 + $0xd0] sm:$0xff]  }
 0x29a   :  { %v7246_v16 = vadd.f32 %v4953_v21, %v4931_v11  ;;  %vm1972_vm14 = vcmp.eq.s32.totalorder %v6434_v41, %v7251_v9  ;;  %vm1974_vm0 = vcmp.eq.s32.totalorder %v8162_v22, %v7251_v9  ;;  %v5911_v41 = vld [vmem:[#allocation3 + $0x80] sm:$0xff]   ;;  %v5913_v11 = vld [vmem:[#allocation3 + $0xc8] sm:$0xff]   ;;  %v5916_v21 = vld [vmem:[#allocation3 + $0x50] sm:$0xff]   ;;  %vm1971_vm4 = vcmp.eq.s32.totalorder %v6431_v40, %v7251_v9 }
 0x29b   :  { %5234 = vmatpush3.bf16.msra.mxu0 %v7142_v51  ;;  %vm4485_vm2 = vmpackc.low %vm1972_vm14, %vm1972_vm14  ;;  %v5914_v22 = vld [vmem:[#allocation3 + $0x8] sm:$0xff]   ;;  %vm1973_vm5 = vcmp.eq.s32.totalorder %v8192_v33, %v7251_v9  ;;  %vm1976_vm6 = vcmp.eq.s32.totalorder %v6443_v44, %v7251_v9  ;;  %vm1978_vm8 = vcmp.eq.s32.totalorder %v6448_v46, %v7251_v9  ;;  %v8242_v40 = vld [vmem:[#allocation40_spill] sm:$0xff]  ;;  %vm1975_vm12 = vcmp.eq.s32.totalorder %v8159_v19, %v7251_v9 }
 0x29c   :  { %5256 = vmatpush3.bf16.msra.mxu1 %v7145_v52  ;;  %5235 = vmatprep.subr.bf16.mxu0 %v7148_v53  ;;  %vm4489_vm3 = vmpackc.low %vm1974_vm0, %vm1974_vm0  ;;  %v8244_v44 = vld [vmem:[#allocation42_spill] sm:$0xff]  ;;  %v8245_v46 = vld [vmem:[#allocation43_spill] sm:$0xff]  ;;  %vm1977_vm13 = vcmp.eq.s32.totalorder %v6553_v61, %v7251_v9  ;;  %vm6133_vm0 = vmmov 0  }
 0x29d   :  { %5257 = vmatprep.subr.bf16.mxu1 %v7153_v54  ;;  %vm4487_vm7 = vmpackc.low %vm1971_vm4, %vm1971_vm4  ;;  %v5541_v19 = vld [vmem:[#allocation5 + $0x20] ss:$16 sps:$4 sm:$0xff]   ;;  %v5549_v61 = vld [vmem:[#allocation5 + $0x44] ss:$16 sps:$4 sm:$0xff]  }
 0x29e   :  { %vm4491_vm9 = vmpackc.low %vm1973_vm5, %vm1973_vm5  ;;  %v5553_v26 = vld [vmem:[#allocation5 + $0x60] ss:$16 sps:$4 sm:$0xff]   ;;  %v5561_v9 = vld [vmem:[#allocation5 + $0x84] ss:$16 sps:$4 sm:$0xff]  }
 0x29f   :  { %5236 = vmatpush3.bf16.msra.mxu0 %v7160_v56  ;;  %vm4493_vm10 = vmpackc.low %vm1976_vm6, %vm1976_vm6 }
 0x2a0   :  { %5258 = vmatpush3.bf16.msra.mxu1 %v7165_v57  ;;  %5265 = vmatprep.subr.bf16.mxu0 %v5908_v6  ;;  %vm4497_vm11 = vmpackc.low %vm1978_vm8, %vm1978_vm8  ;;  %v5564_v6 = vld [vmem:[#allocation5 + $0x8c] ss:$16 sps:$4 sm:$0xff]  }
 0x2a1   :  { %5287 = vmatprep.subr.bf16.mxu1 %v5909_v42  ;;  %vm4495_vm14 = vmpackc.low %vm1975_vm12, %vm1975_vm12  ;;  %v5559_v42 = vld [vmem:[#allocation5 + $0x80] ss:$16 sps:$4 sm:$0xff]  }
 0x2a2   :  { %4480 = vmatmul.mubr.msk.bf16.vlgmr.msra.gmra.mrb[52].mxu0 %vm4479_vm15, %v8139_v39  ;;  %vm4499_vm15 = vmpackc.low %vm1977_vm13, %vm1977_vm13 }
 0x2a3   :  { %4484 = vmatmul.mubr.msk.bf16.vlgmr.msra.gmra.mrb[52].mxu1 %vm4483_vm1, %v8139_v39  ;;  %5266 = vmatpush3.bf16.msra.mxu0 %v5910_v55  ;;  %v5562_v55 = vld [vmem:[#allocation5 + $0x88] ss:$16 sps:$4 sm:$0xff]  }
 0x2a4   :  { %5288 = vmatpush3.bf16.msra.mxu1 %v5911_v41  ;;  %5267 = vmatprep.subr.bf16.mxu0 %v5912_v7  ;;  %v5567_v41 = vld [vmem:[#allocation5 + $0xa4] ss:$16 sps:$4 sm:$0xff]   ;;  %v5570_v7 = vld [vmem:[#allocation5 + $0xac] ss:$16 sps:$4 sm:$0xff]  }
 0x2a5   :  { %5289 = vmatprep.subr.bf16.mxu1 %v5913_v11  ;;  %4486 = vmatprep.mubr.msk.bf16.mxu0 %vm4485_vm2, %v8139_v39  ;;  %v5565_v11 = vld [vmem:[#allocation5 + $0xa0] ss:$16 sps:$4 sm:$0xff]  }
 0x2a6   :  { %4490 = vmatprep.mubr.msk.bf16.mxu1 %vm4489_vm3, %v8139_v39 }
 0x2a7   :  { %5268 = vmatpush3.bf16.msra.mxu0 %v5914_v22  ;;  %v5568_v22 = vld [vmem:[#allocation5 + $0xa8] ss:$16 sps:$4 sm:$0xff]  }
 0x2a8   :  { %5290 = vmatpush3.bf16.msra.mxu1 %v5915_v49  ;;  %5269 = vmatprep.subr.bf16.mxu0 %v5916_v21  ;;  %v5573_v49 = vld [vmem:[#allocation5 + $0xc4] ss:$16 sps:$4 sm:$0xff]  }
 0x2a9   :  { %5291 = vmatprep.subr.bf16.mxu1 %v5917_v23  ;;  %v5576_v23 = vld [vmem:[#allocation5 + $0xcc] ss:$16 sps:$4 sm:$0xff]  }
 0x2ab   :  { %5270 = vmatpush3.bf16.msra.mxu0 %v6796_v27 }
 0x2ac   :  { %5292 = vmatpush3.bf16.msra.mxu1 %v6799_v28  ;;  %5271 = vmatprep.subr.bf16.mxu0 %v8203_v0 }
 0x2ad   :  { %5293 = vmatprep.subr.bf16.mxu1 %v8204_v63 }
 0x2af   :  { %5272 = vmatpush3.bf16.msra.mxu0 %v8205_v1 }
 0x2b0   :  { %5294 = vmatpush3.bf16.msra.mxu1 %v8206_v38  ;;  %5273 = vmatprep.subr.bf16.mxu0 %v8207_v47 }
 0x2b1   :  { %5295 = vmatprep.subr.bf16.mxu1 %v8208_v12 }
 0x2b3   :  { %5274 = vmatpush3.bf16.msra.mxu0 %v8209_v13 }
 0x2b4   :  { %5296 = vmatpush3.bf16.msra.mxu1 %v8210_v45  ;;  %5275 = vmatprep.subr.bf16.mxu0 %v8211_v17 }
 0x2b5   :  { %v4973_v27 = vpop.f32.mrb[28].mxu0  ;;  %5297 = vmatprep.subr.bf16.mxu1 %v8212_v58 }
 0x2b6   :  { %v4995_v28 = vpop.f32.mrb[28].mxu1  ;;  %v4974_v0 = vpop.f32.mrb[29].mxu0 }
 0x2b7   :  { %v4975_v63 = vadd.f32 %v4974_v0, %v4973_v27  ;;  %v4996_v24 = vpop.f32.mrb[29].mxu1  ;;  %v4976_v1 = vpop.f32.mrb[30].mxu0  ;;  %5276 = vmatpush3.bf16.msra.mxu0 %v8187_v30 }
 0x2b8   :  { %v4997_v38 = vadd.f32 %v4996_v24, %v4995_v28  ;;  %v4998_v47 = vpop.f32.mrb[30].mxu1  ;;  %5298 = vmatpush3.bf16.msra.mxu1 %v6835_v34  ;;  %v4977_v12 = vpop.f32.mrb[31].mxu0  ;;  %5277 = vmatprep.subr.bf16.mxu0 %v8188_v59  ;;  %v8246_v34 = vld [vmem:[#allocation19_spill] sm:$0xff]  ;;  %v8252_v59 = vld [vmem:[#allocation26_spill] sm:$0xff] }
 0x2b9   :  { %v1362_v13 = vadd.f32 %v4975_v63, %v7246_v16  ;;  %v4999_v45 = vpop.f32.mrb[31].mxu1  ;;  %5299 = vmatprep.subr.bf16.mxu1 %v6841_v36  ;;  %v8248_v36 = vld [vmem:[#allocation21_spill] sm:$0xff]  ;;  %v5571_v1 = vld [vmem:[#allocation5 + $0xc0] ss:$16 sps:$4 sm:$0xff]  }
 0x2ba   :  { %v5556_v16 = vld [vmem:[#allocation5 + $0x68] ss:$16 sps:$4 sm:$0xff]   ;;  %v5579_v45 = vld [vmem:[#allocation5 + $0xe4] ss:$16 sps:$4 sm:$0xff]  }
 0x2bb   :  { %v1402_v17 = vadd.f32 %v4997_v38, %v1362_v13  ;;  %5278 = vmatpush3.bf16.msra.mxu0 %v8189_v5  ;;  %v8253_v5 = vld [vmem:[#allocation27_spill] sm:$0xff] }
 0x2bc   :  { %5300 = vmatpush3.bf16.msra.mxu1 %v8190_v4  ;;  %5279 = vmatprep.subr.bf16.mxu0 %v6850_v14  ;;  %v8250_v14 = vld [vmem:[#allocation23_spill] sm:$0xff] }
 0x2bd   :  { %5301 = vmatprep.subr.bf16.mxu1 %v8191_v31  ;;  %v7294_v30 = vpack.c.bf16 %v1402_v17, %v7200_v60  ;;  %v5574_v13 = vld [vmem:[#allocation5 + $0xc8] ss:$16 sps:$4 sm:$0xff]  }
 0x2bf   :  { %5280 = vmatpush3.bf16.msra.mxu0 %v6862_v3  ;;  %v8249_v3 = vld [vmem:[#allocation22_spill] sm:$0xff] }
 0x2c0   :  { %5302 = vmatpush3.bf16.msra.mxu1 %v6868_v35  ;;  %5309 = vmatprep.subr.bf16.mxu0 %v6871_v43  ;;  %v8243_v43 = vld [vmem:[#allocation41_spill] sm:$0xff]  ;;  %v8247_v35 = vld [vmem:[#allocation20_spill] sm:$0xff] }
 0x2c1   :  { %5331 = vmatprep.subr.bf16.mxu1 %v6874_v37  ;;  %v8251_v37 = vld [vmem:[#allocation24_spill] sm:$0xff] }
 0x2c2   :  { %4488 = vmatmul.mubr.msk.bf16.vlgmr.msra.gmra.mrb[56].mxu0 %vm4487_vm7, %v8139_v39 }
 0x2c3   :  { %4492 = vmatmul.mubr.msk.bf16.vlgmr.msra.gmra.mrb[56].mxu1 %vm4491_vm9, %v8139_v39  ;;  %5310 = vmatpush3.bf16.msra.mxu0 %v7068_v2 }
 0x2c4   :  { %4494 = vmatprep.mubr.msk.bf16.mxu0 %vm4493_vm10, %v8139_v39  ;;  %5332 = vmatpush3.bf16.msra.mxu1 %v7072_v18 }
 0x2c5   :  { %4498 = vmatprep.mubr.msk.bf16.mxu1 %vm4497_vm11, %v8139_v39  ;;  %5311 = vmatprep.subr.bf16.mxu0 %v7076_v15 }
 0x2c6   :  { %5333 = vmatprep.subr.bf16.mxu1 %v7079_v10 }
 0x2c7   :  { %5312 = vmatpush3.bf16.msra.mxu0 %v7082_v48 }
 0x2c8   :  { %5334 = vmatpush3.bf16.msra.mxu1 %v7085_v8  ;;  %5313 = vmatprep.subr.bf16.mxu0 %v8242_v40 }
 0x2c9   :  { %5335 = vmatprep.subr.bf16.mxu1 %v8243_v43  ;;  %v5582_v43 = vld [vmem:[#allocation5 + $0xec] ss:$16 sps:$4 sm:$0xff]  }
 0x2cb   :  { %5314 = vmatpush3.bf16.msra.mxu0 %v8244_v44 }
 0x2cc   :  { %5336 = vmatpush3.bf16.msra.mxu1 %v8245_v46  ;;  %5315 = vmatprep.subr.bf16.mxu0 %v8246_v34  ;;  %v5577_v46 = vld [vmem:[#allocation5 + $0xe0] ss:$16 sps:$4 sm:$0xff]   ;;  %v5580_v34 = vld [vmem:[#allocation5 + $0xe8] ss:$16 sps:$4 sm:$0xff]  }
 0x2cd   :  { %5337 = vmatprep.subr.bf16.mxu1 %v8247_v35  ;;  %v8255_v35 = vld [vmem:[#allocation39_spill] sm:$0xff] }
 0x2cf   :  { %5316 = vmatpush3.bf16.msra.mxu0 %v8248_v36 }
 0x2d0   :  { %5338 = vmatpush3.bf16.msra.mxu1 %v8249_v3  ;;  %5317 = vmatprep.subr.bf16.mxu0 %v8250_v14 }
 0x2d1   :  { %5339 = vmatprep.subr.bf16.mxu1 %v8251_v37 }
 0x2d3   :  { %5318 = vmatpush3.bf16.msra.mxu0 %v8238_v25  ;;  %v5555_v25 = vld [vmem:[#allocation5 + $0x64] ss:$16 sps:$4 sm:$0xff]  }
 0x2d4   :  { %5340 = vmatpush3.bf16.msra.mxu1 %v8252_v59  ;;  %5319 = vmatprep.subr.bf16.mxu0 %v8253_v5 }
 0x2d5   :  { %v5017_v4 = vpop.f32.mrb[32].mxu0  ;;  %5341 = vmatprep.subr.bf16.mxu1 %v8241_v62  ;;  %v5537_v62 = vld [vmem:[#allocation5 + $0x4] ss:$16 sps:$4 sm:$0xff]  }
 0x2d6   :  { %v5039_v31 = vpop.f32.mrb[32].mxu1  ;;  %v5018_v33 = vpop.f32.mrb[33].mxu0 }
 0x2d7   :  { %v5019_v58 = vadd.f32 %v5018_v33, %v5017_v4  ;;  %v5040_v2 = vpop.f32.mrb[33].mxu1  ;;  %v5020_v18 = vpop.f32.mrb[34].mxu0  ;;  %5320 = vmatpush3.bf16.msra.mxu0 %v7130_v32  ;;  %v5540_v32 = vld [vmem:[#allocation5 + $0xc] ss:$16 sps:$4 sm:$0xff]  }
 0x2d8   :  { %v5041_v15 = vadd.f32 %v5040_v2, %v5039_v31  ;;  %v5042_v10 = vpop.f32.mrb[34].mxu1  ;;  %5342 = vmatpush3.bf16.msra.mxu1 %v7133_v50  ;;  %v5021_v48 = vpop.f32.mrb[35].mxu0  ;;  %5321 = vmatprep.subr.bf16.mxu0 %v7136_v20  ;;  %v5538_v20 = vld [vmem:[#allocation5 + $0x8] ss:$16 sps:$4 sm:$0xff]   ;;  %v5543_v50 = vld [vmem:[#allocation5 + $0x24] ss:$16 sps:$4 sm:$0xff]  }
 0x2d9   :  { %v5043_v8 = vpop.f32.mrb[35].mxu1  ;;  %5343 = vmatprep.subr.bf16.mxu1 %v7139_v29  ;;  %v5535_v29 = vld [vmem:[#allocation5] ss:$16 sps:$4 sm:$0xff]   ;;  %v7359_v18 = vld [vmem:[#allocation8 + $0x4] ss:$16 sps:$4 sm:$0xff]  }
 0x2da   :  { %v7332_v60 = vadd.f32 %v5041_v15, %v5019_v58  ;;  %v7361_v15 = vld [vmem:[#allocation8] ss:$16 sps:$4 sm:$0xff]   ;;  %v7365_v10 = vld [vmem:[#allocation8 + $0x8] ss:$16 sps:$4 sm:$0xff]   ;;  %v7367_v48 = vld [vmem:[#allocation8 + $0x24] ss:$16 sps:$4 sm:$0xff]  }
 0x2db   :  { %5322 = vmatpush3.bf16.msra.mxu0 %v7142_v51  ;;  %v5546_v51 = vld [vmem:[#allocation5 + $0x2c] ss:$16 sps:$4 sm:$0xff]  }
 0x2dc   :  { %5344 = vmatpush3.bf16.msra.mxu1 %v7145_v52  ;;  %5323 = vmatprep.subr.bf16.mxu0 %v7148_v53  ;;  %v5544_v52 = vld [vmem:[#allocation5 + $0x28] ss:$16 sps:$4 sm:$0xff]   ;;  %v5552_v53 = vld [vmem:[#allocation5 + $0x4c] ss:$16 sps:$4 sm:$0xff]  }
 0x2dd   :  { %5345 = vmatprep.subr.bf16.mxu1 %v7153_v54  ;;  %v8254_v54 = vmov 0   ;;  %v7371_v8 = vld [vmem:[#allocation8 + $0x2c] ss:$16 sps:$4 sm:$0xff]  }
 0x2df   :  { %5324 = vmatpush3.bf16.msra.mxu0 %v7160_v56  ;;  %v5547_v56 = vld [vmem:[#allocation5 + $0x40] ss:$16 sps:$4 sm:$0xff]  }
 0x2e0   :  { %5346 = vmatpush3.bf16.msra.mxu1 %v7165_v57  ;;  %2373 = vmatprep.subr.bf16.mxu0 %v5537_v62  ;;  %v5550_v57 = vld [vmem:[#allocation5 + $0x48] ss:$16 sps:$4 sm:$0xff]  }
 0x2e1   :  { %2446 = vmatprep.subr.bf16.mxu1 %v5540_v32  ;;  %v7377_v62 = vld [vmem:[#allocation8 + $0x28] ss:$16 sps:$4 sm:$0xff]   ;;  %v7381_v32 = vld [vmem:[#allocation8 + $0x44] ss:$16 sps:$4 sm:$0xff]  }
 0x2e2   :  { %4496 = vmatmul.mubr.msk.bf16.vlgmr.msra.gmra.mrb[60].mxu0 %vm4495_vm14, %v8139_v39 }
 0x2e3   :  { %4500 = vmatmul.mubr.msk.bf16.vlgmr.msra.gmra.mrb[60].mxu1 %vm4499_vm15, %v8139_v39  ;;  %2374 = vmatpush1.bf16.msra.mxu0 %v5535_v29  ;;  %v5558_v39 = vld [vmem:[#allocation5 + $0x6c] ss:$16 sps:$4 sm:$0xff]  }
 0x2e4   :  { %2447 = vmatpush1.bf16.msra.mxu1 %v5538_v20  ;;  %2375 = vmatprep.subr.bf16.mxu0 %v5543_v50  ;;  %v7383_v29 = vld [vmem:[#allocation8 + $0x4c] ss:$16 sps:$4 sm:$0xff]   ;;  %v7387_v20 = vld [vmem:[#allocation8 + $0x40] ss:$16 sps:$4 sm:$0xff]   ;;  %v7389_v50 = vld [vmem:[#allocation8 + $0x48] ss:$16 sps:$4 sm:$0xff]  }
 0x2e5   :  { %2448 = vmatprep.subr.bf16.mxu1 %v5546_v51  ;;  %2405 = vmatprep.mubr.bf16.mxu0 %v8254_v54  ;;  %v7393_v51 = vld [vmem:[#allocation8 + $0x64] ss:$16 sps:$4 sm:$0xff]  }
 0x2e6   :  { %2478 = vmatprep.mubr.bf16.mxu1 %v8254_v54 }
 0x2e7   :  { %2376 = vmatpush1.bf16.msra.mxu0 %v5541_v19  ;;  %v7395_v19 = vld [vmem:[#allocation8 + $0x6c] ss:$16 sps:$4 sm:$0xff]  }
 0x2e8   :  { %2449 = vmatpush1.bf16.msra.mxu1 %v5544_v52  ;;  %2377 = vmatprep.subr.bf16.mxu0 %v5549_v61  ;;  %v7399_v52 = vld [vmem:[#allocation8 + $0x60] ss:$16 sps:$4 sm:$0xff]   ;;  %v7401_v61 = vld [vmem:[#allocation8 + $0x68] ss:$16 sps:$4 sm:$0xff]  }
 0x2e9   :  { %2450 = vmatprep.subr.bf16.mxu1 %v5552_v53 }
 0x2eb   :  { %2378 = vmatpush1.bf16.msra.mxu0 %v5547_v56 }
 0x2ec   :  { %2451 = vmatpush1.bf16.msra.mxu1 %v5550_v57  ;;  %2379 = vmatprep.subr.bf16.mxu0 %v5555_v25 }
 0x2ed   :  { %2452 = vmatprep.subr.bf16.mxu1 %v5558_v39 }
 0x2ef   :  { %2380 = vmatpush1.bf16.msra.mxu0 %v5553_v26 }
 0x2f0   :  { %2453 = vmatpush1.bf16.msra.mxu1 %v5556_v16  ;;  %2381 = vmatprep.subr.bf16.mxu0 %v5561_v9 }
 0x2f1   :  { %2454 = vmatprep.subr.bf16.mxu1 %v5564_v6 }
 0x2f3   :  { %2382 = vmatpush1.bf16.msra.mxu0 %v5559_v42 }
 0x2f4   :  { %2455 = vmatpush1.bf16.msra.mxu1 %v5562_v55  ;;  %2383 = vmatprep.subr.bf16.mxu0 %v5567_v41  ;;  %v7407_v41 = vld [vmem:[#allocation8 + $0x84] ss:$16 sps:$4 sm:$0xff]  }
 0x2f5   :  { %v5061_v21 = vpop.f32.mrb[36].mxu0  ;;  %2456 = vmatprep.subr.bf16.mxu1 %v5570_v7  ;;  %v7409_v7 = vld [vmem:[#allocation8 + $0x8c] ss:$16 sps:$4 sm:$0xff]  }
 0x2f6   :  { %v5083_v27 = vpop.f32.mrb[36].mxu1  ;;  %v5062_v28 = vpop.f32.mrb[37].mxu0 }
 0x2f7   :  { %v5063_v0 = vadd.f32 %v5062_v28, %v5061_v21  ;;  %v5084_v63 = vpop.f32.mrb[37].mxu1  ;;  %v5064_v24 = vpop.f32.mrb[38].mxu0  ;;  %2384 = vmatpush1.bf16.msra.mxu0 %v5565_v11  ;;  %v7424_v28 = vld [vmem:[#allocation8 + $0xac] ss:$16 sps:$4 sm:$0xff]  }
 0x2f8   :  { %v5085_v38 = vadd.f32 %v5084_v63, %v5083_v27  ;;  %v5086_v47 = vpop.f32.mrb[38].mxu1  ;;  %2457 = vmatpush1.bf16.msra.mxu1 %v5568_v22  ;;  %v5065_v12 = vpop.f32.mrb[39].mxu0  ;;  %2385 = vmatprep.subr.bf16.mxu0 %v5573_v49  ;;  %v7411_v22 = vld [vmem:[#allocation8 + $0x80] ss:$16 sps:$4 sm:$0xff]   ;;  %v7413_v49 = vld [vmem:[#allocation8 + $0x88] ss:$16 sps:$4 sm:$0xff]  }
 0x2f9   :  { %v1549_v17 = vadd.f32 %v5063_v0, %v7332_v60  ;;  %v5087_v40 = vpop.f32.mrb[39].mxu1  ;;  %2458 = vmatprep.subr.bf16.mxu1 %v5576_v23  ;;  %v7375_v60 = vld [vmem:[#allocation8 + $0x20] ss:$16 sps:$4 sm:$0xff]   ;;  %v7420_v23 = vld [vmem:[#allocation8 + $0xa4] ss:$16 sps:$4 sm:$0xff]  }
 0x2fa   :  { %v7422_v27 = vld [vmem:[#allocation8 + $0xa0] ss:$16 sps:$4 sm:$0xff]   ;;  %v7426_v0 = vld [vmem:[#allocation8 + $0xa8] ss:$16 sps:$4 sm:$0xff]   ;;  %v7428_v63 = vld [vmem:[#allocation8 + $0xc4] ss:$16 sps:$4 sm:$0xff]  }
 0x2fb   :  { %v7349_v44 = vadd.f32 %v5085_v38, %v1549_v17  ;;  %2386 = vmatpush1.bf16.msra.mxu0 %v5571_v1  ;;  %v7430_v24 = vld [vmem:[#allocation8 + $0xcc] ss:$16 sps:$4 sm:$0xff]   ;;  %v7436_v1 = vld [vmem:[#allocation8 + $0xc0] ss:$16 sps:$4 sm:$0xff]   ;;  %v7438_v38 = vld [vmem:[#allocation8 + $0xc8] ss:$16 sps:$4 sm:$0xff]  }
 0x2fc   :  { %2459 = vmatpush1.bf16.msra.mxu1 %v5574_v13  ;;  %2387 = vmatprep.subr.bf16.mxu0 %v5579_v45  ;;  %v7442_v47 = vld [vmem:[#allocation8 + $0xe4] ss:$16 sps:$4 sm:$0xff]   ;;  %v7444_v12 = vld [vmem:[#allocation8 + $0xec] ss:$16 sps:$4 sm:$0xff]   ;;  %v7450_v13 = vld [vmem:[#allocation8 + $0xe0] ss:$16 sps:$4 sm:$0xff]  }
 0x2fd   :  { %2460 = vmatprep.subr.bf16.mxu1 %v5582_v43  ;;  %v7452_v45 = vld [vmem:[#allocation8 + $0xe8] ss:$16 sps:$4 sm:$0xff]  }
 0x2ff   :  { %2388 = vmatpush1.bf16.msra.mxu0 %v5577_v46 }
 0x300   :  { %2461 = vmatpush1.bf16.msra.mxu1 %v5580_v34  ;;  %2747 = vmatprep.subr.bf16.mxu0 %v7359_v18 }
 0x302   :  { %2406 = vmatmul.mubr.bf16.vlgmr.msra.gmra.mrb[64].mxu0 %v8255_v35 }
 0x303   :  { %2479 = vmatmul.mubr.bf16.vlgmr.msra.gmra.mrb[64].mxu1 %v8255_v35  ;;  %2415 = vmatprep.mubr.bf16.mxu0 %v8254_v54 }
 0x304   :  { %2488 = vmatprep.mubr.bf16.mxu1 %v8254_v54  ;;  %2748 = vmatpush1.bf16.msra.mxu0 %v7361_v15 }
 0x305   :  { %2749 = vmatprep.subr.bf16.mxu0 %v7367_v48 }
 0x308   :  { %2750 = vmatpush1.bf16.msra.mxu0 %v7375_v60 }
 0x309   :  { %2751 = vmatprep.subr.bf16.mxu0 %v7381_v32 }
 0x30a   :  { %2416 = vmatmul.mubr.bf16.gmra.mrb[68].mxu0 %v7294_v30 }
 0x30b   :  { %2489 = vmatmul.mubr.bf16.gmra.mrb[68].mxu1 %v7294_v30  ;;  %2425 = vmatprep.mubr.bf16.mxu0 %v8254_v54  ;;  %v7363_v30 = vld [vmem:[#allocation8 + $0xc] ss:$16 sps:$4 sm:$0xff]  }
 0x30c   :  { %2498 = vmatprep.mubr.bf16.mxu1 %v8254_v54  ;;  %2788 = vmatprep.subr.bf16.mxu1 %v7363_v30 }
 0x30d   :  { %2789 = vmatpush1.bf16.msra.mxu1 %v7365_v10  ;;  %2752 = vmatpush1.bf16.msra.mxu0 %v7387_v20 }
 0x30e   :  { %2790 = vmatprep.subr.bf16.mxu1 %v7371_v8  ;;  %2753 = vmatprep.subr.bf16.mxu0 %v7393_v51 }
 0x311   :  { %2791 = vmatpush1.bf16.msra.mxu1 %v7377_v62  ;;  %2754 = vmatpush1.bf16.msra.mxu0 %v7399_v52 }
 0x312   :  { %2792 = vmatprep.subr.bf16.mxu1 %v7383_v29  ;;  %2755 = vmatprep.subr.bf16.mxu0 %v7407_v41 }
 0x315   :  { %v5105_v36 = vpop.f32.mrb[40].mxu0  ;;  %2793 = vmatpush1.bf16.msra.mxu1 %v7389_v50  ;;  %2756 = vmatpush1.bf16.msra.mxu0 %v7411_v22 }
 0x316   :  { %v5127_v3 = vpop.f32.mrb[40].mxu1  ;;  %v5106_v14 = vpop.f32.mrb[41].mxu0  ;;  %2794 = vmatprep.subr.bf16.mxu1 %v7395_v19  ;;  %2757 = vmatprep.subr.bf16.mxu0 %v7420_v23 }
 0x317   :  { %v5107_v37 = vadd.f32 %v5106_v14, %v5105_v36  ;;  %v5128_v59 = vpop.f32.mrb[41].mxu1  ;;  %v5108_v5 = vpop.f32.mrb[42].mxu0 }
 0x318   :  { %v5129_v4 = vadd.f32 %v5128_v59, %v5127_v3  ;;  %v5130_v31 = vpop.f32.mrb[42].mxu1  ;;  %v5109_v33 = vpop.f32.mrb[43].mxu0 }
 0x319   :  { %v5131_v58 = vpop.f32.mrb[43].mxu1  ;;  %2795 = vmatpush1.bf16.msra.mxu1 %v7401_v61  ;;  %2758 = vmatpush1.bf16.msra.mxu0 %v7422_v27 }
 0x31a   :  { %v1696_v2 = vadd.f32 %v5129_v4, %v5107_v37  ;;  %2796 = vmatprep.subr.bf16.mxu1 %v7409_v7  ;;  %2759 = vmatprep.subr.bf16.mxu0 %v7428_v63 }
 0x31d   :  { %2797 = vmatpush1.bf16.msra.mxu1 %v7413_v49  ;;  %2760 = vmatpush1.bf16.msra.mxu0 %v7436_v1 }
 0x31e   :  { %2798 = vmatprep.subr.bf16.mxu1 %v7424_v28  ;;  %2761 = vmatprep.subr.bf16.mxu0 %v7442_v47 }
 0x321   :  { %2799 = vmatpush1.bf16.msra.mxu1 %v7426_v0  ;;  %2762 = vmatpush1.bf16.msra.mxu0 %v7450_v13 }
 0x322   :  { %2800 = vmatprep.subr.bf16.mxu1 %v7430_v24  ;;  %2862 = vmatprep.subr.bf16.mxu0 %v7359_v18 }
 0x325   :  { %2801 = vmatpush1.bf16.msra.mxu1 %v7438_v38 }
 0x326   :  { %2802 = vmatprep.subr.bf16.mxu1 %v7444_v12 }
 0x329   :  { %2803 = vmatpush1.bf16.msra.mxu1 %v7452_v45 }
 0x32a   :  { %2903 = vmatprep.subr.bf16.mxu1 %v7363_v30 }
 0x335   :  { %v5149_v53 = vpop.f32.mrb[44].mxu0 }
 0x336   :  { %v5171_v56 = vpop.f32.mrb[44].mxu1  ;;  %v5150_v57 = vpop.f32.mrb[45].mxu0 }
 0x337   :  { %v5151_v25 = vadd.f32 %v5150_v57, %v5149_v53  ;;  %v5172_v39 = vpop.f32.mrb[45].mxu1  ;;  %v5152_v26 = vpop.f32.mrb[46].mxu0 }
 0x338   :  { %v5173_v16 = vadd.f32 %v5172_v39, %v5171_v56  ;;  %v5174_v9 = vpop.f32.mrb[46].mxu1  ;;  %v5153_v6 = vpop.f32.mrb[47].mxu0 }
 0x339   :  { %v1736_v42 = vadd.f32 %v5151_v25, %v1696_v2  ;;  %v5175_v55 = vpop.f32.mrb[47].mxu1 }
 0x33b   :  { %v1776_v11 = vadd.f32 %v5173_v16, %v1736_v42 }
 0x33d   :  { %v2157_v21 = vpack.c.bf16 %v1776_v11, %v7349_v44 }
 0x33f   :  { %2426 = vmatmul.mubr.bf16.gmra.mrb[72].mxu0 %v2157_v21  ;;  %2499 = vmatmul.mubr.bf16.gmra.mrb[72].mxu1 %v2157_v21 }
 0x340   :  { %2435 = vmatprep.mubr.bf16.mxu0 %v8254_v54  ;;  %2508 = vmatprep.mubr.bf16.mxu1 %v8254_v54 }
 0x355   :  { %v5193_v17 = vpop.f32.mrb[48].mxu0 }
 0x356   :  { %v5215_v40 = vpop.f32.mrb[48].mxu1  ;;  %v5194_v43 = vpop.f32.mrb[49].mxu0 }
 0x357   :  { %v5195_v44 = vadd.f32 %v5194_v43, %v5193_v17  ;;  %v5216_v46 = vpop.f32.mrb[49].mxu1  ;;  %v5196_v34 = vpop.f32.mrb[50].mxu0 }
 0x358   :  { %v5217_v35 = vadd.f32 %v5216_v46, %v5215_v40  ;;  %v5218_v36 = vpop.f32.mrb[50].mxu1  ;;  %v5197_v3 = vpop.f32.mrb[51].mxu0 }
 0x359   :  { %v5219_v14 = vpop.f32.mrb[51].mxu1 }
 0x35a   :  { %v1883_v37 = vadd.f32 %v5217_v35, %v5195_v44 }
 0x375   :  { %v5237_v59 = vpop.f32.mrb[52].mxu0 }
 0x376   :  { %v5259_v5 = vpop.f32.mrb[52].mxu1  ;;  %v5238_v4 = vpop.f32.mrb[53].mxu0 }
 0x377   :  { %v5239_v31 = vadd.f32 %v5238_v4, %v5237_v59  ;;  %v5260_v33 = vpop.f32.mrb[53].mxu1  ;;  %v5240_v58 = vpop.f32.mrb[54].mxu0 }
 0x378   :  { %v5261_v2 = vadd.f32 %v5260_v33, %v5259_v5  ;;  %v5262_v53 = vpop.f32.mrb[54].mxu1  ;;  %v5241_v56 = vpop.f32.mrb[55].mxu0 }
 0x379   :  { %v1923_v57 = vadd.f32 %v5239_v31, %v1883_v37  ;;  %v5263_v25 = vpop.f32.mrb[55].mxu1 }
 0x37b   :  { %v1963_v39 = vadd.f32 %v5261_v2, %v1923_v57 }
 0x395   :  { %v5281_v26 = vpop.f32.mrb[56].mxu0 }
 0x396   :  { %v5303_v16 = vpop.f32.mrb[56].mxu1  ;;  %v5282_v9 = vpop.f32.mrb[57].mxu0 }
 0x397   :  { %v5283_v6 = vadd.f32 %v5282_v9, %v5281_v26  ;;  %v5304_v42 = vpop.f32.mrb[57].mxu1  ;;  %v5284_v55 = vpop.f32.mrb[58].mxu0 }
 0x398   :  { %v5305_v11 = vadd.f32 %v5304_v42, %v5303_v16  ;;  %v5306_v21 = vpop.f32.mrb[58].mxu1  ;;  %v5285_v17 = vpop.f32.mrb[59].mxu0 }
 0x399   :  { %v5307_v40 = vpop.f32.mrb[59].mxu1 }
 0x39a   :  { %v2070_v43 = vadd.f32 %v5305_v11, %v5283_v6 }
 0x3b5   :  { %v5325_v44 = vpop.f32.mrb[60].mxu0 }
 0x3b6   :  { %v5347_v46 = vpop.f32.mrb[60].mxu1  ;;  %v5326_v34 = vpop.f32.mrb[61].mxu0 }
 0x3b7   :  { %v5327_v35 = vadd.f32 %v5326_v34, %v5325_v44  ;;  %v5348_v36 = vpop.f32.mrb[61].mxu1  ;;  %v5328_v3 = vpop.f32.mrb[62].mxu0 }
 0x3b8   :  { %v5349_v14 = vadd.f32 %v5348_v36, %v5347_v46  ;;  %v5350_v37 = vpop.f32.mrb[62].mxu1  ;;  %v5329_v59 = vpop.f32.mrb[63].mxu0 }
 0x3b9   :  { %v2110_v5 = vadd.f32 %v5327_v35, %v2070_v43  ;;  %v5351_v4 = vpop.f32.mrb[63].mxu1 }
 0x3ba   :  { %v2191_v4 = vld [vmem:[%s7991_s4] sm:$0xf] }
 0x3bb   :  { %v7460_v31 = vadd.f32 %v5349_v14, %v2110_v5  ;;  %v8272_v14 = vlaneseq }
 0x3bd   :  { %8256 = vst [vmem:[#allocation30_spill] sm:$0xff] %v7460_v31  ;;  %v2158_v33 = vpack.c.bf16 %v7460_v31, %v1963_v39  ;;  %v7542_v37 = vshrl.u32 %v8272_v14, 7 }
 0x3bf   :  { %2436 = vmatmul.mubr.bf16.gmra.mrb[76].mxu0 %v2158_v33  ;;  %2509 = vmatmul.mubr.bf16.gmra.mrb[76].mxu1 %v2158_v33  ;;  %8273 = vst [vmem:[#allocation43_spill] sm:$0xff] %v7542_v37  ;;  %v2199_v33 = vsub.s32 1, %v7542_v37  ;;  %v8280_v5 = vsub.s32 0, %v7542_v37 }
 0x3c0   :  { %2779 = vmatprep.mubr.bf16.mxu0 %v8254_v54  ;;  %2820 = vmatprep.mubr.bf16.mxu1 %v8254_v54 }
 0x3c7   :  { %2780 = vmatmul.mubr.bf16.vlgmr.msra.gmra.mrb[80].mxu0 %v8254_v54  ;;  %2821 = vmatmul.mubr.bf16.vlgmr.msra.gmra.mrb[80].mxu1 %v8254_v54 }
 0x3c8   :  { %2863 = vmatpush1.bf16.msra.mxu0 %v7361_v15  ;;  %2904 = vmatpush1.bf16.msra.mxu1 %v7365_v10 }
 0x3c9   :  { %2864 = vmatprep.subr.bf16.mxu0 %v7367_v48  ;;  %2905 = vmatprep.subr.bf16.mxu1 %v7371_v8 }
 0x3ca   :  { %2894 = vmatprep.mubr.bf16.mxu0 %v8254_v54  ;;  %2935 = vmatprep.mubr.bf16.mxu1 %v8254_v54 }
 0x3cc   :  { %2865 = vmatpush1.bf16.msra.mxu0 %v7375_v60  ;;  %2906 = vmatpush1.bf16.msra.mxu1 %v7377_v62 }
 0x3cd   :  { %2866 = vmatprep.subr.bf16.mxu0 %v7381_v32  ;;  %2907 = vmatprep.subr.bf16.mxu1 %v7383_v29 }
 0x3d0   :  { %2867 = vmatpush1.bf16.msra.mxu0 %v7387_v20  ;;  %2908 = vmatpush1.bf16.msra.mxu1 %v7389_v50 }
 0x3d1   :  { %2868 = vmatprep.subr.bf16.mxu0 %v7393_v51  ;;  %2909 = vmatprep.subr.bf16.mxu1 %v7395_v19 }
 0x3d4   :  { %2869 = vmatpush1.bf16.msra.mxu0 %v7399_v52  ;;  %2910 = vmatpush1.bf16.msra.mxu1 %v7401_v61 }
 0x3d5   :  { %v2407_v58 = vpop.f32.mrb[64].mxu0  ;;  %2870 = vmatprep.subr.bf16.mxu0 %v7407_v41  ;;  %2911 = vmatprep.subr.bf16.mxu1 %v7409_v7 }
 0x3d6   :  { %v2480_v2 = vpop.f32.mrb[64].mxu1  ;;  %v2409_v53 = vpop.f32.mrb[65].mxu0 }
 0x3d7   :  { %v2482_v56 = vpop.f32.mrb[65].mxu1  ;;  %v7485_v57 = vpop.f32.mrb[66].mxu0 }
 0x3d8   :  { %v7487_v25 = vpop.f32.mrb[66].mxu1  ;;  %v7489_v39 = vpop.f32.mrb[67].mxu0  ;;  %2871 = vmatpush1.bf16.msra.mxu0 %v7411_v22  ;;  %2912 = vmatpush1.bf16.msra.mxu1 %v7413_v49 }
 0x3d9   :  { %v7493_v26 = vpop.f32.mrb[67].mxu1  ;;  %2872 = vmatprep.subr.bf16.mxu0 %v7420_v23  ;;  %2913 = vmatprep.subr.bf16.mxu1 %v7424_v28 }
 0x3dc   :  { %2873 = vmatpush1.bf16.msra.mxu0 %v7422_v27  ;;  %2914 = vmatpush1.bf16.msra.mxu1 %v7426_v0 }
 0x3dd   :  { %v7499_v16 = vpop.f32.mrb[68].mxu0  ;;  %2874 = vmatprep.subr.bf16.mxu0 %v7428_v63  ;;  %2915 = vmatprep.subr.bf16.mxu1 %v7430_v24 }
 0x3de   :  { %v7503_v9 = vpop.f32.mrb[68].mxu1  ;;  %v7505_v6 = vpop.f32.mrb[69].mxu0 }
 0x3df   :  { %8257 = vst [vmem:[#allocation31_spill] sm:$0xff] %v7503_v9  ;;  %8258 = vst [vmem:[#allocation35_spill] sm:$0xff] %v7505_v6  ;;  %v7507_v42 = vpop.f32.mrb[69].mxu1  ;;  %v7509_v55 = vpop.f32.mrb[70].mxu0 }
 0x3e0   :  { %8259 = vst [vmem:[#allocation36_spill] sm:$0xff] %v7507_v42  ;;  %8260 = vst [vmem:[#allocation37_spill] sm:$0xff] %v7509_v55  ;;  %v7511_v11 = vpop.f32.mrb[70].mxu1  ;;  %v7513_v21 = vpop.f32.mrb[71].mxu0  ;;  %2875 = vmatpush1.bf16.msra.mxu0 %v7436_v1  ;;  %2916 = vmatpush1.bf16.msra.mxu1 %v7438_v38 }
 0x3e1   :  { %8261 = vst [vmem:[#allocation28_spill] sm:$0xff] %v7511_v11  ;;  %8262 = vst [vmem:[#allocation18_spill] sm:$0xff] %v7513_v21  ;;  %v7517_v17 = vpop.f32.mrb[71].mxu1  ;;  %2876 = vmatprep.subr.bf16.mxu0 %v7442_v47  ;;  %2917 = vmatprep.subr.bf16.mxu1 %v7444_v12 }
 0x3e2   :  { %8263 = vst [vmem:[#allocation32_spill] sm:$0xff] %v7517_v17 }
 0x3e4   :  { %2877 = vmatpush1.bf16.msra.mxu0 %v7450_v13  ;;  %2918 = vmatpush1.bf16.msra.mxu1 %v7452_v45 }
 0x3e5   :  { %2977 = vmatprep.subr.bf16.mxu0 %v7359_v18  ;;  %3018 = vmatprep.subr.bf16.mxu1 %v7363_v30 }
 0x412   :  { %v7525_v40 = vpop.f32.mrb[72].mxu0  ;;  %v7527_v43 = vpop.f32.mrb[72].mxu1 }
 0x413   :  { %8264 = vst [vmem:[#allocation33_spill] sm:$0xff] %v7525_v40  ;;  %8265 = vst [vmem:[#allocation34_spill] sm:$0xff] %v7527_v43  ;;  %v7529_v44 = vpop.f32.mrb[73].mxu0  ;;  %v7531_v46 = vpop.f32.mrb[73].mxu1 }
 0x414   :  { %8266 = vst [vmem:[#allocation38_spill] sm:$0xff] %v7529_v44  ;;  %8267 = vst [vmem:[#allocation25_spill] sm:$0xff] %v7531_v46  ;;  %v7533_v34 = vpop.f32.mrb[74].mxu0  ;;  %v7535_v35 = vpop.f32.mrb[74].mxu1  ;;  %v7565_v46 = vrot.slane %v2191_v4, %v8280_v5  ;;  %v8281_v44 = vsub.s32 2, %v7542_v37 }
 0x415   :  { %8268 = vst [vmem:[#allocation29_spill] sm:$0xff] %v7533_v34  ;;  %8269 = vst [vmem:[#allocation40_spill] sm:$0xff] %v7535_v35  ;;  %v7537_v36 = vpop.f32.mrb[75].mxu0  ;;  %v7539_v3 = vpop.f32.mrb[75].mxu1 }
 0x416   :  { %8270 = vst [vmem:[#allocation41_spill] sm:$0xff] %v7537_v36  ;;  %8271 = vst [vmem:[#allocation42_spill] sm:$0xff] %v7539_v3  ;;  %v7569_v43 = vrot.slane %v2191_v4, %v8281_v44 }
 0x492   :  { %v7551_v35 = vpop.f32.mrb[76].mxu0  ;;  %v7553_v36 = vpop.f32.mrb[76].mxu1 }
 0x493   :  { %8274 = vst [vmem:[#allocation19_spill] sm:$0xff] %v7551_v35  ;;  %8275 = vst [vmem:[#allocation20_spill] sm:$0xff] %v7553_v36  ;;  %v7555_v3 = vpop.f32.mrb[77].mxu0  ;;  %v7557_v14 = vpop.f32.mrb[77].mxu1  ;;  %v7575_v36 = vrot.slane %v2191_v4, %v2199_v33 }
 0x494   :  { %8276 = vst [vmem:[#allocation21_spill] sm:$0xff] %v7555_v3  ;;  %8277 = vst [vmem:[#allocation22_spill] sm:$0xff] %v7557_v14  ;;  %v7559_v34 = vpop.f32.mrb[78].mxu0  ;;  %v7561_v59 = vpop.f32.mrb[78].mxu1  ;;  %v8284_v14 = vsub.s32 3, %v7542_v37 }
 0x495   :  { %8278 = vst [vmem:[#allocation23_spill] sm:$0xff] %v7559_v34  ;;  %8279 = vst [vmem:[#allocation24_spill] sm:$0xff] %v7561_v59  ;;  %v7571_v31 = vpop.f32.mrb[79].mxu0  ;;  %v7573_v35 = vpop.f32.mrb[79].mxu1  ;;  %v2408_v59 = vadd.f32 %v2407_v58, %v7565_v46  ;;  %v2481_v34 = vadd.f32 %v2480_v2, %v7569_v43  ;;  %v2410_v5 = vadd.f32 %v2409_v53, %v7575_v36 }
 0x496   :  { %8282 = vst [vmem:[#allocation26_spill] sm:$0xff] %v7571_v31  ;;  %8283 = vst [vmem:[#allocation27_spill] sm:$0xff] %v7573_v35  ;;  %v7579_v3 = vrot.slane %v2191_v4, %v8284_v14 }
 0x498   :  { %v2483_v40 = vadd.f32 %v2482_v56, %v7579_v3 }
 0x49a   :  { %v2781_v44 = vpop.f32.mrb[80].mxu0  ;;  %v2822_v17 = vpop.f32.mrb[80].mxu1 }
 0x49b   :  { %v2829_v21 = vadd.f32 %v2781_v44, %v2408_v59  ;;  %v2831_v31 = vadd.f32 %v2822_v17, %v2481_v34  ;;  %v2783_v11 = vpop.f32.mrb[81].mxu0  ;;  %v2824_v35 = vpop.f32.mrb[81].mxu1 }
 0x49c   :  { %v2830_v33 = vadd.f32 %v2783_v11, %v2410_v5  ;;  %v2832_v55 = vadd.f32 %v2824_v35, %v2483_v40  ;;  %v2785_v42 = vpop.f32.mrb[82].mxu0  ;;  %v2826_v37 = vpop.f32.mrb[82].mxu1 }
 0x49d   :  { %v4565_v4 = vmul.f32 -1.442695, %v2829_v21  ;;  %v2786_v14 = vpop.f32.mrb[83].mxu0  ;;  %v2827_v6 = vpop.f32.mrb[83].mxu1 }
 0x49e   :  { %v4566_v58 = vmul.f32 -1.442695, %v2830_v33  ;;  %v4567_v2 = vmul.f32 -1.442695, %v2832_v55  ;;  %v2414_v33 = vadd.f32 %v7489_v39, %v7575_v36 }
 0x49f   :  { %5703 = vpow2.f32 %v4565_v4  ;;  %v2487_v4 = vadd.f32 %v7493_v26, %v7579_v3 }
 0x4a0   :  { %5705 = vpow2.f32 %v4566_v58 }
 0x4a1   :  { %5707 = vpow2.f32 %v4567_v2 }
 0x4a2   :  { %5709 = vtanh.f32 %v2831_v31  ;;  %v2412_v31 = vadd.f32 %v7485_v57, %v7565_v46 }
 0x4a9   :  { %v5704_v53 = vpop.eup %5703 }
 0x4aa   :  { %v5706_v9 = vpop.eup %5705  ;;  %v2836_v56 = vadd.f32 1.0, %v5704_v53 }
 0x4ab   :  { %v2842_v59 = vadd.f32 1.0, %v5706_v9  ;;  %v5708_v17 = vpop.eup %5707  ;;  %v2485_v9 = vadd.f32 %v7487_v25, %v7569_v43 }
 0x4ac   :  { %5711 = vrcp.f32 %v2836_v56  ;;  %v5710_v11 = vpop.eup %5709  ;;  %v2849_v21 = vadd.f32 1.0, %v5708_v17 }
 0x4ad   :  { %5713 = vrcp.f32 %v2842_v59 }
 0x4ae   :  { %5715 = vrcp.f32 %v2849_v21 }
 0x4b6   :  { %v5712_v40 = vpop.eup %5711 }
 0x4b7   :  { %v5714_v42 = vpop.eup %5713  ;;  %v2853_v34 = vmul.f32 %v5712_v40, %v5710_v11 }
 0x4b8   :  { %v2852_v35 = vmul.f32 0.0, %v5714_v42  ;;  %v5716_v55 = vpop.eup %5715 }
 0x4ba   :  { %v7585_v6 = vadd.f32 %v2853_v34, %v2852_v35 }
 0x4bc   :  { %5717 = vtanh.f32 %v7585_v6 }
 0x4c6   :  { %v5718_v37 = vpop.eup %5717 }
 0x4c7   :  { %v2856_v5 = vmul.f32 %v5718_v37, %v5716_v55 }
 0x4c9   :  { %v2861_v44 = vpack.c.bf16 %v2856_v5, %v2856_v5 }
 0x4cb   :  { %2895 = vmatmul.mubr.bf16.vlgmr.msra.gmra.mrb[84].mxu0 %v2861_v44  ;;  %2936 = vmatmul.mubr.bf16.vlgmr.msra.gmra.mrb[84].mxu1 %v2861_v44 }
 0x4cc   :  { %2978 = vmatpush1.bf16.msra.mxu0 %v7361_v15  ;;  %3019 = vmatpush1.bf16.msra.mxu1 %v7365_v10 }
 0x4cd   :  { %2979 = vmatprep.subr.bf16.mxu0 %v7367_v48  ;;  %3020 = vmatprep.subr.bf16.mxu1 %v7371_v8 }
 0x4ce   :  { %3009 = vmatprep.mubr.bf16.mxu0 %v8254_v54  ;;  %3050 = vmatprep.mubr.bf16.mxu1 %v8254_v54 }
 0x4d0   :  { %2980 = vmatpush1.bf16.msra.mxu0 %v7375_v60  ;;  %3021 = vmatpush1.bf16.msra.mxu1 %v7377_v62 }
 0x4d1   :  { %2981 = vmatprep.subr.bf16.mxu0 %v7381_v32  ;;  %3022 = vmatprep.subr.bf16.mxu1 %v7383_v29 }
 0x4d4   :  { %2982 = vmatpush1.bf16.msra.mxu0 %v7387_v20  ;;  %3023 = vmatpush1.bf16.msra.mxu1 %v7389_v50 }
 0x4d5   :  { %2983 = vmatprep.subr.bf16.mxu0 %v7393_v51  ;;  %3024 = vmatprep.subr.bf16.mxu1 %v7395_v19 }
 0x4d8   :  { %2984 = vmatpush1.bf16.msra.mxu0 %v7399_v52  ;;  %3025 = vmatpush1.bf16.msra.mxu1 %v7401_v61 }
 0x4d9   :  { %2985 = vmatprep.subr.bf16.mxu0 %v7407_v41  ;;  %3026 = vmatprep.subr.bf16.mxu1 %v7409_v7 }
 0x4dc   :  { %2986 = vmatpush1.bf16.msra.mxu0 %v7411_v22  ;;  %3027 = vmatpush1.bf16.msra.mxu1 %v7413_v49 }
 0x4dd   :  { %2987 = vmatprep.subr.bf16.mxu0 %v7420_v23  ;;  %3028 = vmatprep.subr.bf16.mxu1 %v7424_v28 }
 0x4e0   :  { %2988 = vmatpush1.bf16.msra.mxu0 %v7422_v27  ;;  %3029 = vmatpush1.bf16.msra.mxu1 %v7426_v0 }
 0x4e1   :  { %2989 = vmatprep.subr.bf16.mxu0 %v7428_v63  ;;  %3030 = vmatprep.subr.bf16.mxu1 %v7430_v24 }
 0x4e4   :  { %2990 = vmatpush1.bf16.msra.mxu0 %v7436_v1  ;;  %3031 = vmatpush1.bf16.msra.mxu1 %v7438_v38 }
 0x4e5   :  { %2991 = vmatprep.subr.bf16.mxu0 %v7442_v47  ;;  %3032 = vmatprep.subr.bf16.mxu1 %v7444_v12 }
 0x4e8   :  { %2992 = vmatpush1.bf16.msra.mxu0 %v7450_v13  ;;  %3033 = vmatpush1.bf16.msra.mxu1 %v7452_v45 }
 0x4e9   :  { %3092 = vmatprep.subr.bf16.mxu0 %v7359_v18  ;;  %3133 = vmatprep.subr.bf16.mxu1 %v7363_v30 }
 0x59e   :  { %v2896_v14 = vpop.f32.mrb[84].mxu0  ;;  %v2937_v58 = vpop.f32.mrb[84].mxu1 }
 0x59f   :  { %v2944_v2 = vadd.f32 %v2896_v14, %v2412_v31  ;;  %v2946_v53 = vadd.f32 %v2937_v58, %v2485_v9  ;;  %v2898_v56 = vpop.f32.mrb[85].mxu0  ;;  %v2939_v59 = vpop.f32.mrb[85].mxu1 }
 0x5a0   :  { %v2945_v17 = vadd.f32 %v2898_v56, %v2414_v33  ;;  %v2947_v11 = vadd.f32 %v2939_v59, %v2487_v4  ;;  %v2900_v40 = vpop.f32.mrb[86].mxu0  ;;  %v2941_v42 = vpop.f32.mrb[86].mxu1 }
 0x5a1   :  { %v4568_v57 = vmul.f32 -1.442695, %v2944_v2  ;;  %v2901_v34 = vpop.f32.mrb[87].mxu0  ;;  %v2942_v21 = vpop.f32.mrb[87].mxu1  ;;  %v8286_v40 = vld [vmem:[#allocation35_spill] sm:$0xff] }
 0x5a2   :  { %v4569_v25 = vmul.f32 -1.442695, %v2945_v17  ;;  %v4570_v39 = vmul.f32 -1.442695, %v2947_v11  ;;  %v8285_v17 = vld [vmem:[#allocation31_spill] sm:$0xff]  ;;  %v2420_v42 = vadd.f32 %v8286_v40, %v7575_v36 }
 0x5a3   :  { %5719 = vpow2.f32 %v4568_v57  ;;  %v2491_v11 = vadd.f32 %v8285_v17, %v7569_v43  ;;  %v8287_v57 = vld [vmem:[#allocation36_spill] sm:$0xff] }
 0x5a4   :  { %5721 = vpow2.f32 %v4569_v25  ;;  %v2493_v34 = vadd.f32 %v8287_v57, %v7579_v3 }
 0x5a5   :  { %5723 = vpow2.f32 %v4570_v39 }
 0x5a6   :  { %5725 = vtanh.f32 %v2946_v53 }
 0x5ad   :  { %v5720_v35 = vpop.eup %5719 }
 0x5ae   :  { %v5722_v55 = vpop.eup %5721  ;;  %v2951_v26 = vadd.f32 1.0, %v5720_v35 }
 0x5af   :  { %v2957_v37 = vadd.f32 1.0, %v5722_v55  ;;  %v5724_v5 = vpop.eup %5723 }
 0x5b0   :  { %5727 = vrcp.f32 %v2951_v26  ;;  %v5726_v44 = vpop.eup %5725  ;;  %v2964_v4 = vadd.f32 1.0, %v5724_v5 }
 0x5b1   :  { %5729 = vrcp.f32 %v2957_v37 }
 0x5b2   :  { %5731 = vrcp.f32 %v2964_v4 }
 0x5ba   :  { %v5728_v31 = vpop.eup %5727 }
 0x5bb   :  { %v5730_v9 = vpop.eup %5729  ;;  %v2968_v33 = vmul.f32 %v5728_v31, %v5726_v44 }
 0x5bc   :  { %v2967_v14 = vmul.f32 %v5730_v9, %v7585_v6  ;;  %v5732_v2 = vpop.eup %5731  ;;  %v2418_v6 = vadd.f32 %v7499_v16, %v7565_v46 }
 0x5be   :  { %v7631_v58 = vadd.f32 %v2968_v33, %v2967_v14 }
 0x5c0   :  { %5733 = vtanh.f32 %v7631_v58 }
 0x5ca   :  { %v5734_v56 = vpop.eup %5733 }
 0x5cb   :  { %v2971_v59 = vmul.f32 %v5734_v56, %v5732_v2 }
 0x5cd   :  { %v2976_v53 = vpack.c.bf16 %v2971_v59, %v2971_v59 }
 0x5cf   :  { %3010 = vmatmul.mubr.bf16.vlgmr.msra.gmra.mrb[88].mxu0 %v2976_v53  ;;  %3051 = vmatmul.mubr.bf16.vlgmr.msra.gmra.mrb[88].mxu1 %v2976_v53 }
 0x5d0   :  { %3093 = vmatpush1.bf16.msra.mxu0 %v7361_v15  ;;  %3134 = vmatpush1.bf16.msra.mxu1 %v7365_v10 }
 0x5d1   :  { %3094 = vmatprep.subr.bf16.mxu0 %v7367_v48  ;;  %3135 = vmatprep.subr.bf16.mxu1 %v7371_v8 }
 0x5d2   :  { %3124 = vmatprep.mubr.bf16.mxu0 %v8254_v54  ;;  %3165 = vmatprep.mubr.bf16.mxu1 %v8254_v54 }
 0x5d4   :  { %3095 = vmatpush1.bf16.msra.mxu0 %v7375_v60  ;;  %3136 = vmatpush1.bf16.msra.mxu1 %v7377_v62 }
 0x5d5   :  { %3096 = vmatprep.subr.bf16.mxu0 %v7381_v32  ;;  %3137 = vmatprep.subr.bf16.mxu1 %v7383_v29 }
 0x5d8   :  { %3097 = vmatpush1.bf16.msra.mxu0 %v7387_v20  ;;  %3138 = vmatpush1.bf16.msra.mxu1 %v7389_v50 }
 0x5d9   :  { %3098 = vmatprep.subr.bf16.mxu0 %v7393_v51  ;;  %3139 = vmatprep.subr.bf16.mxu1 %v7395_v19 }
 0x5dc   :  { %3099 = vmatpush1.bf16.msra.mxu0 %v7399_v52  ;;  %3140 = vmatpush1.bf16.msra.mxu1 %v7401_v61 }
 0x5dd   :  { %3100 = vmatprep.subr.bf16.mxu0 %v7407_v41  ;;  %3141 = vmatprep.subr.bf16.mxu1 %v7409_v7 }
 0x5e0   :  { %3101 = vmatpush1.bf16.msra.mxu0 %v7411_v22  ;;  %3142 = vmatpush1.bf16.msra.mxu1 %v7413_v49 }
 0x5e1   :  { %3102 = vmatprep.subr.bf16.mxu0 %v7420_v23  ;;  %3143 = vmatprep.subr.bf16.mxu1 %v7424_v28 }
 0x5e4   :  { %3103 = vmatpush1.bf16.msra.mxu0 %v7422_v27  ;;  %3144 = vmatpush1.bf16.msra.mxu1 %v7426_v0 }
 0x5e5   :  { %3104 = vmatprep.subr.bf16.mxu0 %v7428_v63  ;;  %3145 = vmatprep.subr.bf16.mxu1 %v7430_v24 }
 0x5e8   :  { %3105 = vmatpush1.bf16.msra.mxu0 %v7436_v1  ;;  %3146 = vmatpush1.bf16.msra.mxu1 %v7438_v38 }
 0x5e9   :  { %3106 = vmatprep.subr.bf16.mxu0 %v7442_v47  ;;  %3147 = vmatprep.subr.bf16.mxu1 %v7444_v12 }
 0x5ec   :  { %3107 = vmatpush1.bf16.msra.mxu0 %v7450_v13  ;;  %3148 = vmatpush1.bf16.msra.mxu1 %v7452_v45 }
 0x5ed   :  { %3207 = vmatprep.subr.bf16.mxu0 %v7359_v18  ;;  %3248 = vmatprep.subr.bf16.mxu1 %v7363_v30 }
 0x6a2   :  { %v3011_v21 = vpop.f32.mrb[88].mxu0  ;;  %v3052_v25 = vpop.f32.mrb[88].mxu1 }
 0x6a3   :  { %v3059_v39 = vadd.f32 %v3011_v21, %v2418_v6  ;;  %v3061_v35 = vadd.f32 %v3052_v25, %v2491_v11  ;;  %v3013_v55 = vpop.f32.mrb[89].mxu0  ;;  %v3054_v26 = vpop.f32.mrb[89].mxu1 }
 0x6a4   :  { %v3060_v37 = vadd.f32 %v3013_v55, %v2420_v42  ;;  %v3062_v5 = vadd.f32 %v3054_v26, %v2493_v34  ;;  %v3015_v44 = vpop.f32.mrb[90].mxu0  ;;  %v3056_v31 = vpop.f32.mrb[90].mxu1 }
 0x6a5   :  { %v4571_v16 = vmul.f32 -1.442695, %v3059_v39  ;;  %v3016_v9 = vpop.f32.mrb[91].mxu0  ;;  %v3057_v33 = vpop.f32.mrb[91].mxu1  ;;  %v8290_v44 = vld [vmem:[#allocation18_spill] sm:$0xff] }
 0x6a6   :  { %v4572_v4 = vmul.f32 -1.442695, %v3060_v37  ;;  %v4573_v14 = vmul.f32 -1.442695, %v3062_v5  ;;  %v8289_v37 = vld [vmem:[#allocation28_spill] sm:$0xff]  ;;  %v2424_v31 = vadd.f32 %v8290_v44, %v7575_v36 }
 0x6a7   :  { %5735 = vpow2.f32 %v4571_v16  ;;  %v2495_v5 = vadd.f32 %v8289_v37, %v7569_v43  ;;  %v8291_v16 = vld [vmem:[#allocation32_spill] sm:$0xff] }
 0x6a8   :  { %5737 = vpow2.f32 %v4572_v4  ;;  %v2497_v9 = vadd.f32 %v8291_v16, %v7579_v3 }
 0x6a9   :  { %5739 = vpow2.f32 %v4573_v14 }
 0x6aa   :  { %5741 = vtanh.f32 %v3061_v35 }
 0x6b1   :  { %v5736_v2 = vpop.eup %5735 }
 0x6b2   :  { %v5738_v56 = vpop.eup %5737  ;;  %v3066_v59 = vadd.f32 1.0, %v5736_v2 }
 0x6b3   :  { %v3072_v53 = vadd.f32 1.0, %v5738_v56  ;;  %v5740_v6 = vpop.eup %5739 }
 0x6b4   :  { %5743 = vrcp.f32 %v3066_v59  ;;  %v5742_v17 = vpop.eup %5741  ;;  %v3079_v57 = vadd.f32 1.0, %v5740_v6 }
 0x6b5   :  { %5745 = vrcp.f32 %v3072_v53 }
 0x6b6   :  { %5747 = vrcp.f32 %v3079_v57 }
 0x6be   :  { %v5744_v11 = vpop.eup %5743 }
 0x6bf   :  { %v5746_v40 = vpop.eup %5745  ;;  %v3083_v42 = vmul.f32 %v5744_v11, %v5742_v17 }
 0x6c0   :  { %v3082_v34 = vmul.f32 %v5746_v40, %v7631_v58  ;;  %v5748_v25 = vpop.eup %5747  ;;  %v8288_v58 = vld [vmem:[#allocation37_spill] sm:$0xff] }
 0x6c1   :  { %v2422_v26 = vadd.f32 %v8288_v58, %v7565_v46 }
 0x6c2   :  { %v7677_v21 = vadd.f32 %v3083_v42, %v3082_v34 }
 0x6c4   :  { %5749 = vtanh.f32 %v7677_v21 }
 0x6ce   :  { %v5750_v39 = vpop.eup %5749 }
 0x6cf   :  { %v3086_v55 = vmul.f32 %v5750_v39, %v5748_v25 }
 0x6d1   :  { %v3091_v35 = vpack.c.bf16 %v3086_v55, %v3086_v55 }
 0x6d3   :  { %3125 = vmatmul.mubr.bf16.vlgmr.msra.gmra.mrb[92].mxu0 %v3091_v35  ;;  %3166 = vmatmul.mubr.bf16.vlgmr.msra.gmra.mrb[92].mxu1 %v3091_v35 }
 0x6d4   :  { %3208 = vmatpush1.bf16.msra.mxu0 %v7361_v15  ;;  %3249 = vmatpush1.bf16.msra.mxu1 %v7365_v10 }
 0x6d5   :  { %3209 = vmatprep.subr.bf16.mxu0 %v7367_v48  ;;  %3250 = vmatprep.subr.bf16.mxu1 %v7371_v8 }
 0x6d6   :  { %3239 = vmatprep.mubr.bf16.mxu0 %v8254_v54  ;;  %3280 = vmatprep.mubr.bf16.mxu1 %v8254_v54 }
 0x6d8   :  { %3210 = vmatpush1.bf16.msra.mxu0 %v7375_v60  ;;  %3251 = vmatpush1.bf16.msra.mxu1 %v7377_v62 }
 0x6d9   :  { %3211 = vmatprep.subr.bf16.mxu0 %v7381_v32  ;;  %3252 = vmatprep.subr.bf16.mxu1 %v7383_v29 }
 0x6dc   :  { %3212 = vmatpush1.bf16.msra.mxu0 %v7387_v20  ;;  %3253 = vmatpush1.bf16.msra.mxu1 %v7389_v50 }
 0x6dd   :  { %3213 = vmatprep.subr.bf16.mxu0 %v7393_v51  ;;  %3254 = vmatprep.subr.bf16.mxu1 %v7395_v19 }
 0x6e0   :  { %3214 = vmatpush1.bf16.msra.mxu0 %v7399_v52  ;;  %3255 = vmatpush1.bf16.msra.mxu1 %v7401_v61 }
 0x6e1   :  { %3215 = vmatprep.subr.bf16.mxu0 %v7407_v41  ;;  %3256 = vmatprep.subr.bf16.mxu1 %v7409_v7 }
 0x6e4   :  { %3216 = vmatpush1.bf16.msra.mxu0 %v7411_v22  ;;  %3257 = vmatpush1.bf16.msra.mxu1 %v7413_v49 }
 0x6e5   :  { %3217 = vmatprep.subr.bf16.mxu0 %v7420_v23  ;;  %3258 = vmatprep.subr.bf16.mxu1 %v7424_v28 }
 0x6e8   :  { %3218 = vmatpush1.bf16.msra.mxu0 %v7422_v27  ;;  %3259 = vmatpush1.bf16.msra.mxu1 %v7426_v0 }
 0x6e9   :  { %3219 = vmatprep.subr.bf16.mxu0 %v7428_v63  ;;  %3260 = vmatprep.subr.bf16.mxu1 %v7430_v24 }
 0x6ec   :  { %3220 = vmatpush1.bf16.msra.mxu0 %v7436_v1  ;;  %3261 = vmatpush1.bf16.msra.mxu1 %v7438_v38 }
 0x6ed   :  { %3221 = vmatprep.subr.bf16.mxu0 %v7442_v47  ;;  %3262 = vmatprep.subr.bf16.mxu1 %v7444_v12 }
 0x6f0   :  { %3222 = vmatpush1.bf16.msra.mxu0 %v7450_v13  ;;  %3263 = vmatpush1.bf16.msra.mxu1 %v7452_v45 }
 0x6f1   :  { %3322 = vmatprep.subr.bf16.mxu0 %v7359_v18  ;;  %3363 = vmatprep.subr.bf16.mxu1 %v7363_v30 }
 0x7a6   :  { %v3126_v33 = vpop.f32.mrb[92].mxu0  ;;  %v3167_v4 = vpop.f32.mrb[92].mxu1 }
 0x7a7   :  { %v3174_v14 = vadd.f32 %v3126_v33, %v2422_v26  ;;  %v3176_v2 = vadd.f32 %v3167_v4, %v2495_v5  ;;  %v3128_v56 = vpop.f32.mrb[93].mxu0  ;;  %v3169_v18 = vpop.f32.mrb[93].mxu1 }
 0x7a8   :  { %v3175_v59 = vadd.f32 %v3128_v56, %v2424_v31  ;;  %v3177_v30 = vadd.f32 %v3169_v18, %v2497_v9  ;;  %v3130_v53 = vpop.f32.mrb[94].mxu0  ;;  %v3171_v6 = vpop.f32.mrb[94].mxu1 }
 0x7a9   :  { %v4574_v17 = vmul.f32 -1.442695, %v3174_v14  ;;  %v3131_v11 = vpop.f32.mrb[95].mxu0  ;;  %v3172_v40 = vpop.f32.mrb[95].mxu1 }
 0x7aa   :  { %v4575_v42 = vmul.f32 -1.442695, %v3175_v59  ;;  %v4576_v57 = vmul.f32 -1.442695, %v3177_v30 }
 0x7ab   :  { %5751 = vpow2.f32 %v4574_v17 }
 0x7ac   :  { %5753 = vpow2.f32 %v4575_v42  ;;  %v7776_v42 = vld [vmem:[#allocation8] ss:$16 sps:$4 sm:$0xff]  }
 0x7ad   :  { %5755 = vpow2.f32 %v4576_v57  ;;  %v7779_v57 = vld [vmem:[#allocation8 + $0x8] ss:$16 sps:$4 sm:$0xff]  }
 0x7ae   :  { %5757 = vtanh.f32 %v3176_v2 }
 0x7b5   :  { %v5752_v34 = vpop.eup %5751 }
 0x7b6   :  { %v5754_v25 = vpop.eup %5753  ;;  %v3181_v39 = vadd.f32 1.0, %v5752_v34  ;;  %v7782_v34 = vld [vmem:[#allocation8 + $0x24] ss:$16 sps:$4 sm:$0xff]  }
 0x7b7   :  { %v3187_v55 = vadd.f32 1.0, %v5754_v25  ;;  %v5756_v35 = vpop.eup %5755  ;;  %v7785_v25 = vld [vmem:[#allocation8 + $0x2c] ss:$16 sps:$4 sm:$0xff]  }
 0x7b8   :  { %5759 = vrcp.f32 %v3181_v39  ;;  %v5758_v58 = vpop.eup %5757  ;;  %v3194_v44 = vadd.f32 1.0, %v5756_v35  ;;  %v7790_v39 = vld [vmem:[#allocation8 + $0x20] ss:$16 sps:$4 sm:$0xff]   ;;  %v7796_v35 = vld [vmem:[#allocation8 + $0x44] ss:$16 sps:$4 sm:$0xff]  }
 0x7b9   :  { %5761 = vrcp.f32 %v3187_v55  ;;  %v7793_v55 = vld [vmem:[#allocation8 + $0x28] ss:$16 sps:$4 sm:$0xff]  }
 0x7ba   :  { %5763 = vrcp.f32 %v3194_v44  ;;  %v7811_v44 = vld [vmem:[#allocation8 + $0x6c] ss:$16 sps:$4 sm:$0xff]  }
 0x7c2   :  { %v5760_v26 = vpop.eup %5759 }
 0x7c3   :  { %v5762_v37 = vpop.eup %5761  ;;  %v3198_v5 = vmul.f32 %v5760_v26, %v5758_v58  ;;  %v7799_v58 = vld [vmem:[#allocation8 + $0x4c] ss:$16 sps:$4 sm:$0xff]   ;;  %v7802_v26 = vld [vmem:[#allocation8 + $0x40] ss:$16 sps:$4 sm:$0xff]  }
 0x7c4   :  { %v3197_v31 = vmul.f32 %v5762_v37, %v7677_v21  ;;  %v5764_v9 = vpop.eup %5763  ;;  %v7805_v37 = vld [vmem:[#allocation8 + $0x48] ss:$16 sps:$4 sm:$0xff]  }
 0x7c6   :  { %v7723_v16 = vadd.f32 %v3198_v5, %v3197_v31  ;;  %v7808_v5 = vld [vmem:[#allocation8 + $0x64] ss:$16 sps:$4 sm:$0xff]   ;;  %v7814_v31 = vld [vmem:[#allocation8 + $0x60] ss:$16 sps:$4 sm:$0xff]  }
 0x7c8   :  { %5765 = vtanh.f32 %v7723_v16 }
 0x7d2   :  { %v5766_v33 = vpop.eup %5765 }
 0x7d3   :  { %v3201_v4 = vmul.f32 %v5766_v33, %v5764_v9  ;;  %v7820_v9 = vld [vmem:[#allocation8 + $0x84] ss:$16 sps:$4 sm:$0xff]   ;;  %v7823_v33 = vld [vmem:[#allocation8 + $0x8c] ss:$16 sps:$4 sm:$0xff]  }
 0x7d5   :  { %v3206_v14 = vpack.c.bf16 %v3201_v4, %v3201_v4  ;;  %v7826_v4 = vld [vmem:[#allocation8 + $0x80] ss:$16 sps:$4 sm:$0xff]  }
 0x7d7   :  { %3240 = vmatmul.mubr.bf16.vlgmr.msra.gmra.mrb[96].mxu0 %v3206_v14  ;;  %3281 = vmatmul.mubr.bf16.vlgmr.msra.gmra.mrb[96].mxu1 %v3206_v14  ;;  %v7829_v14 = vld [vmem:[#allocation8 + $0x88] ss:$16 sps:$4 sm:$0xff]  }
 0x7d8   :  { %3323 = vmatpush1.bf16.msra.mxu0 %v7361_v15  ;;  %3364 = vmatpush1.bf16.msra.mxu1 %v7365_v10  ;;  %v7758_v15 = vld [vmem:[#allocation8 + $0x4] ss:$16 sps:$4 sm:$0xff]   ;;  %v7761_v10 = vld [vmem:[#allocation8 + $0xc] ss:$16 sps:$4 sm:$0xff]  }
 0x7d9   :  { %3324 = vmatprep.subr.bf16.mxu0 %v7367_v48  ;;  %3365 = vmatprep.subr.bf16.mxu1 %v7371_v8  ;;  %v8292_v48 = vld [vmem:[#allocation33_spill] sm:$0xff] }
 0x7da   :  { %3354 = vmatprep.mubr.bf16.mxu0 %v8254_v54  ;;  %3395 = vmatprep.mubr.bf16.mxu1 %v8254_v54  ;;  %v2428_v8 = vadd.f32 %v8292_v48, %v7565_v46  ;;  %v7832_v48 = vld [vmem:[#allocation8 + $0xa4] ss:$16 sps:$4 sm:$0xff]  }
 0x7dc   :  { %3325 = vmatpush1.bf16.msra.mxu0 %v7375_v60  ;;  %3366 = vmatpush1.bf16.msra.mxu1 %v7377_v62  ;;  %v8293_v60 = vld [vmem:[#allocation34_spill] sm:$0xff] }
 0x7dd   :  { %3326 = vmatprep.subr.bf16.mxu0 %v7381_v32  ;;  %3367 = vmatprep.subr.bf16.mxu1 %v7383_v29  ;;  %v2501_v62 = vadd.f32 %v8293_v60, %v7569_v43  ;;  %v8294_v32 = vld [vmem:[#allocation38_spill] sm:$0xff] }
 0x7de   :  { %v2430_v29 = vadd.f32 %v8294_v32, %v7575_v36  ;;  %v7838_v60 = vld [vmem:[#allocation8 + $0xa0] ss:$16 sps:$4 sm:$0xff]   ;;  %v7844_v32 = vld [vmem:[#allocation8 + $0xc4] ss:$16 sps:$4 sm:$0xff]  }
 0x7e0   :  { %3327 = vmatpush1.bf16.msra.mxu0 %v7387_v20  ;;  %3368 = vmatpush1.bf16.msra.mxu1 %v7389_v50  ;;  %v8295_v20 = vld [vmem:[#allocation25_spill] sm:$0xff] }
 0x7e1   :  { %3328 = vmatprep.subr.bf16.mxu0 %v7393_v51  ;;  %3369 = vmatprep.subr.bf16.mxu1 %v7395_v19  ;;  %v2503_v50 = vadd.f32 %v8295_v20, %v7579_v3  ;;  %v7850_v20 = vld [vmem:[#allocation8 + $0xc0] ss:$16 sps:$4 sm:$0xff]  }
 0x7e4   :  { %3329 = vmatpush1.bf16.msra.mxu0 %v7399_v52  ;;  %3370 = vmatpush1.bf16.msra.mxu1 %v7401_v61 }
 0x7e5   :  { %3330 = vmatprep.subr.bf16.mxu0 %v7407_v41  ;;  %3371 = vmatprep.subr.bf16.mxu1 %v7409_v7 }
 0x7e8   :  { %3331 = vmatpush1.bf16.msra.mxu0 %v7411_v22  ;;  %3372 = vmatpush1.bf16.msra.mxu1 %v7413_v49 }
 0x7e9   :  { %3332 = vmatprep.subr.bf16.mxu0 %v7420_v23  ;;  %3373 = vmatprep.subr.bf16.mxu1 %v7424_v28 }
 0x7ec   :  { %3333 = vmatpush1.bf16.msra.mxu0 %v7422_v27  ;;  %3374 = vmatpush1.bf16.msra.mxu1 %v7426_v0 }
 0x7ed   :  { %3334 = vmatprep.subr.bf16.mxu0 %v7428_v63  ;;  %3375 = vmatprep.subr.bf16.mxu1 %v7430_v24 }
 0x7f0   :  { %3335 = vmatpush1.bf16.msra.mxu0 %v7436_v1  ;;  %3376 = vmatpush1.bf16.msra.mxu1 %v7438_v38 }
 0x7f1   :  { %3336 = vmatprep.subr.bf16.mxu0 %v7442_v47  ;;  %3377 = vmatprep.subr.bf16.mxu1 %v7444_v12 }
 0x7f4   :  { %3337 = vmatpush1.bf16.msra.mxu0 %v7450_v13  ;;  %3378 = vmatpush1.bf16.msra.mxu1 %v7452_v45 }
 0x7f5   :  { %3437 = vmatprep.subr.bf16.mxu0 %v7758_v15  ;;  %3478 = vmatprep.subr.bf16.mxu1 %v7761_v10 }
 0x8aa   :  { %v3241_v51 = vpop.f32.mrb[96].mxu0  ;;  %v3282_v19 = vpop.f32.mrb[96].mxu1 }
 0x8ab   :  { %v3289_v52 = vadd.f32 %v3241_v51, %v2428_v8  ;;  %v3291_v61 = vadd.f32 %v3282_v19, %v2501_v62  ;;  %v3243_v41 = vpop.f32.mrb[97].mxu0  ;;  %v3284_v7 = vpop.f32.mrb[97].mxu1  ;;  %v7835_v8 = vld [vmem:[#allocation8 + $0xac] ss:$16 sps:$4 sm:$0xff]   ;;  %v7841_v62 = vld [vmem:[#allocation8 + $0xa8] ss:$16 sps:$4 sm:$0xff]  }
 0x8ac   :  { %v3290_v22 = vadd.f32 %v3243_v41, %v2430_v29  ;;  %v3292_v49 = vadd.f32 %v3284_v7, %v2503_v50  ;;  %v3245_v23 = vpop.f32.mrb[98].mxu0  ;;  %v3286_v27 = vpop.f32.mrb[98].mxu1  ;;  %v7847_v29 = vld [vmem:[#allocation8 + $0xcc] ss:$16 sps:$4 sm:$0xff]   ;;  %v7853_v50 = vld [vmem:[#allocation8 + $0xc8] ss:$16 sps:$4 sm:$0xff]  }
 0x8ad   :  { %v4577_v28 = vmul.f32 -1.442695, %v3289_v52  ;;  %v3246_v0 = vpop.f32.mrb[99].mxu0  ;;  %v3287_v63 = vpop.f32.mrb[99].mxu1  ;;  %v7856_v51 = vld [vmem:[#allocation8 + $0xe4] ss:$16 sps:$4 sm:$0xff]  }
 0x8ae   :  { %v4578_v24 = vmul.f32 -1.442695, %v3290_v22  ;;  %v4579_v1 = vmul.f32 -1.442695, %v3292_v49  ;;  %v7859_v19 = vld [vmem:[#allocation8 + $0xec] ss:$16 sps:$4 sm:$0xff]  }
 0x8af   :  { %5767 = vpow2.f32 %v4577_v28  ;;  %v7862_v52 = vld [vmem:[#allocation8 + $0xe0] ss:$16 sps:$4 sm:$0xff]   ;;  %v8296_v41 = vld [vmem:[#allocation29_spill] sm:$0xff] }
 0x8b0   :  { %5769 = vpow2.f32 %v4578_v24  ;;  %v2432_v7 = vadd.f32 %v8296_v41, %v7565_v46  ;;  %v8297_v22 = vld [vmem:[#allocation40_spill] sm:$0xff]  ;;  %v8298_v23 = vld [vmem:[#allocation41_spill] sm:$0xff]  ;;  %v8299_v28 = vld [vmem:[#allocation42_spill] sm:$0xff] }
 0x8b1   :  { %5771 = vpow2.f32 %v4579_v1  ;;  %v2505_v49 = vadd.f32 %v8297_v22, %v7569_v43  ;;  %v2434_v27 = vadd.f32 %v8298_v23, %v7575_v36  ;;  %v2507_v0 = vadd.f32 %v8299_v28, %v7579_v3 }
 0x8b2   :  { %5773 = vtanh.f32 %v3291_v61  ;;  %v7865_v61 = vld [vmem:[#allocation8 + $0xe8] ss:$16 sps:$4 sm:$0xff]  }
 0x8b9   :  { %v5768_v38 = vpop.eup %5767 }
 0x8ba   :  { %v5770_v47 = vpop.eup %5769  ;;  %v3296_v12 = vadd.f32 1.0, %v5768_v38 }
 0x8bb   :  { %v3302_v13 = vadd.f32 1.0, %v5770_v47  ;;  %v5772_v45 = vpop.eup %5771 }
 0x8bc   :  { %5775 = vrcp.f32 %v3296_v12  ;;  %v5774_v21 = vpop.eup %5773  ;;  %v3309_v59 = vadd.f32 1.0, %v5772_v45 }
 0x8bd   :  { %5777 = vrcp.f32 %v3302_v13 }
 0x8be   :  { %5779 = vrcp.f32 %v3309_v59 }
 0x8c6   :  { %v5776_v2 = vpop.eup %5775 }
 0x8c7   :  { %v5778_v56 = vpop.eup %5777  ;;  %v3313_v18 = vmul.f32 %v5776_v2, %v5774_v21 }
 0x8c8   :  { %v3312_v30 = vmul.f32 %v5778_v56, %v7723_v16  ;;  %v5780_v6 = vpop.eup %5779  ;;  %v7817_v16 = vld [vmem:[#allocation8 + $0x68] ss:$16 sps:$4 sm:$0xff]  }
 0x8ca   :  { %v7773_v53 = vadd.f32 %v3313_v18, %v3312_v30 }
 0x8cc   :  { %5781 = vtanh.f32 %v7773_v53 }
 0x8d6   :  { %v5782_v17 = vpop.eup %5781 }
 0x8d7   :  { %v3316_v11 = vmul.f32 %v5782_v17, %v5780_v6 }
 0x8d9   :  { %v3321_v40 = vpack.c.bf16 %v3316_v11, %v3316_v11 }
 0x8db   :  { %3355 = vmatmul.mubr.bf16.vlgmr.msra.gmra.mrb[100].mxu0 %v3321_v40  ;;  %3396 = vmatmul.mubr.bf16.vlgmr.msra.gmra.mrb[100].mxu1 %v3321_v40 }
 0x8dc   :  { %3438 = vmatpush1.bf16.msra.mxu0 %v7776_v42  ;;  %3479 = vmatpush1.bf16.msra.mxu1 %v7779_v57 }
 0x8dd   :  { %3439 = vmatprep.subr.bf16.mxu0 %v7782_v34  ;;  %3480 = vmatprep.subr.bf16.mxu1 %v7785_v25 }
 0x8de   :  { %3469 = vmatprep.mubr.bf16.mxu0 %v8254_v54  ;;  %3510 = vmatprep.mubr.bf16.mxu1 %v8254_v54 }
 0x8e0   :  { %3440 = vmatpush1.bf16.msra.mxu0 %v7790_v39  ;;  %3481 = vmatpush1.bf16.msra.mxu1 %v7793_v55 }
 0x8e1   :  { %3441 = vmatprep.subr.bf16.mxu0 %v7796_v35  ;;  %3482 = vmatprep.subr.bf16.mxu1 %v7799_v58 }
 0x8e4   :  { %3442 = vmatpush1.bf16.msra.mxu0 %v7802_v26  ;;  %3483 = vmatpush1.bf16.msra.mxu1 %v7805_v37 }
 0x8e5   :  { %3443 = vmatprep.subr.bf16.mxu0 %v7808_v5  ;;  %3484 = vmatprep.subr.bf16.mxu1 %v7811_v44 }
 0x8e8   :  { %3444 = vmatpush1.bf16.msra.mxu0 %v7814_v31  ;;  %3485 = vmatpush1.bf16.msra.mxu1 %v7817_v16 }
 0x8e9   :  { %3445 = vmatprep.subr.bf16.mxu0 %v7820_v9  ;;  %3486 = vmatprep.subr.bf16.mxu1 %v7823_v33 }
 0x8ec   :  { %3446 = vmatpush1.bf16.msra.mxu0 %v7826_v4  ;;  %3487 = vmatpush1.bf16.msra.mxu1 %v7829_v14 }
 0x8ed   :  { %3447 = vmatprep.subr.bf16.mxu0 %v7832_v48  ;;  %3488 = vmatprep.subr.bf16.mxu1 %v7835_v8 }
 0x8f0   :  { %3448 = vmatpush1.bf16.msra.mxu0 %v7838_v60  ;;  %3489 = vmatpush1.bf16.msra.mxu1 %v7841_v62 }
 0x8f1   :  { %3449 = vmatprep.subr.bf16.mxu0 %v7844_v32  ;;  %3490 = vmatprep.subr.bf16.mxu1 %v7847_v29 }
 0x8f4   :  { %3450 = vmatpush1.bf16.msra.mxu0 %v7850_v20  ;;  %3491 = vmatpush1.bf16.msra.mxu1 %v7853_v50 }
 0x8f5   :  { %3451 = vmatprep.subr.bf16.mxu0 %v7856_v51  ;;  %3492 = vmatprep.subr.bf16.mxu1 %v7859_v19 }
 0x8f8   :  { %3452 = vmatpush1.bf16.msra.mxu0 %v7862_v52  ;;  %3493 = vmatpush1.bf16.msra.mxu1 %v7865_v61 }
 0x8f9   :  { %3552 = vmatprep.subr.bf16.mxu0 %v7758_v15  ;;  %3593 = vmatprep.subr.bf16.mxu1 %v7761_v10 }
 0x9ae   :  { %v3356_v63 = vpop.f32.mrb[100].mxu0  ;;  %v3397_v24 = vpop.f32.mrb[100].mxu1 }
 0x9af   :  { %v3404_v1 = vadd.f32 %v3356_v63, %v2432_v7  ;;  %v3406_v38 = vadd.f32 %v3397_v24, %v2505_v49  ;;  %v3358_v47 = vpop.f32.mrb[101].mxu0  ;;  %v3399_v15 = vpop.f32.mrb[101].mxu1 }
 0x9b0   :  { %v3405_v12 = vadd.f32 %v3358_v47, %v2434_v27  ;;  %v3407_v10 = vadd.f32 %v3399_v15, %v2507_v0  ;;  %v3360_v13 = vpop.f32.mrb[102].mxu0  ;;  %v3401_v45 = vpop.f32.mrb[102].mxu1 }
 0x9b1   :  { %v4580_v21 = vmul.f32 -1.442695, %v3404_v1  ;;  %v3361_v2 = vpop.f32.mrb[103].mxu0  ;;  %v3402_v56 = vpop.f32.mrb[103].mxu1 }
 0x9b2   :  { %v4581_v18 = vmul.f32 -1.442695, %v3405_v12  ;;  %v4582_v59 = vmul.f32 -1.442695, %v3407_v10  ;;  %v5631_v56 = vld [vmem:[#allocation7] ss:$16 sps:$4 sm:$0xff]  }
 0x9b3   :  { %5783 = vpow2.f32 %v4580_v21 }
 0x9b4   :  { %5785 = vpow2.f32 %v4581_v18  ;;  %v5634_v18 = vld [vmem:[#allocation7 + $0x8] ss:$16 sps:$4 sm:$0xff]  }
 0x9b5   :  { %5787 = vpow2.f32 %v4582_v59 }
 0x9b6   :  { %5789 = vtanh.f32 %v3406_v38 }
 0x9bd   :  { %v5784_v30 = vpop.eup %5783 }
 0x9be   :  { %v5786_v6 = vpop.eup %5785  ;;  %v3411_v17 = vadd.f32 1.0, %v5784_v30  ;;  %v5639_v30 = vld [vmem:[#allocation7 + $0x24] ss:$16 sps:$4 sm:$0xff]  }
 0x9bf   :  { %v3417_v11 = vadd.f32 1.0, %v5786_v6  ;;  %v5788_v40 = vpop.eup %5787  ;;  %v5642_v6 = vld [vmem:[#allocation7 + $0x2c] ss:$16 sps:$4 sm:$0xff]  }
 0x9c0   :  { %5791 = vrcp.f32 %v3411_v17  ;;  %v5790_v41 = vpop.eup %5789  ;;  %v3424_v23 = vadd.f32 1.0, %v5788_v40  ;;  %v5637_v17 = vld [vmem:[#allocation7 + $0x20] ss:$16 sps:$4 sm:$0xff]   ;;  %v5645_v40 = vld [vmem:[#allocation7 + $0x44] ss:$16 sps:$4 sm:$0xff]  }
 0x9c1   :  { %5793 = vrcp.f32 %v3417_v11  ;;  %v5640_v11 = vld [vmem:[#allocation7 + $0x28] ss:$16 sps:$4 sm:$0xff]  }
 0x9c2   :  { %5795 = vrcp.f32 %v3424_v23  ;;  %v5654_v23 = vld [vmem:[#allocation7 + $0x6c] ss:$16 sps:$4 sm:$0xff]  }
 0x9ca   :  { %v5792_v7 = vpop.eup %5791 }
 0x9cb   :  { %v5794_v22 = vpop.eup %5793  ;;  %v3428_v49 = vmul.f32 %v5792_v7, %v5790_v41  ;;  %v5648_v41 = vld [vmem:[#allocation7 + $0x4c] ss:$16 sps:$4 sm:$0xff]   ;;  %v5643_v7 = vld [vmem:[#allocation7 + $0x40] ss:$16 sps:$4 sm:$0xff]  }
 0x9cc   :  { %v3427_v27 = vmul.f32 %v5794_v22, %v7773_v53  ;;  %v5796_v0 = vpop.eup %5795  ;;  %v5633_v53 = vld [vmem:[#allocation7 + $0x4] ss:$16 sps:$4 sm:$0xff]   ;;  %v5646_v22 = vld [vmem:[#allocation7 + $0x48] ss:$16 sps:$4 sm:$0xff]  }
 0x9ce   :  { %v7879_v28 = vadd.f32 %v3428_v49, %v3427_v27  ;;  %v5651_v49 = vld [vmem:[#allocation7 + $0x64] ss:$16 sps:$4 sm:$0xff]   ;;  %v5649_v27 = vld [vmem:[#allocation7 + $0x60] ss:$16 sps:$4 sm:$0xff]  }
 0x9d0   :  { %5797 = vtanh.f32 %v7879_v28 }
 0x9da   :  { %v5798_v63 = vpop.eup %5797 }
 0x9db   :  { %v3431_v24 = vmul.f32 %v5798_v63, %v5796_v0  ;;  %v5657_v0 = vld [vmem:[#allocation7 + $0x84] ss:$16 sps:$4 sm:$0xff]   ;;  %v5660_v63 = vld [vmem:[#allocation7 + $0x8c] ss:$16 sps:$4 sm:$0xff]  }
 0x9dd   :  { %v3436_v1 = vpack.c.bf16 %v3431_v24, %v3431_v24  ;;  %v5655_v24 = vld [vmem:[#allocation7 + $0x80] ss:$16 sps:$4 sm:$0xff]  }
 0x9df   :  { %3470 = vmatmul.mubr.bf16.vlgmr.msra.gmra.mrb[104].mxu0 %v3436_v1  ;;  %3511 = vmatmul.mubr.bf16.vlgmr.msra.gmra.mrb[104].mxu1 %v3436_v1  ;;  %v5663_v1 = vld [vmem:[#allocation7 + $0xa4] ss:$16 sps:$4 sm:$0xff]  }
 0x9e0   :  { %3553 = vmatpush1.bf16.msra.mxu0 %v7776_v42  ;;  %3594 = vmatpush1.bf16.msra.mxu1 %v7779_v57  ;;  %v5636_v42 = vld [vmem:[#allocation7 + $0xc] ss:$16 sps:$4 sm:$0xff]  }
 0x9e1   :  { %3554 = vmatprep.subr.bf16.mxu0 %v7782_v34  ;;  %3595 = vmatprep.subr.bf16.mxu1 %v7785_v25  ;;  %v8300_v57 = vld [vmem:[#allocation19_spill] sm:$0xff]  ;;  %v8301_v25 = vld [vmem:[#allocation20_spill] sm:$0xff] }
 0x9e2   :  { %3584 = vmatprep.mubr.bf16.mxu0 %v8254_v54  ;;  %3625 = vmatprep.mubr.bf16.mxu1 %v8254_v54  ;;  %v2438_v34 = vadd.f32 %v8300_v57, %v7565_v46  ;;  %v5664_v57 = vld [vmem:[#allocation7 + $0xa8] ss:$16 sps:$4 sm:$0xff]  }
 0x9e4   :  { %3555 = vmatpush1.bf16.msra.mxu0 %v7790_v39  ;;  %3596 = vmatpush1.bf16.msra.mxu1 %v7793_v55  ;;  %v2511_v39 = vadd.f32 %v8301_v25, %v7569_v43  ;;  %v8302_v55 = vld [vmem:[#allocation21_spill] sm:$0xff] }
 0x9e5   :  { %3556 = vmatprep.subr.bf16.mxu0 %v7796_v35  ;;  %3597 = vmatprep.subr.bf16.mxu1 %v7799_v58  ;;  %v2440_v35 = vadd.f32 %v8302_v55, %v7575_v36  ;;  %v8303_v58 = vld [vmem:[#allocation22_spill] sm:$0xff]  ;;  %v5672_v25 = vld [vmem:[#allocation7 + $0xcc] ss:$16 sps:$4 sm:$0xff]   ;;  %v5670_v55 = vld [vmem:[#allocation7 + $0xc8] ss:$16 sps:$4 sm:$0xff]  }
 0x9e8   :  { %3557 = vmatpush1.bf16.msra.mxu0 %v7802_v26  ;;  %3598 = vmatpush1.bf16.msra.mxu1 %v7805_v37  ;;  %v2513_v26 = vadd.f32 %v8303_v58, %v7579_v3  ;;  %v5678_v58 = vld [vmem:[#allocation7 + $0xec] ss:$16 sps:$4 sm:$0xff]  }
 0x9e9   :  { %3558 = vmatprep.subr.bf16.mxu0 %v7808_v5  ;;  %3599 = vmatprep.subr.bf16.mxu1 %v7811_v44 }
 0x9ec   :  { %3559 = vmatpush1.bf16.msra.mxu0 %v7814_v31  ;;  %3600 = vmatpush1.bf16.msra.mxu1 %v7817_v16 }
 0x9ed   :  { %3560 = vmatprep.subr.bf16.mxu0 %v7820_v9  ;;  %3601 = vmatprep.subr.bf16.mxu1 %v7823_v33 }
 0x9f0   :  { %3561 = vmatpush1.bf16.msra.mxu0 %v7826_v4  ;;  %3602 = vmatpush1.bf16.msra.mxu1 %v7829_v14 }
 0x9f1   :  { %3562 = vmatprep.subr.bf16.mxu0 %v7832_v48  ;;  %3603 = vmatprep.subr.bf16.mxu1 %v7835_v8 }
 0x9f4   :  { %3563 = vmatpush1.bf16.msra.mxu0 %v7838_v60  ;;  %3604 = vmatpush1.bf16.msra.mxu1 %v7841_v62 }
 0x9f5   :  { %3564 = vmatprep.subr.bf16.mxu0 %v7844_v32  ;;  %3605 = vmatprep.subr.bf16.mxu1 %v7847_v29 }
 0x9f8   :  { %3565 = vmatpush1.bf16.msra.mxu0 %v7850_v20  ;;  %3606 = vmatpush1.bf16.msra.mxu1 %v7853_v50 }
 0x9f9   :  { %3566 = vmatprep.subr.bf16.mxu0 %v7856_v51  ;;  %3607 = vmatprep.subr.bf16.mxu1 %v7859_v19 }
 0x9fc   :  { %3567 = vmatpush1.bf16.msra.mxu0 %v7862_v52  ;;  %3608 = vmatpush1.bf16.msra.mxu1 %v7865_v61 }
 0x9fd   :  { %3872 = vmatprep.subr.bf16.mxu0 %v5633_v53  ;;  %3912 = vmatprep.subr.bf16.mxu1 %v5636_v42  ;;  %v5666_v53 = vld [vmem:[#allocation7 + $0xac] ss:$16 sps:$4 sm:$0xff]   ;;  %v5661_v42 = vld [vmem:[#allocation7 + $0xa0] ss:$16 sps:$4 sm:$0xff]  }
 0xab2   :  { %v3471_v37 = vpop.f32.mrb[104].mxu0  ;;  %v3512_v5 = vpop.f32.mrb[104].mxu1 }
 0xab3   :  { %v3519_v44 = vadd.f32 %v3471_v37, %v2438_v34  ;;  %v3521_v31 = vadd.f32 %v3512_v5, %v2511_v39  ;;  %v3473_v16 = vpop.f32.mrb[105].mxu0  ;;  %v3514_v9 = vpop.f32.mrb[105].mxu1  ;;  %v5669_v34 = vld [vmem:[#allocation7 + $0xc4] ss:$16 sps:$4 sm:$0xff]   ;;  %v5667_v39 = vld [vmem:[#allocation7 + $0xc0] ss:$16 sps:$4 sm:$0xff]  }
 0xab4   :  { %v3520_v33 = vadd.f32 %v3473_v16, %v2440_v35  ;;  %v3522_v4 = vadd.f32 %v3514_v9, %v2513_v26  ;;  %v3475_v14 = vpop.f32.mrb[106].mxu0  ;;  %v3516_v48 = vpop.f32.mrb[106].mxu1  ;;  %v5675_v35 = vld [vmem:[#allocation7 + $0xe4] ss:$16 sps:$4 sm:$0xff]   ;;  %v5673_v26 = vld [vmem:[#allocation7 + $0xe0] ss:$16 sps:$4 sm:$0xff]  }
 0xab5   :  { %v4583_v8 = vmul.f32 -1.442695, %v3519_v44  ;;  %v3476_v60 = vpop.f32.mrb[107].mxu0  ;;  %v3517_v62 = vpop.f32.mrb[107].mxu1  ;;  %v5676_v37 = vld [vmem:[#allocation7 + $0xe8] ss:$16 sps:$4 sm:$0xff]  }
 0xab6   :  { %v4584_v32 = vmul.f32 -1.442695, %v3520_v33  ;;  %v4585_v29 = vmul.f32 -1.442695, %v3522_v4  ;;  %v8304_v5 = vld [vmem:[#allocation30_spill] sm:$0xff]  ;;  %v6132_v16 = vmov 0.0  }
 0xab7   :  { %5799 = vpow2.f32 %v4583_v8  ;;  %v3662_v44 = vpack.c.bf16 %v8304_v5, %v8304_v5  ;;  %v5680_v9 = vld [vmem:[#allocation10 + $0x8] sm:$0xff]   ;;  %v5681_v33 = vld [vmem:[#allocation10 + $0x10] sm:$0xff]   ;;  %v5682_v4 = vld [vmem:[#allocation10 + $0x18] sm:$0xff]  }
 0xab8   :  { %5801 = vpow2.f32 %v4584_v32  ;;  %v5683_v14 = vld [vmem:[#allocation10 + $0x20] sm:$0xff]   ;;  %v5684_v48 = vld [vmem:[#allocation10 + $0x28] sm:$0xff]   ;;  %v5685_v8 = vld [vmem:[#allocation10 + $0x30] sm:$0xff]  }
 0xab9   :  { %5803 = vpow2.f32 %v4585_v29  ;;  %v5686_v60 = vld [vmem:[#allocation11] sm:$0xff]   ;;  %v5687_v62 = vld [vmem:[#allocation10 + $0x38] sm:$0xff]   ;;  %v5688_v32 = vld [vmem:[#allocation11 + $0x8] sm:$0xff]  }
 0xaba   :  { %5805 = vtanh.f32 %v3521_v31  ;;  %v5679_v31 = vld [vmem:[#allocation10] sm:$0xff]   ;;  %v5689_v29 = vld [vmem:[#allocation11 + $0x10] sm:$0xff]  }
 0xac1   :  { %v5800_v20 = vpop.eup %5799 }
 0xac2   :  { %v5802_v50 = vpop.eup %5801  ;;  %v3526_v51 = vadd.f32 1.0, %v5800_v20  ;;  %v5690_v20 = vld [vmem:[#allocation11 + $0x18] sm:$0xff]  }
 0xac3   :  { %v3532_v19 = vadd.f32 1.0, %v5802_v50  ;;  %v5804_v52 = vpop.eup %5803  ;;  %v5691_v50 = vld [vmem:[#allocation11 + $0x20] sm:$0xff]  }
 0xac4   :  { %5807 = vrcp.f32 %v3526_v51  ;;  %v5806_v61 = vpop.eup %5805  ;;  %v3539_v12 = vadd.f32 1.0, %v5804_v52  ;;  %v5692_v51 = vld [vmem:[#allocation11 + $0x28] sm:$0xff]   ;;  %v5694_v52 = vld [vmem:[#allocation11 + $0x38] sm:$0xff]  }
 0xac5   :  { %5809 = vrcp.f32 %v3532_v19  ;;  %v5693_v19 = vld [vmem:[#allocation11 + $0x30] sm:$0xff]  }
 0xac6   :  { %5811 = vrcp.f32 %v3539_v12  ;;  %v8307_v12 = vld [vmem:[#allocation26_spill] sm:$0xff] }
 0xace   :  { %v5808_v38 = vpop.eup %5807 }
 0xacf   :  { %v5810_v47 = vpop.eup %5809  ;;  %v3543_v15 = vmul.f32 %v5808_v38, %v5806_v61  ;;  %v8305_v61 = vld [vmem:[#allocation23_spill] sm:$0xff] }
 0xad0   :  { %v3542_v10 = vmul.f32 %v5810_v47, %v7879_v28  ;;  %v5812_v45 = vpop.eup %5811  ;;  %v5652_v28 = vld [vmem:[#allocation7 + $0x68] ss:$16 sps:$4 sm:$0xff]   ;;  %v2442_v38 = vadd.f32 %v8305_v61, %v7565_v46  ;;  %v8306_v47 = vld [vmem:[#allocation24_spill] sm:$0xff] }
 0xad2   :  { %v7923_v13 = vadd.f32 %v3543_v15, %v3542_v10  ;;  %v2515_v15 = vadd.f32 %v8306_v47, %v7569_v43  ;;  %v2444_v10 = vadd.f32 %v8307_v12, %v7575_v36 }
 0xad4   :  { %5813 = vtanh.f32 %v7923_v13 }
 0xade   :  { %v5814_v21 = vpop.eup %5813 }
 0xadf   :  { %v3546_v2 = vmul.f32 %v5814_v21, %v5812_v45  ;;  %v8308_v45 = vld [vmem:[#allocation27_spill] sm:$0xff] }
 0xae0   :  { %v2517_v21 = vadd.f32 %v8308_v45, %v7579_v3 }
 0xae1   :  { %v3551_v59 = vpack.c.bf16 %v3546_v2, %v3546_v2 }
 0xae3   :  { %3585 = vmatmul.mubr.bf16.vlgmr.msra.gmra.mrb[108].mxu0 %v3551_v59  ;;  %3626 = vmatmul.mubr.bf16.vlgmr.msra.gmra.mrb[108].mxu1 %v3551_v59 }
 0xae4   :  { %3873 = vmatpush1.bf16.msra.mxu0 %v5631_v56  ;;  %3913 = vmatpush1.bf16.msra.mxu1 %v5634_v18 }
 0xae5   :  { %3874 = vmatprep.subr.bf16.mxu0 %v5639_v30  ;;  %3914 = vmatprep.subr.bf16.mxu1 %v5642_v6 }
 0xae6   :  { %3904 = vmatprep.mubr.bf16.mxu0 %v8254_v54  ;;  %3944 = vmatprep.mubr.bf16.mxu1 %v8254_v54  ;;  %v5658_v54 = vld [vmem:[#allocation7 + $0x88] ss:$16 sps:$4 sm:$0xff]  }
 0xae8   :  { %3875 = vmatpush1.bf16.msra.mxu0 %v5637_v17  ;;  %3915 = vmatpush1.bf16.msra.mxu1 %v5640_v11 }
 0xae9   :  { %3876 = vmatprep.subr.bf16.mxu0 %v5645_v40  ;;  %3916 = vmatprep.subr.bf16.mxu1 %v5648_v41 }
 0xaec   :  { %3877 = vmatpush1.bf16.msra.mxu0 %v5643_v7  ;;  %3917 = vmatpush1.bf16.msra.mxu1 %v5646_v22 }
 0xaed   :  { %3878 = vmatprep.subr.bf16.mxu0 %v5651_v49  ;;  %3918 = vmatprep.subr.bf16.mxu1 %v5654_v23 }
 0xaf0   :  { %3879 = vmatpush1.bf16.msra.mxu0 %v5649_v27  ;;  %3919 = vmatpush1.bf16.msra.mxu1 %v5652_v28 }
 0xaf1   :  { %3880 = vmatprep.subr.bf16.mxu0 %v5657_v0  ;;  %3920 = vmatprep.subr.bf16.mxu1 %v5660_v63  ;;  %v3695_v0 = vld [vmem:[%s7992_s5] sm:$0xf] }
 0xaf4   :  { %3881 = vmatpush1.bf16.msra.mxu0 %v5655_v24  ;;  %3921 = vmatpush1.bf16.msra.mxu1 %v5658_v54 }
 0xaf5   :  { %3882 = vmatprep.subr.bf16.mxu0 %v5663_v1  ;;  %3922 = vmatprep.subr.bf16.mxu1 %v5666_v53 }
 0xaf8   :  { %3883 = vmatpush1.bf16.msra.mxu0 %v5661_v42  ;;  %3923 = vmatpush1.bf16.msra.mxu1 %v5664_v57  ;;  %v8309_v42 = vld [vmem:[#allocation43_spill] sm:$0xff] }
 0xaf9   :  { %3884 = vmatprep.subr.bf16.mxu0 %v5669_v34  ;;  %3924 = vmatprep.subr.bf16.mxu1 %v5672_v25  ;;  %v8310_v57 = vsub.s32 0, %v8309_v42 }
 0xafb   :  { %v3700_v34 = vrot.slane %v3695_v0, %v8310_v57 }
 0xafc   :  { %3885 = vmatpush1.bf16.msra.mxu0 %v5667_v39  ;;  %3925 = vmatpush1.bf16.msra.mxu1 %v5670_v55 }
 0xafd   :  { %3886 = vmatprep.subr.bf16.mxu0 %v5675_v35  ;;  %3926 = vmatprep.subr.bf16.mxu1 %v5678_v58 }
 0xb00   :  { %3887 = vmatpush1.bf16.msra.mxu0 %v5673_v26  ;;  %3927 = vmatpush1.bf16.msra.mxu1 %v5676_v37  ;;  %v8311_v37 = vsub.s32 3, %v8309_v42 }
 0xb01   :  { %5400 = vmatprep.subr.bf16.mxu1 %v6132_v16  ;;  %5380 = vmatprep.subr.bf16.mxu0 %v6132_v16 }
 0xb02   :  { %v3708_v5 = vrot.slane %v3695_v0, %v8311_v37 }
 0xb03   :  { %3905 = vmatmul.mubr.bf16.vlgmr.msra.gmra.mrb[112].mxu0 %v3662_v44  ;;  %3945 = vmatmul.mubr.bf16.vlgmr.msra.gmra.mrb[112].mxu1 %v3662_v44 }
 0xb04   :  { %5401 = vmatpush3.bf16.msra.mxu1 %v5679_v31  ;;  %5381 = vmatpush3.bf16.msra.mxu0 %v5686_v60 }
 0xb05   :  { %5402 = vmatprep.subr.bf16.mxu1 %v6132_v16  ;;  %5382 = vmatprep.subr.bf16.mxu0 %v6132_v16 }
 0xb06   :  { %5416 = vmatprep.mubr.msk.bf16.mxu1 %vm6133_vm0, %v6132_v16  ;;  %5396 = vmatprep.mubr.msk.bf16.mxu0 %vm6133_vm0, %v6132_v16 }
 0xb08   :  { %5403 = vmatpush3.bf16.msra.mxu1 %v5680_v9  ;;  %5383 = vmatpush3.bf16.msra.mxu0 %v5688_v32 }
 0xb09   :  { %5404 = vmatprep.subr.bf16.mxu1 %v6132_v16  ;;  %5384 = vmatprep.subr.bf16.mxu0 %v6132_v16 }
 0xb0c   :  { %5405 = vmatpush3.bf16.msra.mxu1 %v5681_v33  ;;  %5385 = vmatpush3.bf16.msra.mxu0 %v5689_v29 }
 0xb0d   :  { %5406 = vmatprep.subr.bf16.mxu1 %v6132_v16  ;;  %5386 = vmatprep.subr.bf16.mxu0 %v6132_v16 }
 0xb10   :  { %5407 = vmatpush3.bf16.msra.mxu1 %v5682_v4  ;;  %5387 = vmatpush3.bf16.msra.mxu0 %v5690_v20 }
 0xb11   :  { %5408 = vmatprep.subr.bf16.mxu1 %v6132_v16  ;;  %5388 = vmatprep.subr.bf16.mxu0 %v6132_v16 }
 0xb14   :  { %5409 = vmatpush3.bf16.msra.mxu1 %v5683_v14  ;;  %5389 = vmatpush3.bf16.msra.mxu0 %v5691_v50 }
 0xb15   :  { %5410 = vmatprep.subr.bf16.mxu1 %v6132_v16  ;;  %5390 = vmatprep.subr.bf16.mxu0 %v6132_v16 }
 0xb18   :  { %5411 = vmatpush3.bf16.msra.mxu1 %v5684_v48  ;;  %5391 = vmatpush3.bf16.msra.mxu0 %v5692_v51 }
 0xb19   :  { %5412 = vmatprep.subr.bf16.mxu1 %v6132_v16  ;;  %5392 = vmatprep.subr.bf16.mxu0 %v6132_v16 }
 0xb1c   :  { %5413 = vmatpush3.bf16.msra.mxu1 %v5685_v8  ;;  %5393 = vmatpush3.bf16.msra.mxu0 %v5693_v19 }
 0xb1d   :  { %5414 = vmatprep.subr.bf16.mxu1 %v6132_v16  ;;  %5394 = vmatprep.subr.bf16.mxu0 %v6132_v16 }
 0xb20   :  { %5415 = vmatpush3.bf16.msra.mxu1 %v5687_v62  ;;  %5395 = vmatpush3.bf16.msra.mxu0 %v5694_v52 }
 0xb21   :  { %5420 = vmatprep.subr.bf16.mxu0 %v6132_v16 }
 0xbb6   :  { %v3586_v2 = vpop.f32.mrb[108].mxu0  ;;  %v3627_v56 = vpop.f32.mrb[108].mxu1 }
 0xbb7   :  { %v3634_v18 = vadd.f32 %v3586_v2, %v2442_v38  ;;  %v3636_v59 = vadd.f32 %v3627_v56, %v2515_v15  ;;  %v3588_v30 = vpop.f32.mrb[109].mxu0  ;;  %v3629_v6 = vpop.f32.mrb[109].mxu1  ;;  %v5695_v2 = vld [vmem:[#allocation13] sm:$0xff]   ;;  %v5696_v56 = vld [vmem:[#allocation13 + $0x8] sm:$0xff]  }
 0xbb8   :  { %v3635_v17 = vadd.f32 %v3588_v30, %v2444_v10  ;;  %v3637_v11 = vadd.f32 %v3629_v6, %v2517_v21  ;;  %v3590_v40 = vpop.f32.mrb[110].mxu0  ;;  %v3631_v41 = vpop.f32.mrb[110].mxu1  ;;  %v5699_v30 = vld [vmem:[#allocation13 + $0x20] sm:$0xff]   ;;  %v5700_v6 = vld [vmem:[#allocation13 + $0x28] sm:$0xff]  }
 0xbb9   :  { %v4586_v46 = vmul.f32 -1.442695, %v3634_v18  ;;  %v3591_v7 = vpop.f32.mrb[111].mxu0  ;;  %v3632_v22 = vpop.f32.mrb[111].mxu1  ;;  %v5697_v18 = vld [vmem:[#allocation13 + $0x10] sm:$0xff]  }
 0xbba   :  { %v4587_v43 = vmul.f32 -1.442695, %v3635_v17  ;;  %v4588_v36 = vmul.f32 -1.442695, %v3637_v11  ;;  %v5701_v17 = vld [vmem:[#allocation13 + $0x30] sm:$0xff]   ;;  %v5702_v11 = vld [vmem:[#allocation13 + $0x38] sm:$0xff]  }
 0xbbb   :  { %5815 = vpow2.f32 %v4586_v46 }
 0xbbc   :  { %5817 = vpow2.f32 %v4587_v43  ;;  %v4639_v43 = vld [vmem:[%s7996_s9] ss:$0 sm:$0xff] }
 0xbbd   :  { %5819 = vpow2.f32 %v4588_v36 }
 0xbbe   :  { %5821 = vtanh.f32 %v3636_v59  ;;  %v5698_v59 = vld [vmem:[#allocation13 + $0x18] sm:$0xff]  }
 0xbc5   :  { %v5816_v49 = vpop.eup %5815 }
 0xbc6   :  { %v5818_v23 = vpop.eup %5817  ;;  %v3641_v3 = vadd.f32 1.0, %v5816_v49 }
 0xbc7   :  { %v3647_v27 = vadd.f32 1.0, %v5818_v23  ;;  %v5820_v28 = vpop.eup %5819 }
 0xbc8   :  { %5823 = vrcp.f32 %v3641_v3  ;;  %v5822_v63 = vpop.eup %5821  ;;  %v3654_v53 = vadd.f32 1.0, %v5820_v28 }
 0xbc9   :  { %5825 = vrcp.f32 %v3647_v27 }
 0xbca   :  { %5827 = vrcp.f32 %v3654_v53 }
 0xbd2   :  { %v5824_v24 = vpop.eup %5823 }
 0xbd3   :  { %v5826_v54 = vpop.eup %5825  ;;  %v3658_v1 = vmul.f32 %v5824_v24, %v5822_v63 }
 0xbd4   :  { %v3657_v25 = vmul.f32 %v5826_v54, %v7923_v13  ;;  %v8312_v13 = vsub.s32 2, %v8309_v42  ;;  %v5828_v62 = vpop.eup %5827 }
 0xbd6   :  { %v3659_v39 = vadd.f32 %v3658_v1, %v3657_v25  ;;  %v3906_v55 = vpop.f32.mrb[112].mxu0  ;;  %v3946_v35 = vpop.f32.mrb[112].mxu1  ;;  %v3704_v8 = vrot.slane %v3695_v0, %v8312_v13 }
 0xbd7   :  { %v3907_v58 = vadd.f32 %v3906_v55, %v3700_v34  ;;  %v3908_v26 = vpop.f32.mrb[113].mxu0  ;;  %v3948_v44 = vpop.f32.mrb[113].mxu1 }
 0xbd8   :  { %5829 = vtanh.f32 %v3659_v39  ;;  %v3909_v31 = vpop.f32.mrb[114].mxu0  ;;  %v3950_v9 = vpop.f32.mrb[114].mxu1  ;;  %v3949_v48 = vadd.f32 %v3948_v44, %v3708_v5  ;;  %v3947_v29 = vadd.f32 %v3946_v35, %v3704_v8 }
 0xbd9   :  { %v4621_v33 = vmul.f32 -1.442695, %v3907_v58  ;;  %v3910_v4 = vpop.f32.mrb[115].mxu0  ;;  %v3951_v14 = vpop.f32.mrb[115].mxu1 }
 0xbda   :  { %v4622_v60 = vmul.f32 -1.442695, %v3949_v48 }
 0xbdb   :  { %5831 = vpow2.f32 %v4621_v33 }
 0xbdc   :  { %5833 = vpow2.f32 %v4622_v60 }
 0xbdd   :  { %5835 = vtanh.f32 %v3947_v29 }
 0xbe2   :  { %v5830_v32 = vpop.eup %5829 }
 0xbe3   :  { %v3661_v20 = vmul.f32 %v5830_v32, %v5828_v62 }
 0xbe5   :  { %v5832_v50 = vpop.eup %5831  ;;  %v3969_v51 = vpack.c.bf16 %v3661_v20, %v3661_v20 }
 0xbe6   :  { %v3956_v19 = vadd.f32 1.0, %v5832_v50  ;;  %v5834_v52 = vpop.eup %5833 }
 0xbe7   :  { %5417 = vmatmul.mubr.bf16.vlgmr.msra.gmra.mrb[116].mxu1 %v3969_v51  ;;  %v3963_v61 = vadd.f32 1.0, %v5834_v52  ;;  %v5836_v38 = vpop.eup %5835 }
 0xbe8   :  { %5837 = vrcp.f32 %v3956_v19 }
 0xbe9   :  { %5839 = vrcp.f32 %v3963_v61 }
 0xbf2   :  { %v5838_v47 = vpop.eup %5837 }
 0xbf3   :  { %v3966_v15 = vmul.f32 %v5838_v47, %v5836_v38  ;;  %v5840_v12 = vpop.eup %5839 }
 0xbf5   :  { %5841 = vtanh.f32 %v3966_v15 }
 0xbff   :  { %v5842_v10 = vpop.eup %5841 }
 0xc00   :  { %v3968_v45 = vmul.f32 %v5842_v10, %v5840_v12 }
 0xc02   :  { %v3986_v21 = vpack.c.bf16 %v3968_v45, %v3968_v45 }
 0xc04   :  { %5397 = vmatmul.mubr.bf16.vlgmr.msra.gmra.mrb[116].mxu0 %v3986_v21 }
 0xc05   :  { %5436 = vmatprep.mubr.msk.bf16.mxu0 %vm6133_vm0, %v6132_v16  ;;  %5421 = vmatpush3.bf16.msra.mxu0 %v5695_v2 }
 0xc06   :  { %5422 = vmatprep.subr.bf16.mxu0 %v6132_v16 }
 0xc09   :  { %5423 = vmatpush3.bf16.msra.mxu0 %v5696_v56 }
 0xc0a   :  { %5424 = vmatprep.subr.bf16.mxu0 %v6132_v16 }
 0xc0d   :  { %5425 = vmatpush3.bf16.msra.mxu0 %v5697_v18 }
 0xc0e   :  { %5426 = vmatprep.subr.bf16.mxu0 %v6132_v16 }
 0xc11   :  { %5427 = vmatpush3.bf16.msra.mxu0 %v5698_v59 }
 0xc12   :  { %5428 = vmatprep.subr.bf16.mxu0 %v6132_v16 }
 0xc15   :  { %5429 = vmatpush3.bf16.msra.mxu0 %v5699_v30 }
 0xc16   :  { %5430 = vmatprep.subr.bf16.mxu0 %v6132_v16 }
 0xc19   :  { %5431 = vmatpush3.bf16.msra.mxu0 %v5700_v6 }
 0xc1a   :  { %5432 = vmatprep.subr.bf16.mxu0 %v6132_v16 }
 0xc1d   :  { %5433 = vmatpush3.bf16.msra.mxu0 %v5701_v17 }
 0xc1e   :  { %5434 = vmatprep.subr.bf16.mxu0 %v6132_v16  ;;  %v4640_v16 = vld [vmem:[%s7998_s11] ss:$0 sm:$0xff] }
 0xc21   :  { %5435 = vmatpush3.bf16.msra.mxu0 %v5702_v11 }
 0xcba   :  { %v4173_v40 = vpop.f32.mrb[116].mxu1 }
 0xcbb   :  { %v5418_v41 = vpop.f32.mrb[117].mxu1 }
 0xcbc   :  { %v4176_v46 = vpop.f32.mrb[118].mxu1 }
 0xcbd   :  { %v5419_v7 = vpop.f32.mrb[119].mxu1 }
 0xcd7   :  { %v4085_v22 = vpop.f32.mrb[116].mxu0 }
 0xcd8   :  { %v4174_v36 = vadd.f32 %v4173_v40, %v4085_v22  ;;  %v5398_v49 = vpop.f32.mrb[117].mxu0 }
 0xcd9   :  { %v4088_v23 = vpop.f32.mrb[118].mxu0 }
 0xcda   :  { %v4186_v3 = vadd.f32 %v4639_v43, %v4174_v36  ;;  %v5399_v27 = vpop.f32.mrb[119].mxu0 }
 0xcdc   :  { %v4187_v28 = vmax.f32 %v4186_v3, 0.0 }
 0xcde   :  { %v4188_v0 = vpack.c.bf16 %v4187_v28, %v4187_v28 }
 0xce0   :  { %5437 = vmatmul.mubr.bf16.vlgmr.msra.gmra.mrb[120].mxu0 %v4188_v0 }
 0xdb3   :  { %v4294_v63 = vpop.f32.mrb[120].mxu0 }
 0xdb4   :  { %v4295_v24 = vadd.f32 %v4640_v16, %v4294_v63  ;;  %v5438_v54 = vpop.f32.mrb[121].mxu0 }
 0xdb5   :  { %v4297_v1 = vpop.f32.mrb[122].mxu0 }
 0xdb6   :  { %4300 = vst [vmem:[%s7999_s12] sm:$0xff] %v4295_v24  ;;  %v5439_v53 = vpop.f32.mrb[123].mxu0 }
 0xdb7   :  { %4305 = vsyncpa [#allocation4], 1 }
 0xdb8   :  { %4306 = vsyncpa [#allocation6], 1 }
 0xdb9   :  { %4307 = vsyncpa [#allocation9], 1 }
 0xdba   :  { %4308 = vsyncpa [#allocation12], 1 }

</bundles_post_ra>
